<compile_context>
chip_gen: v7x
topology: tpu7x:2x2x1
jax: 0.10.0
libtpu: 0.0.40
codegen_flags: <defaults>
</compile_context>

<pallas_src>
import functools
import math

import numpy as np
import jax
import jax.numpy as jnp
from jax.experimental import pallas as pl
from jax.experimental.pallas import tpu as pltpu

# ---------------- configuration (small, consistent with the module) ----------------
DIM = 32         # model dim
DEPTH = 2        # number of layers
HEADS = 2
DIM_HEADS = 16
MLP_DIM = 64
INNER = HEADS * DIM_HEADS
B = 2            # batch
END_X = END_Y = 4
N = END_X * END_Y   # 16 tokens (4x4 grid for the 2-D RoPE coordinates)
LN_EPS = 1e-5
SCALE = DIM_HEADS ** -0.5
NEG_BIG = -1e30  # additive mask for cross-batch attention blocks


# ---------------- in-kernel helpers ----------------
def _layernorm(x, g, b):
    mu = jnp.mean(x, axis=-1, keepdims=True)
    xc = x - mu
    var = jnp.mean(xc * xc, axis=-1, keepdims=True)
    return xc * jax.lax.rsqrt(var + LN_EPS) * g + b


def _gelu_erf(x):
    # Exact-GELU via Abramowitz & Stegun 7.1.26 erf (|abs err| <= 1.5e-7).
    # The divide uses the EUP approx reciprocal + ONE Newton step (near f32-exact),
    # so the multi-instruction VALU Newton sequence of an exact divide is avoided.
    a1, a2, a3, a4, a5 = 0.254829592, -0.284496736, 1.421413741, -1.453152027, 1.061405429
    p = 0.3275911
    z = x * (1.0 / math.sqrt(2.0))
    s = jnp.where(z < 0.0, -1.0, 1.0)
    az = jnp.abs(z)
    den = 1.0 + p * az
    t = pl.reciprocal(den, approx=True)
    t = t * (2.0 - den * t)                 # one Newton step -> ~exact 1/den
    poly = ((((a5 * t + a4) * t + a3) * t + a2) * t + a1) * t
    erf = s * (1.0 - poly * jnp.exp(-az * az))
    return 0.5 * x * (1.0 + erf)


# ---------------- fused Pallas kernel (whole transformer forward) ----------------
def fused_transformer_kernel(x_ref, bias_ref, ln1g_ref, ln1b_ref, wbig_ref, cos_ref, sin_ref,
                             wout_ref, bout_ref, ln2g_ref, ln2b_ref,
                             w1_ref, b1_ref, w2_ref, b2_ref,
                             xs_ref, *, depth, heads, dh):
    inner = heads * dh
    dn = (((1,), (1,)), ((), ()))          # contract last dims: (M,K) x (N,K) -> (M,N)

    x = x_ref[...]                          # (B*N, D) residual, resident across all layers
    bias = bias_ref[...]                    # (B*N, B*N) block-diagonal additive mask

    for l in range(depth):                  # static unrolled layer loop (DEPTH=2)
        # ---------------- attention block ----------------
        xn = _layernorm(x, ln1g_ref[l], ln1b_ref[l])
        # One projection: columns are [q | rot_half(q) | k | rot_half(k) | v].
        # q/k columns are pre-permuted to head-contiguous [re(8)|im(8)] layout, the
        # RoPE rotate-half is pre-folded into the extra weight columns, and the softmax
        # scale is pre-folded into the q columns (prep time, zero kernel cost).
        proj = jnp.dot(xn, wbig_ref[l], preferred_element_type=jnp.float32)   # (B*N, 5*inner)
        cs = cos_ref[l]                     # (B*N, inner), cos duplicated across re/im halves
        sn = sin_ref[l]
        q_rot = proj[:, 0:inner] * cs + proj[:, inner:2 * inner] * sn
        k_rot = proj[:, 2 * inner:3 * inner] * cs + proj[:, 3 * inner:4 * inner] * sn
        v = proj[:, 4 * inner:5 * inner]    # lane-tile-aligned slice (offset 128)

        out = bout_ref[l]                   # (1, D): start the accumulation from the bias
        for h in range(heads):
            c0, c1 = h * dh, (h + 1) * dh
            # Full-slab (B*N, B*N) logits per head, single K=dh contraction; cross-batch
            # blocks get -1e30 so exp underflows to exactly 0 -> per-batch attention.
            dots = jax.lax.dot_general(q_rot[:, c0:c1], k_rot[:, c0:c1], dn,
                                       preferred_element_type=jnp.float32) + bias
            m = jnp.max(dots, axis=-1, keepdims=True)
            e = jnp.exp(dots - m)
            attn = e * pl.reciprocal(jnp.sum(e, axis=-1, keepdims=True), approx=True)
            ho = jnp.dot(attn, v[:, c0:c1], preferred_element_type=jnp.float32)  # (B*N, dh)
            out = out + jnp.dot(ho, wout_ref[l * heads + h],
                                preferred_element_type=jnp.float32)              # (B*N, D)
        x = x + out                         # residual (out already includes bout)

        # ---------------- MLP block ----------------
        xn2 = _layernorm(x, ln2g_ref[l], ln2b_ref[l])
        hdd = jnp.dot(xn2, w1_ref[l], preferred_element_type=jnp.float32) + b1_ref[l]
        hdd = _gelu_erf(hdd)                # exact (erf) GELU
        x = x + jnp.dot(hdd, w2_ref[l], preferred_element_type=jnp.float32) + b2_ref[l]

        # ---------------- per-layer residual (only output) ----------------
        xs_ref[l] = x                       # one full-slab store per layer


# ---------------- one-time (init-time) parameter preparation ----------------
def prepare_fused_params(layers, cos, sin):
    """Host-side constant prep, hoisted out of the forward:
      * q/k columns permuted to head-contiguous [re(8)|im(8)] layout,
      * rotate-half of q/k folded into extra weight columns (so RoPE is 2 mul + 1 add
        on full slabs, no lane slicing/concat in the kernel),
      * softmax scale folded into the q columns only,
      * wout reshaped per-head for the partial-sum out projection,
      * cos/sin pre-tiled to (DEPTH, B*N, INNER) matching the layout,
      * block-diagonal additive attention bias precomputed."""
    half = DIM_HEADS // 2
    # within-head permutation: interleaved [re0,im0,re1,im1,...] -> [re(8) | im(8)]
    perm_head = np.concatenate([2 * np.arange(half), 2 * np.arange(half) + 1])
    perm = np.concatenate([h * DIM_HEADS + perm_head for h in range(HEADS)])
    # rotate-half in the permuted layout: [re|im] -> [-im|re]  (column permutation + sign)
    rh_perm_head = np.concatenate([half + np.arange(half), np.arange(half)])
    rh_perm = np.concatenate([h * DIM_HEADS + rh_perm_head for h in range(HEADS)])
    rh_sign = np.tile(np.concatenate([-np.ones(half, np.float32),
                                      np.ones(half, np.float32)]), HEADS)

    def big_w(wqkv):
        wq = wqkv[:, :INNER][:, perm] * SCALE         # scale folded into q ONLY
        wk = wqkv[:, INNER:2 * INNER][:, perm]
        wv = wqkv[:, 2 * INNER:]                      # v keeps original 'b n (h d)' layout
        wq_rh = wq[:, rh_perm] * rh_sign              # inherits the q scale
        wk_rh = wk[:, rh_perm] * rh_sign
        return jnp.concatenate([wq, wq_rh, wk, wk_rh, wv], axis=-1)   # (DIM, 5*INNER)

    stack = lambda name: jnp.stack([p[name] for p in layers])

    def tile_cs(t):   # (DEPTH, H, N, half) -> (DEPTH, B*N, INNER): per head [vals | vals]
        t2 = jnp.concatenate([t, t], axis=-1)                     # (DEPTH, H, N, dh)
        t2 = jnp.transpose(t2, (0, 2, 1, 3)).reshape(DEPTH, N, INNER)
        return jnp.tile(t2, (1, B, 1))

    # block-diagonal additive bias: 0 within batch, -1e30 across batches
    block = np.kron(np.eye(B, dtype=np.float32), np.ones((N, N), np.float32))
    attn_bias = jnp.asarray((1.0 - block) * NEG_BIG, dtype=jnp.float32)

    wout = jnp.stack([p["wout"].reshape(HEADS, DIM_HEADS, DIM) for p in layers])
    wout = wout.reshape(DEPTH * HEADS, DIM_HEADS, DIM)            # index with l*HEADS+h

    return dict(
        attn_bias=attn_bias,
        ln1_g=stack("ln1_g"), ln1_b=stack("ln1_b"),
        wbig=jnp.stack([big_w(p["wqkv"]) for p in layers]),
        cos=tile_cs(cos), sin=tile_cs(sin),
        wout=wout, bout=stack("bout"),
        ln2_g=stack("ln2_g"), ln2_b=stack("ln2_b"),
        w1=stack("w1"), b1=stack("b1"), w2=stack("w2"), b2=stack("b2"),
    )


# ---------------- pallas_call wrapper (single launch for the whole forward) ----------------
def rope_transformer_forward(x, fp):
    bsz, n, d = x.shape
    bn = bsz * n
    x2 = x.reshape(bn, d)                  # fold batch into the matmul M-dimension

    kernel = functools.partial(fused_transformer_kernel,
                               depth=DEPTH, heads=HEADS, dh=DIM_HEADS)

    args = (x2, fp["attn_bias"], fp["ln1_g"], fp["ln1_b"], fp["wbig"], fp["cos"], fp["sin"],
            fp["wout"], fp["bout"], fp["ln2_g"], fp["ln2_b"],
            fp["w1"], fp["b1"], fp["w2"], fp["b2"])

    # Advisory cost estimate for XLA scheduling around the custom call.
    flops = DEPTH * (2 * bn * d * 5 * INNER                 # fused projection
                     + HEADS * 2 * bn * bn * DIM_HEADS      # block-diag logits
                     + HEADS * 2 * bn * bn * DIM_HEADS      # attn @ v
                     + HEADS * 2 * bn * DIM_HEADS * d       # per-head out-proj partial sums
                     + 4 * bn * d * MLP_DIM)                # MLP up + down
    transc = DEPTH * (HEADS * bn * bn + bn * MLP_DIM)       # softmax exp + GELU exp
    in_bytes = sum(int(a.size) * a.dtype.itemsize for a in args)
    out_bytes = DEPTH * bn * d * 4

    vspec = pl.BlockSpec(memory_space=pltpu.MemorySpace.VMEM)   # whole array resident in VMEM

    xs = pl.pallas_call(
        kernel,
        out_shape=jax.ShapeDtypeStruct((DEPTH, bn, d), x.dtype),
        in_specs=[vspec] * len(args),
        out_specs=vspec,
        compiler_params=pltpu.CompilerParams(vmem_limit_bytes=32 * 1024 * 1024),
        cost_estimate=pl.CostEstimate(flops=flops, transcendentals=transc,
                                      bytes_accessed=in_bytes + out_bytes),
    )(*args)

    xs_b = xs.reshape(DEPTH, bsz, n, d)
    out = xs_b[DEPTH - 1]                                   # final residual == layer DEPTH-1
    centers = [xs_b[l, :, n // 2, :] for l in range(DEPTH)]  # centre tokens sliced in XLA
    return out, centers


# ---------------- parameters / RoPE freqs (deterministic, glue) ----------------
def init_params(key):
    layers = []
    for _ in range(DEPTH):
        key, *ks = jax.random.split(key, 12)
        layers.append(dict(
            ln1_g=1.0 + 0.1 * jax.random.normal(ks[0], (1, DIM), jnp.float32),
            ln1_b=0.1 * jax.random.normal(ks[1], (1, DIM), jnp.float32),
            wqkv=jax.random.normal(ks[2], (DIM, 3 * INNER), jnp.float32) * DIM ** -0.5,
            wout=jax.random.normal(ks[3], (INNER, DIM), jnp.float32) * INNER ** -0.5,
            bout=0.02 * jax.random.normal(ks[4], (1, DIM), jnp.float32),
            ln2_g=1.0 + 0.1 * jax.random.normal(ks[5], (1, DIM), jnp.float32),
            ln2_b=0.1 * jax.random.normal(ks[6], (1, DIM), jnp.float32),
            w1=jax.random.normal(ks[7], (DIM, MLP_DIM), jnp.float32) * DIM ** -0.5,
            b1=0.02 * jax.random.normal(ks[8], (1, MLP_DIM), jnp.float32),
            w2=jax.random.normal(ks[9], (MLP_DIM, DIM), jnp.float32) * MLP_DIM ** -0.5,
            b2=0.02 * jax.random.normal(ks[10], (1, DIM), jnp.float32),
        ))
    return layers


def init_freqs_cos_sin(key, depth, heads, dim_heads, n, end_x, theta=10.0):
    # JAX equivalent of RoPEUtils.init_2d_freqs + init_coords_xy + compute_mixed_cis
    # (per-layer random rotation), returned as real cos/sin instead of complex cis.
    t = jnp.arange(n, dtype=jnp.float32)
    t_x = t % end_x
    t_y = jnp.floor(t / end_x)
    mag = 1.0 / (theta ** (jnp.arange(0, dim_heads, 4, dtype=jnp.float32)[: dim_heads // 4] / dim_heads))
    cos_l, sin_l = [], []
    for _ in range(depth):
        key, k = jax.random.split(key)
        ang = jax.random.uniform(k, (heads, 1), jnp.float32) * 2.0 * jnp.pi
        fx = jnp.concatenate([mag * jnp.cos(ang), mag * jnp.cos(jnp.pi / 2 + ang)], axis=-1)  # (H, dh/2)
        fy = jnp.concatenate([mag * jnp.sin(ang), mag * jnp.sin(jnp.pi / 2 + ang)], axis=-1)
        angles = t_x[None, :, None] * fx[:, None, :] + t_y[None, :, None] * fy[:, None, :]    # (H, N, dh/2)
        cos_l.append(jnp.cos(angles))
        sin_l.append(jnp.sin(angles))
    return jnp.stack(cos_l), jnp.stack(sin_l)


# ---------------- pure-JAX reference (mirrors the PyTorch math) ----------------
def ref_forward(x, layers, cos, sin):
    hp = jax.lax.Precision.HIGHEST
    mm = lambda a, b: jnp.matmul(a, b, precision=hp)

    def ln(v, g, b):
        mu = v.mean(-1, keepdims=True)
        xc = v - mu
        var = (xc * xc).mean(-1, keepdims=True)
        return xc / jnp.sqrt(var + LN_EPS) * g + b

    centers = []
    bsz, n, _ = x.shape
    for i, p in enumerate(layers):
        xn = ln(x, p["ln1_g"], p["ln1_b"])
        qkv = mm(xn, p["wqkv"])
        q, k, v = jnp.split(qkv, 3, axis=-1)
        to_heads = lambda t: t.reshape(bsz, n, HEADS, DIM_HEADS).transpose(0, 2, 1, 3)
        q, k, v = map(to_heads, (q, k, v))
        c = cos[i][None]
        s = sin[i][None]

        def rope(t):  # interleaved complex-pair rotation, as torch.view_as_complex
            tr = t.reshape(bsz, HEADS, n, DIM_HEADS // 2, 2)
            te, to = tr[..., 0], tr[..., 1]
            return jnp.stack([te * c - to * s, te * s + to * c], axis=-1).reshape(
                bsz, HEADS, n, DIM_HEADS)

        q, k = rope(q), rope(k)
        dots = jnp.einsum("bhid,bhjd->bhij", q, k, precision=hp) * SCALE
        attn = jax.nn.softmax(dots, axis=-1)
        out = jnp.einsum("bhij,bhjd->bhid", attn, v, precision=hp)
        out = out.transpose(0, 2, 1, 3).reshape(bsz, n, INNER)
        x = mm(out, p["wout"]) + p["bout"] + x

        xn = ln(x, p["ln2_g"], p["ln2_b"])
        h = mm(xn, p["w1"]) + p["b1"]
        h = 0.5 * h * (1.0 + jax.scipy.special.erf(h / jnp.sqrt(2.0)))
        x = mm(h, p["w2"]) + p["b2"] + x
        centers.append(x[:, n // 2, :])
    return x, centers


# ---------------- main ----------------
if __name__ == "__main__":
    key = jax.random.PRNGKey(0)
    key, kx, kp, kf = jax.random.split(key, 4)
    x = jax.random.normal(kx, (B, N, DIM), dtype=jnp.float32)
    layers = init_params(kp)
    cos, sin = init_freqs_cos_sin(kf, DEPTH, HEADS, DIM_HEADS, N, END_X)

    # One-time parameter prep (permutation + rotate-half folding + stacking + cos/sin
    # tiling + attention bias) hoisted out of the forward.
    fused_params = prepare_fused_params(layers, cos, sin)
    fused_params = jax.tree_util.tree_map(jax.block_until_ready, fused_params)

    out, centers = rope_transformer_forward(x, fused_params)
    out = jax.block_until_ready(out)
    centers = [jax.block_until_ready(c) for c in centers]

    ref_out, ref_centers = ref_forward(x, layers, cos, sin)
    err_out = float(jnp.max(jnp.abs(out - ref_out)))
    err_ctr = max(float(jnp.max(jnp.abs(a - b))) for a, b in zip(centers, ref_centers))
    assert err_out < 1e-2 and err_ctr < 1e-2, (err_out, err_ctr)
    print("KERNEL_OK")
</pallas_src>

<mosaic_0001>
module attributes {stable_mosaic.version = 11 : i64} {
  func.func @fused_transformer_kernel(%arg0: memref<32x32xf32, #tpu.memory_space<vmem>>, %arg1: memref<32x32xf32, #tpu.memory_space<vmem>>, %arg2: memref<2x1x32xf32, #tpu.memory_space<vmem>>, %arg3: memref<2x1x32xf32, #tpu.memory_space<vmem>>, %arg4: memref<2x32x160xf32, #tpu.memory_space<vmem>>, %arg5: memref<2x32x32xf32, #tpu.memory_space<vmem>>, %arg6: memref<2x32x32xf32, #tpu.memory_space<vmem>>, %arg7: memref<4x16x32xf32, #tpu.memory_space<vmem>>, %arg8: memref<2x1x32xf32, #tpu.memory_space<vmem>>, %arg9: memref<2x1x32xf32, #tpu.memory_space<vmem>>, %arg10: memref<2x1x32xf32, #tpu.memory_space<vmem>>, %arg11: memref<2x32x64xf32, #tpu.memory_space<vmem>>, %arg12: memref<2x1x64xf32, #tpu.memory_space<vmem>>, %arg13: memref<2x64x32xf32, #tpu.memory_space<vmem>>, %arg14: memref<2x1x32xf32, #tpu.memory_space<vmem>>, %arg15: memref<2x32x32xf32, #tpu.memory_space<vmem>>) attributes {dimension_semantics = [], scalar_prefetch = 0 : i64, scratch_operands = 0 : i64, tpu.core_type = #tpu.core_type<tc>} {
    %c0 = arith.constant 0 : index
    %c0_0 = arith.constant 0 : index
    %0 = vector.load %arg0[%c0, %c0_0] : memref<32x32xf32, #tpu.memory_space<vmem>>, vector<32x32xf32>
    %c0_1 = arith.constant 0 : index
    %c0_2 = arith.constant 0 : index
    %1 = vector.load %arg1[%c0_1, %c0_2] : memref<32x32xf32, #tpu.memory_space<vmem>>, vector<32x32xf32>
    %c0_3 = arith.constant 0 : index
    %c0_4 = arith.constant 0 : index
    %c0_5 = arith.constant 0 : index
    %2 = vector.load %arg2[%c0_3, %c0_4, %c0_5] : memref<2x1x32xf32, #tpu.memory_space<vmem>>, vector<1x1x32xf32>
    %3 = vector.shape_cast %2 : vector<1x1x32xf32> to vector<1x32xf32>
    %c0_6 = arith.constant 0 : index
    %c0_7 = arith.constant 0 : index
    %c0_8 = arith.constant 0 : index
    %4 = vector.load %arg3[%c0_6, %c0_7, %c0_8] : memref<2x1x32xf32, #tpu.memory_space<vmem>>, vector<1x1x32xf32>
    %5 = vector.shape_cast %4 : vector<1x1x32xf32> to vector<1x32xf32>
    %cst = arith.constant dense<0.000000e+00> : vector<32xf32>
    %6 = vector.multi_reduction <add>, %0, %cst [1] : vector<32x32xf32> to vector<32xf32>
    %7 = vector.shape_cast %6 : vector<32xf32> to vector<32x1xf32>
    %cst_9 = arith.constant 3.200000e+01 : f32
    %8 = vector.broadcast %cst_9 : f32 to vector<32x1xf32>
    %9 = arith.divf %7, %8 : vector<32x1xf32>
    %10 = vector.broadcast %9 : vector<32x1xf32> to vector<32x32xf32>
    %11 = arith.subf %0, %10 : vector<32x32xf32>
    %12 = arith.mulf %11, %11 : vector<32x32xf32>
    %cst_10 = arith.constant dense<0.000000e+00> : vector<32xf32>
    %13 = vector.multi_reduction <add>, %12, %cst_10 [1] : vector<32x32xf32> to vector<32xf32>
    %14 = vector.shape_cast %13 : vector<32xf32> to vector<32x1xf32>
    %cst_11 = arith.constant 3.200000e+01 : f32
    %15 = vector.broadcast %cst_11 : f32 to vector<32x1xf32>
    %16 = arith.divf %14, %15 : vector<32x1xf32>
    %cst_12 = arith.constant 9.99999974E-6 : f32
    %17 = vector.broadcast %cst_12 : f32 to vector<32x1xf32>
    %18 = arith.addf %16, %17 : vector<32x1xf32>
    %19 = math.rsqrt %18 : vector<32x1xf32>
    %20 = vector.broadcast %19 : vector<32x1xf32> to vector<32x32xf32>
    %21 = arith.mulf %11, %20 : vector<32x32xf32>
    %22 = vector.broadcast %3 : vector<1x32xf32> to vector<32x32xf32>
    %23 = arith.mulf %21, %22 : vector<32x32xf32>
    %24 = vector.broadcast %5 : vector<1x32xf32> to vector<32x32xf32>
    %25 = arith.addf %23, %24 : vector<32x32xf32>
    %c0_13 = arith.constant 0 : index
    %c0_14 = arith.constant 0 : index
    %c0_15 = arith.constant 0 : index
    %26 = vector.load %arg4[%c0_13, %c0_14, %c0_15] : memref<2x32x160xf32, #tpu.memory_space<vmem>>, vector<1x32x160xf32>
    %27 = vector.shape_cast %26 : vector<1x32x160xf32> to vector<32x160xf32>
    %cst_16 = arith.constant dense<0.000000e+00> : vector<32x160xf32>
    %28 = tpu.matmul %25, %27, %cst_16 {dimension_numbers = #tpu.dot_dimension_numbers<[1], [0], [0], [1], [0, 0, 1, 1], [], []>} : vector<32x32xf32>, vector<32x160xf32>, vector<32x160xf32> -> vector<32x160xf32>
    %c0_17 = arith.constant 0 : index
    %c0_18 = arith.constant 0 : index
    %c0_19 = arith.constant 0 : index
    %29 = vector.load %arg5[%c0_17, %c0_18, %c0_19] : memref<2x32x32xf32, #tpu.memory_space<vmem>>, vector<1x32x32xf32>
    %30 = vector.shape_cast %29 : vector<1x32x32xf32> to vector<32x32xf32>
    %c0_20 = arith.constant 0 : index
    %c0_21 = arith.constant 0 : index
    %c0_22 = arith.constant 0 : index
    %31 = vector.load %arg6[%c0_20, %c0_21, %c0_22] : memref<2x32x32xf32, #tpu.memory_space<vmem>>, vector<1x32x32xf32>
    %32 = vector.shape_cast %31 : vector<1x32x32xf32> to vector<32x32xf32>
    %33 = vector.extract_strided_slice %28 {offsets = [0, 0], sizes = [32, 32], strides = [1, 1]} : vector<32x160xf32> to vector<32x32xf32>
    %34 = arith.mulf %33, %30 : vector<32x32xf32>
    %35 = vector.extract_strided_slice %28 {offsets = [0, 32], sizes = [32, 32], strides = [1, 1]} : vector<32x160xf32> to vector<32x32xf32>
    %36 = arith.mulf %35, %32 : vector<32x32xf32>
    %37 = arith.addf %34, %36 : vector<32x32xf32>
    %38 = vector.extract_strided_slice %28 {offsets = [0, 64], sizes = [32, 32], strides = [1, 1]} : vector<32x160xf32> to vector<32x32xf32>
    %39 = arith.mulf %38, %30 : vector<32x32xf32>
    %40 = vector.extract_strided_slice %28 {offsets = [0, 96], sizes = [32, 32], strides = [1, 1]} : vector<32x160xf32> to vector<32x32xf32>
    %41 = arith.mulf %40, %32 : vector<32x32xf32>
    %42 = arith.addf %39, %41 : vector<32x32xf32>
    %43 = vector.extract_strided_slice %28 {offsets = [0, 128], sizes = [32, 32], strides = [1, 1]} : vector<32x160xf32> to vector<32x32xf32>
    %c0_23 = arith.constant 0 : index
    %c0_24 = arith.constant 0 : index
    %c0_25 = arith.constant 0 : index
    %44 = vector.load %arg8[%c0_23, %c0_24, %c0_25] : memref<2x1x32xf32, #tpu.memory_space<vmem>>, vector<1x1x32xf32>
    %45 = vector.shape_cast %44 : vector<1x1x32xf32> to vector<1x32xf32>
    %46 = vector.extract_strided_slice %37 {offsets = [0, 0], sizes = [32, 16], strides = [1, 1]} : vector<32x32xf32> to vector<32x16xf32>
    %47 = vector.extract_strided_slice %42 {offsets = [0, 0], sizes = [32, 16], strides = [1, 1]} : vector<32x32xf32> to vector<32x16xf32>
    %cst_26 = arith.constant dense<0.000000e+00> : vector<32x32xf32>
    %48 = tpu.matmul %46, %47, %cst_26 {dimension_numbers = #tpu.dot_dimension_numbers<[1], [1], [0], [0], [0, 0, 1, 0], [], []>} : vector<32x16xf32>, vector<32x16xf32>, vector<32x32xf32> -> vector<32x32xf32>
    %49 = arith.addf %48, %1 : vector<32x32xf32>
    %cst_27 = arith.constant dense<0xFF800000> : vector<32xf32>
    %50 = vector.multi_reduction <maximumf>, %49, %cst_27 [1] : vector<32x32xf32> to vector<32xf32>
    %51 = vector.shape_cast %50 : vector<32xf32> to vector<32x1xf32>
    %52 = vector.broadcast %51 : vector<32x1xf32> to vector<32x32xf32>
    %53 = arith.subf %49, %52 : vector<32x32xf32>
    %54 = math.exp %53 : vector<32x32xf32>
    %cst_28 = arith.constant dense<0.000000e+00> : vector<32xf32>
    %55 = vector.multi_reduction <add>, %54, %cst_28 [1] : vector<32x32xf32> to vector<32xf32>
    %56 = vector.shape_cast %55 : vector<32xf32> to vector<32x1xf32>
    %57 = tpu.reciprocal %56 {approx = true} : vector<32x1xf32> -> vector<32x1xf32>
    %58 = vector.broadcast %57 : vector<32x1xf32> to vector<32x32xf32>
    %59 = arith.mulf %54, %58 : vector<32x32xf32>
    %60 = vector.extract_strided_slice %43 {offsets = [0, 0], sizes = [32, 16], strides = [1, 1]} : vector<32x32xf32> to vector<32x16xf32>
    %cst_29 = arith.constant dense<0.000000e+00> : vector<32x16xf32>
    %61 = tpu.matmul %59, %60, %cst_29 {dimension_numbers = #tpu.dot_dimension_numbers<[1], [0], [0], [1], [0, 0, 1, 1], [], []>} : vector<32x32xf32>, vector<32x16xf32>, vector<32x16xf32> -> vector<32x16xf32>
    %c0_30 = arith.constant 0 : index
    %c0_31 = arith.constant 0 : index
    %c0_32 = arith.constant 0 : index
    %62 = vector.load %arg7[%c0_30, %c0_31, %c0_32] : memref<4x16x32xf32, #tpu.memory_space<vmem>>, vector<1x16x32xf32>
    %63 = vector.shape_cast %62 : vector<1x16x32xf32> to vector<16x32xf32>
    %cst_33 = arith.constant dense<0.000000e+00> : vector<32x32xf32>
    %64 = tpu.matmul %61, %63, %cst_33 {dimension_numbers = #tpu.dot_dimension_numbers<[1], [0], [0], [1], [0, 0, 1, 1], [], []>} : vector<32x16xf32>, vector<16x32xf32>, vector<32x32xf32> -> vector<32x32xf32>
    %65 = vector.broadcast %45 : vector<1x32xf32> to vector<32x32xf32>
    %66 = arith.addf %65, %64 : vector<32x32xf32>
    %67 = vector.extract_strided_slice %37 {offsets = [0, 16], sizes = [32, 16], strides = [1, 1]} : vector<32x32xf32> to vector<32x16xf32>
    %68 = vector.extract_strided_slice %42 {offsets = [0, 16], sizes = [32, 16], strides = [1, 1]} : vector<32x32xf32> to vector<32x16xf32>
    %cst_34 = arith.constant dense<0.000000e+00> : vector<32x32xf32>
    %69 = tpu.matmul %67, %68, %cst_34 {dimension_numbers = #tpu.dot_dimension_numbers<[1], [1], [0], [0], [0, 0, 1, 0], [], []>} : vector<32x16xf32>, vector<32x16xf32>, vector<32x32xf32> -> vector<32x32xf32>
    %70 = arith.addf %69, %1 : vector<32x32xf32>
    %cst_35 = arith.constant dense<0xFF800000> : vector<32xf32>
    %71 = vector.multi_reduction <maximumf>, %70, %cst_35 [1] : vector<32x32xf32> to vector<32xf32>
    %72 = vector.shape_cast %71 : vector<32xf32> to vector<32x1xf32>
    %73 = vector.broadcast %72 : vector<32x1xf32> to vector<32x32xf32>
    %74 = arith.subf %70, %73 : vector<32x32xf32>
    %75 = math.exp %74 : vector<32x32xf32>
    %cst_36 = arith.constant dense<0.000000e+00> : vector<32xf32>
    %76 = vector.multi_reduction <add>, %75, %cst_36 [1] : vector<32x32xf32> to vector<32xf32>
    %77 = vector.shape_cast %76 : vector<32xf32> to vector<32x1xf32>
    %78 = tpu.reciprocal %77 {approx = true} : vector<32x1xf32> -> vector<32x1xf32>
    %79 = vector.broadcast %78 : vector<32x1xf32> to vector<32x32xf32>
    %80 = arith.mulf %75, %79 : vector<32x32xf32>
    %81 = vector.extract_strided_slice %43 {offsets = [0, 16], sizes = [32, 16], strides = [1, 1]} : vector<32x32xf32> to vector<32x16xf32>
    %cst_37 = arith.constant dense<0.000000e+00> : vector<32x16xf32>
    %82 = tpu.matmul %80, %81, %cst_37 {dimension_numbers = #tpu.dot_dimension_numbers<[1], [0], [0], [1], [0, 0, 1, 1], [], []>} : vector<32x32xf32>, vector<32x16xf32>, vector<32x16xf32> -> vector<32x16xf32>
    %c1 = arith.constant 1 : index
    %c0_38 = arith.constant 0 : index
    %c0_39 = arith.constant 0 : index
    %83 = vector.load %arg7[%c1, %c0_38, %c0_39] : memref<4x16x32xf32, #tpu.memory_space<vmem>>, vector<1x16x32xf32>
    %84 = vector.shape_cast %83 : vector<1x16x32xf32> to vector<16x32xf32>
    %cst_40 = arith.constant dense<0.000000e+00> : vector<32x32xf32>
    %85 = tpu.matmul %82, %84, %cst_40 {dimension_numbers = #tpu.dot_dimension_numbers<[1], [0], [0], [1], [0, 0, 1, 1], [], []>} : vector<32x16xf32>, vector<16x32xf32>, vector<32x32xf32> -> vector<32x32xf32>
    %86 = arith.addf %66, %85 : vector<32x32xf32>
    %87 = arith.addf %0, %86 : vector<32x32xf32>
    %c0_41 = arith.constant 0 : index
    %c0_42 = arith.constant 0 : index
    %c0_43 = arith.constant 0 : index
    %88 = vector.load %arg9[%c0_41, %c0_42, %c0_43] : memref<2x1x32xf32, #tpu.memory_space<vmem>>, vector<1x1x32xf32>
    %89 = vector.shape_cast %88 : vector<1x1x32xf32> to vector<1x32xf32>
    %c0_44 = arith.constant 0 : index
    %c0_45 = arith.constant 0 : index
    %c0_46 = arith.constant 0 : index
    %90 = vector.load %arg10[%c0_44, %c0_45, %c0_46] : memref<2x1x32xf32, #tpu.memory_space<vmem>>, vector<1x1x32xf32>
    %91 = vector.shape_cast %90 : vector<1x1x32xf32> to vector<1x32xf32>
    %cst_47 = arith.constant dense<0.000000e+00> : vector<32xf32>
    %92 = vector.multi_reduction <add>, %87, %cst_47 [1] : vector<32x32xf32> to vector<32xf32>
    %93 = vector.shape_cast %92 : vector<32xf32> to vector<32x1xf32>
    %cst_48 = arith.constant 3.200000e+01 : f32
    %94 = vector.broadcast %cst_48 : f32 to vector<32x1xf32>
    %95 = arith.divf %93, %94 : vector<32x1xf32>
    %96 = vector.broadcast %95 : vector<32x1xf32> to vector<32x32xf32>
    %97 = arith.subf %87, %96 : vector<32x32xf32>
    %98 = arith.mulf %97, %97 : vector<32x32xf32>
    %cst_49 = arith.constant dense<0.000000e+00> : vector<32xf32>
    %99 = vector.multi_reduction <add>, %98, %cst_49 [1] : vector<32x32xf32> to vector<32xf32>
    %100 = vector.shape_cast %99 : vector<32xf32> to vector<32x1xf32>
    %cst_50 = arith.constant 3.200000e+01 : f32
    %101 = vector.broadcast %cst_50 : f32 to vector<32x1xf32>
    %102 = arith.divf %100, %101 : vector<32x1xf32>
    %cst_51 = arith.constant 9.99999974E-6 : f32
    %103 = vector.broadcast %cst_51 : f32 to vector<32x1xf32>
    %104 = arith.addf %102, %103 : vector<32x1xf32>
    %105 = math.rsqrt %104 : vector<32x1xf32>
    %106 = vector.broadcast %105 : vector<32x1xf32> to vector<32x32xf32>
    %107 = arith.mulf %97, %106 : vector<32x32xf32>
    %108 = vector.broadcast %89 : vector<1x32xf32> to vector<32x32xf32>
    %109 = arith.mulf %107, %108 : vector<32x32xf32>
    %110 = vector.broadcast %91 : vector<1x32xf32> to vector<32x32xf32>
    %111 = arith.addf %109, %110 : vector<32x32xf32>
    %c0_52 = arith.constant 0 : index
    %c0_53 = arith.constant 0 : index
    %c0_54 = arith.constant 0 : index
    %112 = vector.load %arg11[%c0_52, %c0_53, %c0_54] : memref<2x32x64xf32, #tpu.memory_space<vmem>>, vector<1x32x64xf32>
    %113 = vector.shape_cast %112 : vector<1x32x64xf32> to vector<32x64xf32>
    %cst_55 = arith.constant dense<0.000000e+00> : vector<32x64xf32>
    %114 = tpu.matmul %111, %113, %cst_55 {dimension_numbers = #tpu.dot_dimension_numbers<[1], [0], [0], [1], [0, 0, 1, 1], [], []>} : vector<32x32xf32>, vector<32x64xf32>, vector<32x64xf32> -> vector<32x64xf32>
    %c0_56 = arith.constant 0 : index
    %c0_57 = arith.constant 0 : index
    %c0_58 = arith.constant 0 : index
    %115 = vector.load %arg12[%c0_56, %c0_57, %c0_58] : memref<2x1x64xf32, #tpu.memory_space<vmem>>, vector<1x1x64xf32>
    %116 = vector.shape_cast %115 : vector<1x1x64xf32> to vector<1x64xf32>
    %117 = vector.broadcast %116 : vector<1x64xf32> to vector<32x64xf32>
    %118 = arith.addf %114, %117 : vector<32x64xf32>
    %cst_59 = arith.constant 0.707106769 : f32
    %119 = vector.broadcast %cst_59 : f32 to vector<32x64xf32>
    %120 = arith.mulf %118, %119 : vector<32x64xf32>
    %cst_60 = arith.constant 0.000000e+00 : f32
    %121 = vector.broadcast %cst_60 : f32 to vector<32x64xf32>
    %122 = arith.cmpf olt, %120, %121 : vector<32x64xf32>
    %cst_61 = arith.constant -1.000000e+00 : f32
    %cst_62 = arith.constant 1.000000e+00 : f32
    %123 = vector.broadcast %cst_61 : f32 to vector<32x64xf32>
    %124 = vector.broadcast %cst_62 : f32 to vector<32x64xf32>
    %125 = arith.select %122, %123, %124 : vector<32x64xi1>, vector<32x64xf32>
    %126 = math.absf %120 : vector<32x64xf32>
    %cst_63 = arith.constant 0.327591091 : f32
    %127 = vector.broadcast %cst_63 : f32 to vector<32x64xf32>
    %128 = arith.mulf %127, %126 : vector<32x64xf32>
    %cst_64 = arith.constant 1.000000e+00 : f32
    %129 = vector.broadcast %cst_64 : f32 to vector<32x64xf32>
    %130 = arith.addf %129, %128 : vector<32x64xf32>
    %131 = tpu.reciprocal %130 {approx = true} : vector<32x64xf32> -> vector<32x64xf32>
    %132 = arith.mulf %130, %131 : vector<32x64xf32>
    %cst_65 = arith.constant 2.000000e+00 : f32
    %133 = vector.broadcast %cst_65 : f32 to vector<32x64xf32>
    %134 = arith.subf %133, %132 : vector<32x64xf32>
    %135 = arith.mulf %131, %134 : vector<32x64xf32>
    %cst_66 = arith.constant 1.06140542 : f32
    %136 = vector.broadcast %cst_66 : f32 to vector<32x64xf32>
    %137 = arith.mulf %136, %135 : vector<32x64xf32>
    %cst_67 = arith.constant -1.45315206 : f32
    %138 = vector.broadcast %cst_67 : f32 to vector<32x64xf32>
    %139 = arith.addf %137, %138 : vector<32x64xf32>
    %140 = arith.mulf %139, %135 : vector<32x64xf32>
    %cst_68 = arith.constant 1.42141378 : f32
    %141 = vector.broadcast %cst_68 : f32 to vector<32x64xf32>
    %142 = arith.addf %140, %141 : vector<32x64xf32>
    %143 = arith.mulf %142, %135 : vector<32x64xf32>
    %cst_69 = arith.constant -0.284496725 : f32
    %144 = vector.broadcast %cst_69 : f32 to vector<32x64xf32>
    %145 = arith.addf %143, %144 : vector<32x64xf32>
    %146 = arith.mulf %145, %135 : vector<32x64xf32>
    %cst_70 = arith.constant 0.254829586 : f32
    %147 = vector.broadcast %cst_70 : f32 to vector<32x64xf32>
    %148 = arith.addf %146, %147 : vector<32x64xf32>
    %149 = arith.mulf %148, %135 : vector<32x64xf32>
    %cst_71 = arith.constant 0.000000e+00 : f32
    %150 = vector.broadcast %cst_71 : f32 to vector<32x64xf32>
    %151 = arith.subf %150, %126 : vector<32x64xf32>
    %152 = arith.mulf %151, %126 : vector<32x64xf32>
    %153 = math.exp %152 : vector<32x64xf32>
    %154 = arith.mulf %149, %153 : vector<32x64xf32>
    %cst_72 = arith.constant 1.000000e+00 : f32
    %155 = vector.broadcast %cst_72 : f32 to vector<32x64xf32>
    %156 = arith.subf %155, %154 : vector<32x64xf32>
    %157 = arith.mulf %125, %156 : vector<32x64xf32>
    %cst_73 = arith.constant 5.000000e-01 : f32
    %158 = vector.broadcast %cst_73 : f32 to vector<32x64xf32>
    %159 = arith.mulf %158, %118 : vector<32x64xf32>
    %cst_74 = arith.constant 1.000000e+00 : f32
    %160 = vector.broadcast %cst_74 : f32 to vector<32x64xf32>
    %161 = arith.addf %160, %157 : vector<32x64xf32>
    %162 = arith.mulf %159, %161 : vector<32x64xf32>
    %c0_75 = arith.constant 0 : index
    %c0_76 = arith.constant 0 : index
    %c0_77 = arith.constant 0 : index
    %163 = vector.load %arg13[%c0_75, %c0_76, %c0_77] : memref<2x64x32xf32, #tpu.memory_space<vmem>>, vector<1x64x32xf32>
    %164 = vector.shape_cast %163 : vector<1x64x32xf32> to vector<64x32xf32>
    %cst_78 = arith.constant dense<0.000000e+00> : vector<32x32xf32>
    %165 = tpu.matmul %162, %164, %cst_78 {dimension_numbers = #tpu.dot_dimension_numbers<[1], [0], [0], [1], [0, 0, 1, 1], [], []>} : vector<32x64xf32>, vector<64x32xf32>, vector<32x32xf32> -> vector<32x32xf32>
    %166 = arith.addf %87, %165 : vector<32x32xf32>
    %c0_79 = arith.constant 0 : index
    %c0_80 = arith.constant 0 : index
    %c0_81 = arith.constant 0 : index
    %167 = vector.load %arg14[%c0_79, %c0_80, %c0_81] : memref<2x1x32xf32, #tpu.memory_space<vmem>>, vector<1x1x32xf32>
    %168 = vector.shape_cast %167 : vector<1x1x32xf32> to vector<1x32xf32>
    %169 = vector.broadcast %168 : vector<1x32xf32> to vector<32x32xf32>
    %170 = arith.addf %166, %169 : vector<32x32xf32>
    %c0_82 = arith.constant 0 : index
    %c0_83 = arith.constant 0 : index
    %c0_84 = arith.constant 0 : index
    %171 = vector.load %arg15[%c0_82, %c0_83, %c0_84] : memref<2x32x32xf32, #tpu.memory_space<vmem>>, vector<1x32x32xf32>
    %172 = vector.shape_cast %171 : vector<1x32x32xf32> to vector<32x32xf32>
    %173 = vector.shape_cast %170 : vector<32x32xf32> to vector<1x32x32xf32>
    tpu.vector_store %arg15[%c0_82, %c0_83, %c0_84], %173 {strides = array<i32>} : memref<2x32x32xf32, #tpu.memory_space<vmem>>, vector<1x32x32xf32>,
    %c1_85 = arith.constant 1 : index
    %c0_86 = arith.constant 0 : index
    %c0_87 = arith.constant 0 : index
    %174 = vector.load %arg2[%c1_85, %c0_86, %c0_87] : memref<2x1x32xf32, #tpu.memory_space<vmem>>, vector<1x1x32xf32>
    %175 = vector.shape_cast %174 : vector<1x1x32xf32> to vector<1x32xf32>
    %c1_88 = arith.constant 1 : index
    %c0_89 = arith.constant 0 : index
    %c0_90 = arith.constant 0 : index
    %176 = vector.load %arg3[%c1_88, %c0_89, %c0_90] : memref<2x1x32xf32, #tpu.memory_space<vmem>>, vector<1x1x32xf32>
    %177 = vector.shape_cast %176 : vector<1x1x32xf32> to vector<1x32xf32>
    %cst_91 = arith.constant dense<0.000000e+00> : vector<32xf32>
    %178 = vector.multi_reduction <add>, %170, %cst_91 [1] : vector<32x32xf32> to vector<32xf32>
    %179 = vector.shape_cast %178 : vector<32xf32> to vector<32x1xf32>
    %cst_92 = arith.constant 3.200000e+01 : f32
    %180 = vector.broadcast %cst_92 : f32 to vector<32x1xf32>
    %181 = arith.divf %179, %180 : vector<32x1xf32>
    %182 = vector.broadcast %181 : vector<32x1xf32> to vector<32x32xf32>
    %183 = arith.subf %170, %182 : vector<32x32xf32>
    %184 = arith.mulf %183, %183 : vector<32x32xf32>
    %cst_93 = arith.constant dense<0.000000e+00> : vector<32xf32>
    %185 = vector.multi_reduction <add>, %184, %cst_93 [1] : vector<32x32xf32> to vector<32xf32>
    %186 = vector.shape_cast %185 : vector<32xf32> to vector<32x1xf32>
    %cst_94 = arith.constant 3.200000e+01 : f32
    %187 = vector.broadcast %cst_94 : f32 to vector<32x1xf32>
    %188 = arith.divf %186, %187 : vector<32x1xf32>
    %cst_95 = arith.constant 9.99999974E-6 : f32
    %189 = vector.broadcast %cst_95 : f32 to vector<32x1xf32>
    %190 = arith.addf %188, %189 : vector<32x1xf32>
    %191 = math.rsqrt %190 : vector<32x1xf32>
    %192 = vector.broadcast %191 : vector<32x1xf32> to vector<32x32xf32>
    %193 = arith.mulf %183, %192 : vector<32x32xf32>
    %194 = vector.broadcast %175 : vector<1x32xf32> to vector<32x32xf32>
    %195 = arith.mulf %193, %194 : vector<32x32xf32>
    %196 = vector.broadcast %177 : vector<1x32xf32> to vector<32x32xf32>
    %197 = arith.addf %195, %196 : vector<32x32xf32>
    %c1_96 = arith.constant 1 : index
    %c0_97 = arith.constant 0 : index
    %c0_98 = arith.constant 0 : index
    %198 = vector.load %arg4[%c1_96, %c0_97, %c0_98] : memref<2x32x160xf32, #tpu.memory_space<vmem>>, vector<1x32x160xf32>
    %199 = vector.shape_cast %198 : vector<1x32x160xf32> to vector<32x160xf32>
    %cst_99 = arith.constant dense<0.000000e+00> : vector<32x160xf32>
    %200 = tpu.matmul %197, %199, %cst_99 {dimension_numbers = #tpu.dot_dimension_numbers<[1], [0], [0], [1], [0, 0, 1, 1], [], []>} : vector<32x32xf32>, vector<32x160xf32>, vector<32x160xf32> -> vector<32x160xf32>
    %c1_100 = arith.constant 1 : index
    %c0_101 = arith.constant 0 : index
    %c0_102 = arith.constant 0 : index
    %201 = vector.load %arg5[%c1_100, %c0_101, %c0_102] : memref<2x32x32xf32, #tpu.memory_space<vmem>>, vector<1x32x32xf32>
    %202 = vector.shape_cast %201 : vector<1x32x32xf32> to vector<32x32xf32>
    %c1_103 = arith.constant 1 : index
    %c0_104 = arith.constant 0 : index
    %c0_105 = arith.constant 0 : index
    %203 = vector.load %arg6[%c1_103, %c0_104, %c0_105] : memref<2x32x32xf32, #tpu.memory_space<vmem>>, vector<1x32x32xf32>
    %204 = vector.shape_cast %203 : vector<1x32x32xf32> to vector<32x32xf32>
    %205 = vector.extract_strided_slice %200 {offsets = [0, 0], sizes = [32, 32], strides = [1, 1]} : vector<32x160xf32> to vector<32x32xf32>
    %206 = arith.mulf %205, %202 : vector<32x32xf32>
    %207 = vector.extract_strided_slice %200 {offsets = [0, 32], sizes = [32, 32], strides = [1, 1]} : vector<32x160xf32> to vector<32x32xf32>
    %208 = arith.mulf %207, %204 : vector<32x32xf32>
    %209 = arith.addf %206, %208 : vector<32x32xf32>
    %210 = vector.extract_strided_slice %200 {offsets = [0, 64], sizes = [32, 32], strides = [1, 1]} : vector<32x160xf32> to vector<32x32xf32>
    %211 = arith.mulf %210, %202 : vector<32x32xf32>
    %212 = vector.extract_strided_slice %200 {offsets = [0, 96], sizes = [32, 32], strides = [1, 1]} : vector<32x160xf32> to vector<32x32xf32>
    %213 = arith.mulf %212, %204 : vector<32x32xf32>
    %214 = arith.addf %211, %213 : vector<32x32xf32>
    %215 = vector.extract_strided_slice %200 {offsets = [0, 128], sizes = [32, 32], strides = [1, 1]} : vector<32x160xf32> to vector<32x32xf32>
    %c1_106 = arith.constant 1 : index
    %c0_107 = arith.constant 0 : index
    %c0_108 = arith.constant 0 : index
    %216 = vector.load %arg8[%c1_106, %c0_107, %c0_108] : memref<2x1x32xf32, #tpu.memory_space<vmem>>, vector<1x1x32xf32>
    %217 = vector.shape_cast %216 : vector<1x1x32xf32> to vector<1x32xf32>
    %218 = vector.extract_strided_slice %209 {offsets = [0, 0], sizes = [32, 16], strides = [1, 1]} : vector<32x32xf32> to vector<32x16xf32>
    %219 = vector.extract_strided_slice %214 {offsets = [0, 0], sizes = [32, 16], strides = [1, 1]} : vector<32x32xf32> to vector<32x16xf32>
    %cst_109 = arith.constant dense<0.000000e+00> : vector<32x32xf32>
    %220 = tpu.matmul %218, %219, %cst_109 {dimension_numbers = #tpu.dot_dimension_numbers<[1], [1], [0], [0], [0, 0, 1, 0], [], []>} : vector<32x16xf32>, vector<32x16xf32>, vector<32x32xf32> -> vector<32x32xf32>
    %221 = arith.addf %220, %1 : vector<32x32xf32>
    %cst_110 = arith.constant dense<0xFF800000> : vector<32xf32>
    %222 = vector.multi_reduction <maximumf>, %221, %cst_110 [1] : vector<32x32xf32> to vector<32xf32>
    %223 = vector.shape_cast %222 : vector<32xf32> to vector<32x1xf32>
    %224 = vector.broadcast %223 : vector<32x1xf32> to vector<32x32xf32>
    %225 = arith.subf %221, %224 : vector<32x32xf32>
    %226 = math.exp %225 : vector<32x32xf32>
    %cst_111 = arith.constant dense<0.000000e+00> : vector<32xf32>
    %227 = vector.multi_reduction <add>, %226, %cst_111 [1] : vector<32x32xf32> to vector<32xf32>
    %228 = vector.shape_cast %227 : vector<32xf32> to vector<32x1xf32>
    %229 = tpu.reciprocal %228 {approx = true} : vector<32x1xf32> -> vector<32x1xf32>
    %230 = vector.broadcast %229 : vector<32x1xf32> to vector<32x32xf32>
    %231 = arith.mulf %226, %230 : vector<32x32xf32>
    %232 = vector.extract_strided_slice %215 {offsets = [0, 0], sizes = [32, 16], strides = [1, 1]} : vector<32x32xf32> to vector<32x16xf32>
    %cst_112 = arith.constant dense<0.000000e+00> : vector<32x16xf32>
    %233 = tpu.matmul %231, %232, %cst_112 {dimension_numbers = #tpu.dot_dimension_numbers<[1], [0], [0], [1], [0, 0, 1, 1], [], []>} : vector<32x32xf32>, vector<32x16xf32>, vector<32x16xf32> -> vector<32x16xf32>
    %c2 = arith.constant 2 : index
    %c0_113 = arith.constant 0 : index
    %c0_114 = arith.constant 0 : index
    %234 = vector.load %arg7[%c2, %c0_113, %c0_114] : memref<4x16x32xf32, #tpu.memory_space<vmem>>, vector<1x16x32xf32>
    %235 = vector.shape_cast %234 : vector<1x16x32xf32> to vector<16x32xf32>
    %cst_115 = arith.constant dense<0.000000e+00> : vector<32x32xf32>
    %236 = tpu.matmul %233, %235, %cst_115 {dimension_numbers = #tpu.dot_dimension_numbers<[1], [0], [0], [1], [0, 0, 1, 1], [], []>} : vector<32x16xf32>, vector<16x32xf32>, vector<32x32xf32> -> vector<32x32xf32>
    %237 = vector.broadcast %217 : vector<1x32xf32> to vector<32x32xf32>
    %238 = arith.addf %237, %236 : vector<32x32xf32>
    %239 = vector.extract_strided_slice %209 {offsets = [0, 16], sizes = [32, 16], strides = [1, 1]} : vector<32x32xf32> to vector<32x16xf32>
    %240 = vector.extract_strided_slice %214 {offsets = [0, 16], sizes = [32, 16], strides = [1, 1]} : vector<32x32xf32> to vector<32x16xf32>
    %cst_116 = arith.constant dense<0.000000e+00> : vector<32x32xf32>
    %241 = tpu.matmul %239, %240, %cst_116 {dimension_numbers = #tpu.dot_dimension_numbers<[1], [1], [0], [0], [0, 0, 1, 0], [], []>} : vector<32x16xf32>, vector<32x16xf32>, vector<32x32xf32> -> vector<32x32xf32>
    %242 = arith.addf %241, %1 : vector<32x32xf32>
    %cst_117 = arith.constant dense<0xFF800000> : vector<32xf32>
    %243 = vector.multi_reduction <maximumf>, %242, %cst_117 [1] : vector<32x32xf32> to vector<32xf32>
    %244 = vector.shape_cast %243 : vector<32xf32> to vector<32x1xf32>
    %245 = vector.broadcast %244 : vector<32x1xf32> to vector<32x32xf32>
    %246 = arith.subf %242, %245 : vector<32x32xf32>
    %247 = math.exp %246 : vector<32x32xf32>
    %cst_118 = arith.constant dense<0.000000e+00> : vector<32xf32>
    %248 = vector.multi_reduction <add>, %247, %cst_118 [1] : vector<32x32xf32> to vector<32xf32>
    %249 = vector.shape_cast %248 : vector<32xf32> to vector<32x1xf32>
    %250 = tpu.reciprocal %249 {approx = true} : vector<32x1xf32> -> vector<32x1xf32>
    %251 = vector.broadcast %250 : vector<32x1xf32> to vector<32x32xf32>
    %252 = arith.mulf %247, %251 : vector<32x32xf32>
    %253 = vector.extract_strided_slice %215 {offsets = [0, 16], sizes = [32, 16], strides = [1, 1]} : vector<32x32xf32> to vector<32x16xf32>
    %cst_119 = arith.constant dense<0.000000e+00> : vector<32x16xf32>
    %254 = tpu.matmul %252, %253, %cst_119 {dimension_numbers = #tpu.dot_dimension_numbers<[1], [0], [0], [1], [0, 0, 1, 1], [], []>} : vector<32x32xf32>, vector<32x16xf32>, vector<32x16xf32> -> vector<32x16xf32>
    %c3 = arith.constant 3 : index
    %c0_120 = arith.constant 0 : index
    %c0_121 = arith.constant 0 : index
    %255 = vector.load %arg7[%c3, %c0_120, %c0_121] : memref<4x16x32xf32, #tpu.memory_space<vmem>>, vector<1x16x32xf32>
    %256 = vector.shape_cast %255 : vector<1x16x32xf32> to vector<16x32xf32>
    %cst_122 = arith.constant dense<0.000000e+00> : vector<32x32xf32>
    %257 = tpu.matmul %254, %256, %cst_122 {dimension_numbers = #tpu.dot_dimension_numbers<[1], [0], [0], [1], [0, 0, 1, 1], [], []>} : vector<32x16xf32>, vector<16x32xf32>, vector<32x32xf32> -> vector<32x32xf32>
    %258 = arith.addf %238, %257 : vector<32x32xf32>
    %259 = arith.addf %170, %258 : vector<32x32xf32>
    %c1_123 = arith.constant 1 : index
    %c0_124 = arith.constant 0 : index
    %c0_125 = arith.constant 0 : index
    %260 = vector.load %arg9[%c1_123, %c0_124, %c0_125] : memref<2x1x32xf32, #tpu.memory_space<vmem>>, vector<1x1x32xf32>
    %261 = vector.shape_cast %260 : vector<1x1x32xf32> to vector<1x32xf32>
    %c1_126 = arith.constant 1 : index
    %c0_127 = arith.constant 0 : index
    %c0_128 = arith.constant 0 : index
    %262 = vector.load %arg10[%c1_126, %c0_127, %c0_128] : memref<2x1x32xf32, #tpu.memory_space<vmem>>, vector<1x1x32xf32>
    %263 = vector.shape_cast %262 : vector<1x1x32xf32> to vector<1x32xf32>
    %cst_129 = arith.constant dense<0.000000e+00> : vector<32xf32>
    %264 = vector.multi_reduction <add>, %259, %cst_129 [1] : vector<32x32xf32> to vector<32xf32>
    %265 = vector.shape_cast %264 : vector<32xf32> to vector<32x1xf32>
    %cst_130 = arith.constant 3.200000e+01 : f32
    %266 = vector.broadcast %cst_130 : f32 to vector<32x1xf32>
    %267 = arith.divf %265, %266 : vector<32x1xf32>
    %268 = vector.broadcast %267 : vector<32x1xf32> to vector<32x32xf32>
    %269 = arith.subf %259, %268 : vector<32x32xf32>
    %270 = arith.mulf %269, %269 : vector<32x32xf32>
    %cst_131 = arith.constant dense<0.000000e+00> : vector<32xf32>
    %271 = vector.multi_reduction <add>, %270, %cst_131 [1] : vector<32x32xf32> to vector<32xf32>
    %272 = vector.shape_cast %271 : vector<32xf32> to vector<32x1xf32>
    %cst_132 = arith.constant 3.200000e+01 : f32
    %273 = vector.broadcast %cst_132 : f32 to vector<32x1xf32>
    %274 = arith.divf %272, %273 : vector<32x1xf32>
    %cst_133 = arith.constant 9.99999974E-6 : f32
    %275 = vector.broadcast %cst_133 : f32 to vector<32x1xf32>
    %276 = arith.addf %274, %275 : vector<32x1xf32>
    %277 = math.rsqrt %276 : vector<32x1xf32>
    %278 = vector.broadcast %277 : vector<32x1xf32> to vector<32x32xf32>
    %279 = arith.mulf %269, %278 : vector<32x32xf32>
    %280 = vector.broadcast %261 : vector<1x32xf32> to vector<32x32xf32>
    %281 = arith.mulf %279, %280 : vector<32x32xf32>
    %282 = vector.broadcast %263 : vector<1x32xf32> to vector<32x32xf32>
    %283 = arith.addf %281, %282 : vector<32x32xf32>
    %c1_134 = arith.constant 1 : index
    %c0_135 = arith.constant 0 : index
    %c0_136 = arith.constant 0 : index
    %284 = vector.load %arg11[%c1_134, %c0_135, %c0_136] : memref<2x32x64xf32, #tpu.memory_space<vmem>>, vector<1x32x64xf32>
    %285 = vector.shape_cast %284 : vector<1x32x64xf32> to vector<32x64xf32>
    %cst_137 = arith.constant dense<0.000000e+00> : vector<32x64xf32>
    %286 = tpu.matmul %283, %285, %cst_137 {dimension_numbers = #tpu.dot_dimension_numbers<[1], [0], [0], [1], [0, 0, 1, 1], [], []>} : vector<32x32xf32>, vector<32x64xf32>, vector<32x64xf32> -> vector<32x64xf32>
    %c1_138 = arith.constant 1 : index
    %c0_139 = arith.constant 0 : index
    %c0_140 = arith.constant 0 : index
    %287 = vector.load %arg12[%c1_138, %c0_139, %c0_140] : memref<2x1x64xf32, #tpu.memory_space<vmem>>, vector<1x1x64xf32>
    %288 = vector.shape_cast %287 : vector<1x1x64xf32> to vector<1x64xf32>
    %289 = vector.broadcast %288 : vector<1x64xf32> to vector<32x64xf32>
    %290 = arith.addf %286, %289 : vector<32x64xf32>
    %cst_141 = arith.constant 0.707106769 : f32
    %291 = vector.broadcast %cst_141 : f32 to vector<32x64xf32>
    %292 = arith.mulf %290, %291 : vector<32x64xf32>
    %cst_142 = arith.constant 0.000000e+00 : f32
    %293 = vector.broadcast %cst_142 : f32 to vector<32x64xf32>
    %294 = arith.cmpf olt, %292, %293 : vector<32x64xf32>
    %cst_143 = arith.constant -1.000000e+00 : f32
    %cst_144 = arith.constant 1.000000e+00 : f32
    %295 = vector.broadcast %cst_143 : f32 to vector<32x64xf32>
    %296 = vector.broadcast %cst_144 : f32 to vector<32x64xf32>
    %297 = arith.select %294, %295, %296 : vector<32x64xi1>, vector<32x64xf32>
    %298 = math.absf %292 : vector<32x64xf32>
    %cst_145 = arith.constant 0.327591091 : f32
    %299 = vector.broadcast %cst_145 : f32 to vector<32x64xf32>
    %300 = arith.mulf %299, %298 : vector<32x64xf32>
    %cst_146 = arith.constant 1.000000e+00 : f32
    %301 = vector.broadcast %cst_146 : f32 to vector<32x64xf32>
    %302 = arith.addf %301, %300 : vector<32x64xf32>
    %303 = tpu.reciprocal %302 {approx = true} : vector<32x64xf32> -> vector<32x64xf32>
    %304 = arith.mulf %302, %303 : vector<32x64xf32>
    %cst_147 = arith.constant 2.000000e+00 : f32
    %305 = vector.broadcast %cst_147 : f32 to vector<32x64xf32>
    %306 = arith.subf %305, %304 : vector<32x64xf32>
    %307 = arith.mulf %303, %306 : vector<32x64xf32>
    %cst_148 = arith.constant 1.06140542 : f32
    %308 = vector.broadcast %cst_148 : f32 to vector<32x64xf32>
    %309 = arith.mulf %308, %307 : vector<32x64xf32>
    %cst_149 = arith.constant -1.45315206 : f32
    %310 = vector.broadcast %cst_149 : f32 to vector<32x64xf32>
    %311 = arith.addf %309, %310 : vector<32x64xf32>
    %312 = arith.mulf %311, %307 : vector<32x64xf32>
    %cst_150 = arith.constant 1.42141378 : f32
    %313 = vector.broadcast %cst_150 : f32 to vector<32x64xf32>
    %314 = arith.addf %312, %313 : vector<32x64xf32>
    %315 = arith.mulf %314, %307 : vector<32x64xf32>
    %cst_151 = arith.constant -0.284496725 : f32
    %316 = vector.broadcast %cst_151 : f32 to vector<32x64xf32>
    %317 = arith.addf %315, %316 : vector<32x64xf32>
    %318 = arith.mulf %317, %307 : vector<32x64xf32>
    %cst_152 = arith.constant 0.254829586 : f32
    %319 = vector.broadcast %cst_152 : f32 to vector<32x64xf32>
    %320 = arith.addf %318, %319 : vector<32x64xf32>
    %321 = arith.mulf %320, %307 : vector<32x64xf32>
    %cst_153 = arith.constant 0.000000e+00 : f32
    %322 = vector.broadcast %cst_153 : f32 to vector<32x64xf32>
    %323 = arith.subf %322, %298 : vector<32x64xf32>
    %324 = arith.mulf %323, %298 : vector<32x64xf32>
    %325 = math.exp %324 : vector<32x64xf32>
    %326 = arith.mulf %321, %325 : vector<32x64xf32>
    %cst_154 = arith.constant 1.000000e+00 : f32
    %327 = vector.broadcast %cst_154 : f32 to vector<32x64xf32>
    %328 = arith.subf %327, %326 : vector<32x64xf32>
    %329 = arith.mulf %297, %328 : vector<32x64xf32>
    %cst_155 = arith.constant 5.000000e-01 : f32
    %330 = vector.broadcast %cst_155 : f32 to vector<32x64xf32>
    %331 = arith.mulf %330, %290 : vector<32x64xf32>
    %cst_156 = arith.constant 1.000000e+00 : f32
    %332 = vector.broadcast %cst_156 : f32 to vector<32x64xf32>
    %333 = arith.addf %332, %329 : vector<32x64xf32>
    %334 = arith.mulf %331, %333 : vector<32x64xf32>
    %c1_157 = arith.constant 1 : index
    %c0_158 = arith.constant 0 : index
    %c0_159 = arith.constant 0 : index
    %335 = vector.load %arg13[%c1_157, %c0_158, %c0_159] : memref<2x64x32xf32, #tpu.memory_space<vmem>>, vector<1x64x32xf32>
    %336 = vector.shape_cast %335 : vector<1x64x32xf32> to vector<64x32xf32>
    %cst_160 = arith.constant dense<0.000000e+00> : vector<32x32xf32>
    %337 = tpu.matmul %334, %336, %cst_160 {dimension_numbers = #tpu.dot_dimension_numbers<[1], [0], [0], [1], [0, 0, 1, 1], [], []>} : vector<32x64xf32>, vector<64x32xf32>, vector<32x32xf32> -> vector<32x32xf32>
    %338 = arith.addf %259, %337 : vector<32x32xf32>
    %c1_161 = arith.constant 1 : index
    %c0_162 = arith.constant 0 : index
    %c0_163 = arith.constant 0 : index
    %339 = vector.load %arg14[%c1_161, %c0_162, %c0_163] : memref<2x1x32xf32, #tpu.memory_space<vmem>>, vector<1x1x32xf32>
    %340 = vector.shape_cast %339 : vector<1x1x32xf32> to vector<1x32xf32>
    %341 = vector.broadcast %340 : vector<1x32xf32> to vector<32x32xf32>
    %342 = arith.addf %338, %341 : vector<32x32xf32>
    %c1_164 = arith.constant 1 : index
    %c0_165 = arith.constant 0 : index
    %c0_166 = arith.constant 0 : index
    %343 = vector.load %arg15[%c1_164, %c0_165, %c0_166] : memref<2x32x32xf32, #tpu.memory_space<vmem>>, vector<1x32x32xf32>
    %344 = vector.shape_cast %343 : vector<1x32x32xf32> to vector<32x32xf32>
    %345 = vector.shape_cast %342 : vector<32x32xf32> to vector<1x32x32xf32>
    tpu.vector_store %arg15[%c1_164, %c0_165, %c0_166], %345 {strides = array<i32>} : memref<2x32x32xf32, #tpu.memory_space<vmem>>, vector<1x32x32xf32>,
    return
  }
}

</mosaic_0001>

<bundles_post_ra>
// kernel: tpu_custom_call.1
= control target key start
LH: loop header
LB: loop body
LE: loop exit
PB: predicated region body
PF: predicated region fallthrough
CT: control target
= control target key end

     0   :  { %20 = vsyncpa [#allocation3], 0  ;;  %s5057_s0 = inlined_call_operand.hbm [shape: f32[32,32], index: 0, kind: input, shape index: {}]   ;;  %s5058_s1 = inlined_call_operand.hbm [shape: f32[32,32], index: 1, kind: input, shape index: {}]   ;;  %s5059_s2 = inlined_call_operand.vmem [shape: f32[2,1,32], index: 2, kind: input, shape index: {}]   ;;  %s5060_s3 = inlined_call_operand.vmem [shape: f32[2,1,32], index: 3, kind: input, shape index: {}]   ;;  %s5061_s4 = inlined_call_operand.vmem [shape: f32[2,32,160], index: 4, kind: input, shape index: {}]   ;;  %s5062_s5 = inlined_call_operand.vmem [shape: f32[2,32,32], index: 5, kind: input, shape index: {}]   ;;  %s5063_s6 = inlined_call_operand.hbm [shape: f32[2,32,32], index: 6, kind: input, shape index: {}]   ;;  %s5064_s7 = inlined_call_operand.hbm [shape: f32[4,16,32], index: 7, kind: input, shape index: {}]   ;;  %s5065_s8 = inlined_call_operand.vmem [shape: f32[2,1,32], index: 8, kind: input, shape index: {}]   ;;  %s5066_s9 = inlined_call_operand.vmem [shape: f32[2,1,32], index: 9, kind: input, shape index: {}]   ;;  %s5067_s10 = inlined_call_operand.vmem [shape: f32[2,1,32], index: 10, kind: input, shape index: {}]   ;;  %s5068_s11 = inlined_call_operand.hbm [shape: f32[2,32,64], index: 11, kind: input, shape index: {}]   ;;  %s5069_s12 = inlined_call_operand.vmem [shape: f32[2,1,64], index: 12, kind: input, shape index: {}]   ;;  %s5070_s13 = inlined_call_operand.vmem [shape: f32[2,64,32], index: 13, kind: input, shape index: {}]   ;;  %s5071_s14 = inlined_call_operand.vmem [shape: f32[2,1,32], index: 14, kind: input, shape index: {}]   ;;  %s5072_s15 = inlined_call_operand.hbm [shape: f32[2,32,32], index: 15, kind: output, shape index: {}]  }
   0x1   :  { %21 = vsyncpa [#allocation6], 0 }
   0x2   :  { %22 = vsyncpa [#allocation9], 0 }
   0x3   :  { %23 = vsyncpa [#allocation4], 0  ;;  %s4094_s18 = smov [#allocation5]   ;;  %s4095_s20 = smov [#allocation8]  }
   0x4   :  { %s41_s19 = sshll.u32 %s4094_s18, 4  ;;  %s73_s21 = sshll.u32 %s4095_s20, 4  ;;  %s42_s19 = int_to_ptr.vmem [resolvable:$true] %s41_s19  ;;  %s4189_s21 = int_to_ptr.vmem [resolvable:$true] %s73_s21 }
   0x5   :  { %s3954_s24 = scalar_lea.hbm %s5058_s1, 512 }
   0x6   :  { %p3955_p0 = scmp.ne.s32.totalorder %s5058_s1, %s3954_s24  ;;  %p3958_p1 = scmp.lt.u32.totalorder %s3954_s24, %s5058_s1 }
   0x8   :  { %p3960_p2 = pnand %p3958_p1, %p3955_p0 }
   0xa   :  { %3963 = shalt.err (!%p3960_p2)
}
   0xb   :  { %s3964_s29 = scalar_lea.vmem %s42_s19, 512  ;;  %p3969_p4 = scmp.lt.s32.totalorder %s42_s19, %s42_s19 }
   0xc   :  { %p3965_p3 = scmp.ne.s32.totalorder %s42_s19, %s3964_s29  ;;  %p3970_p5 = scmp.lt.s32.totalorder %s3964_s29, %s3964_s29 }
   0xe   :  { %p3971_p6 = por %p3970_p5, %p3969_p4 }
  0x10   :  { %p3972_p7 = pnand %p3971_p6, %p3965_p3 }
  0x12   :  { %3975 = shalt.err (!%p3972_p7)
}
  0x13   :  { %s4096_s30 = smov 128   ;;  %s4097_s16 = smov 8  }
  0x14   :  { %47 = dma.hbm_to_vmem [thread:$0]  %s5058_s1, 512, %s42_s19, [#allocation6], %s4096_s30, %s4096_s30, %s4097_s16  }
  0x15   :  { %s3976_s23 = scalar_lea.hbm %s5064_s7, 1024 }
  0x16   :  { %p3977_p8 = scmp.ne.s32.totalorder %s5064_s7, %s3976_s23  ;;  %p3980_p9 = scmp.lt.u32.totalorder %s3976_s23, %s5064_s7 }
  0x18   :  { %p3982_p10 = pnand %p3980_p9, %p3977_p8 }
  0x1a   :  { %3985 = shalt.err (!%p3982_p10)
}
  0x1b   :  { %s3986_s28 = scalar_lea.vmem %s4189_s21, 1024  ;;  %p3991_p12 = scmp.lt.s32.totalorder %s4189_s21, %s4189_s21 }
  0x1c   :  { %p3987_p11 = scmp.ne.s32.totalorder %s4189_s21, %s3986_s28  ;;  %p3992_p13 = scmp.lt.s32.totalorder %s3986_s28, %s3986_s28 }
  0x1e   :  { %p3993_p0 = por %p3992_p13, %p3991_p12 }
  0x20   :  { %p3994_p1 = pnand %p3993_p0, %p3987_p11 }
  0x22   :  { %3997 = shalt.err (!%p3994_p1)
}
  0x23   :  { %79 = dma.hbm_to_vmem [thread:$0]  %s5064_s7, 1024, %s4189_s21, [#allocation9], %s4096_s30, %s4096_s30, %s4097_s16  }
  0x24   :  { %s4098_s29 = smov [#allocation2]   ;;  %s4099_s18 = smov [#allocation7]  }
  0x25   :  { %s29_s17 = sshll.u32 %s4098_s29, 4  ;;  %s61_s20 = sshll.u32 %s4099_s18, 4  ;;  %s30_s17 = int_to_ptr.vmem [resolvable:$true] %s29_s17  ;;  %s4226_s20 = int_to_ptr.vmem [resolvable:$true] %s61_s20 }
  0x26   :  { %s3998_s24 = scalar_lea.hbm %s5057_s0, 512 }
  0x27   :  { %p3999_p2 = scmp.ne.s32.totalorder %s5057_s0, %s3998_s24  ;;  %p4002_p3 = scmp.lt.u32.totalorder %s3998_s24, %s5057_s0 }
  0x29   :  { %p4004_p4 = pnand %p4002_p3, %p3999_p2 }
  0x2b   :  { %4007 = shalt.err (!%p4004_p4)
}
  0x2c   :  { %s4008_s7 = scalar_lea.vmem %s30_s17, 512  ;;  %p4013_p6 = scmp.lt.s32.totalorder %s30_s17, %s30_s17 }
  0x2d   :  { %p4009_p5 = scmp.ne.s32.totalorder %s30_s17, %s4008_s7  ;;  %p4014_p7 = scmp.lt.s32.totalorder %s4008_s7, %s4008_s7 }
  0x2f   :  { %p4015_p8 = por %p4014_p7, %p4013_p6 }
  0x31   :  { %p4016_p9 = pnand %p4015_p8, %p4009_p5 }
  0x33   :  { %4019 = shalt.err (!%p4016_p9)
}
  0x34   :  { %35 = dma.hbm_to_vmem [thread:$0]  %s5057_s0, 512, %s30_s17, [#allocation3], %s4096_s30, %s4096_s30, %s4097_s16  }
  0x35   :  { %s4020_s18 = scalar_lea.hbm %s5063_s6, 1024 }
  0x36   :  { %p4021_p10 = scmp.ne.s32.totalorder %s5063_s6, %s4020_s18  ;;  %p4024_p11 = scmp.lt.u32.totalorder %s4020_s18, %s5063_s6 }
  0x38   :  { %p4026_p12 = pnand %p4024_p11, %p4021_p10 }
  0x3a   :  { %4029 = shalt.err (!%p4026_p12)
}
  0x3b   :  { %s4030_s26 = scalar_lea.vmem %s4226_s20, 1024  ;;  %p4035_p0 = scmp.lt.s32.totalorder %s4226_s20, %s4226_s20 }
  0x3c   :  { %p4031_p13 = scmp.ne.s32.totalorder %s4226_s20, %s4030_s26  ;;  %p4036_p1 = scmp.lt.s32.totalorder %s4030_s26, %s4030_s26 }
  0x3e   :  { %p4037_p2 = por %p4036_p1, %p4035_p0 }
  0x40   :  { %p4038_p3 = pnand %p4037_p2, %p4031_p13 }
  0x42   :  { %4041 = shalt.err (!%p4038_p3)
}
  0x43   :  { %67 = dma.hbm_to_vmem [thread:$0]  %s5063_s6, 1024, %s4226_s20, [#allocation6], %s4096_s30, %s4096_s30, %s4097_s16  }
  0x44   :  { %s4100_s27 = smov [#allocation10]   ;;  %s4042_s1 = scalar_lea.hbm %s5068_s11, 1024 }
  0x45   :  { %s91_s28 = sshll.u32 %s4100_s27, 4  ;;  %p4043_p4 = scmp.ne.s32.totalorder %s5068_s11, %s4042_s1  ;;  %s92_s28 = int_to_ptr.vmem [resolvable:$true] %s91_s28 }
  0x46   :  { %p4046_p5 = scmp.lt.u32.totalorder %s4042_s1, %s5068_s11 }
  0x48   :  { %p4048_p6 = pnand %p4046_p5, %p4043_p4 }
  0x4a   :  { %4051 = shalt.err (!%p4048_p6)
}
  0x4b   :  { %s4052_s23 = scalar_lea.vmem %s92_s28, 1024  ;;  %p4057_p8 = scmp.lt.s32.totalorder %s92_s28, %s92_s28 }
  0x4c   :  { %p4053_p7 = scmp.ne.s32.totalorder %s92_s28, %s4052_s23  ;;  %p4058_p9 = scmp.lt.s32.totalorder %s4052_s23, %s4052_s23 }
  0x4e   :  { %p4059_p10 = por %p4058_p9, %p4057_p8 }
  0x50   :  { %p4060_p11 = pnand %p4059_p10, %p4053_p7 }
  0x52   :  { %4063 = shalt.err (!%p4060_p11)
}
  0x53   :  { %97 = dma.hbm_to_vmem [thread:$0]  %s5068_s11, 1024, %s92_s28, [#allocation9], %s4096_s30, %s4096_s30, %s4097_s16  }
  0x54   :  { %4086 = dma.done.wait [#allocation3], 512  }
  0x55   :  { %4087 = vsyncadd [#allocation3], 4294966784 }
  0x56   :  { %4088 = dma.done.wait [#allocation6], 1536  }
  0x57   :  { %4089 = vsyncadd [#allocation6], 4294965760 }
  0x58   :  { %4090 = dma.done.wait [#allocation9], 2048  }
  0x59   :  { %4091 = vsyncadd [#allocation9], 4294965248  ;;  %vm129_vm0 = vcmask 261120   ;;  %v4278_v0 = vld [vmem:[#allocation2] sm:$0xff]  ;;  %v4280_v1 = vld [vmem:[#allocation2 + $0x10] sm:$0xff]  ;;  %v4101_v38 = vmov 0.0  }
  0x5a   :  { %v4282_v2 = vld [vmem:[#allocation2 + $0x8] sm:$0xff]  ;;  %v130_v3 = vsel %vm129_vm0, %v4278_v0, 0.0  ;;  %v136_v4 = vsel %vm129_vm0, %v4280_v1, 0.0  ;;  %v4288_v5 = vld [vmem:[#allocation2 + $0x18] sm:$0xff]  ;;  %v203_v31 = vld [vmem:[%s5061_s4] sm:$0xff]  ;;  %287 = vmatprep.mubr.f32.mxu0 %v4101_v38  ;;  %s4102_s6 = smov 96  }
  0x5b   :  { %131 = vadd.xlane.f32.xlu0 %v130_v3  ;;  %137 = vadd.xlane.f32.xlu1 %v136_v4  ;;  %v133_v6 = vsel %vm129_vm0, %v4282_v2, 0.0  ;;  %v139_v7 = vsel %vm129_vm0, %v4288_v5, 0.0  ;;  %v204_v28 = vld [vmem:[%s5061_s4 + $0x8] sm:$0xff]  ;;  %v206_v29 = vld [vmem:[%s5061_s4 + $0x18] sm:$0xff]  ;;  %v205_v32 = vld [vmem:[%s5061_s4 + $0x10] sm:$0xff]  ;;  %s4103_s24 = smov 64  }
  0x5c   :  { %v3571_v30 = vpack.c.bf16 %v206_v29, %v204_v28  ;;  %v208_v33 = vld [vmem:[%s5061_s4 + $0x28] sm:$0xff]  ;;  %v3573_v34 = vpack.c.bf16 %v205_v32, %v203_v31  ;;  %v210_v35 = vld [vmem:[%s5061_s4 + $0x38] sm:$0xff]  ;;  %v207_v36 = vld [vmem:[%s5061_s4 + $0x20] sm:$0xff]  ;;  %s4104_s29 = smov 32   ;;  %vm433_vm1 = vcmask 130048   ;;  %s4105_s18 = smov 48  }
  0x5d   :  { %v209_v37 = vld [vmem:[%s5061_s4 + $0x30] sm:$0xff]  ;;  %v3575_v39 = vpack.c.bf16 %v210_v35, %v208_v33  ;;  %v4343_v41 = vld [vmem:[#allocation7 + $0x8] sm:$0xff]  ;;  %v4345_v42 = vld [vmem:[#allocation7] sm:$0xff]  ;;  %s4106_s22 = smov 112   ;;  %vm1477_vm6 = vcmask 523264   ;;  %s4108_s1 = smov [#allocation11]  }
  0x5e   :  { %3572 = vmatprep.subr.bf16.mxu0 %v3571_v30  ;;  %v3577_v40 = vpack.c.bf16 %v209_v37, %v207_v36  ;;  %v4351_v43 = vld [vmem:[#allocation7 + $0x10] sm:$0xff]  ;;  %v4356_v44 = vld [vmem:[%s5062_s5] sm:$0xff]  ;;  %v4362_v45 = vld [vmem:[#allocation7 + $0x18] sm:$0xff] }
  0x5f   :  { %134 = vadd.xlane.f32.xlu0 %v133_v6  ;;  %140 = vadd.xlane.f32.xlu1 %v139_v7  ;;  %v4369_v46 = vld [vmem:[%s5062_s5 + $0x8] sm:$0xff]  ;;  %v3090_v60 = vld [vmem:[%s5059_s2] ss:$0 sm:$0xff]  ;;  %v315_v30 = vld [vmem:[%s5062_s5 + $0x18] sm:$0xff] }
  0x60   :  { %3574 = vmatpush1.bf16.msra.mxu0 %v3573_v34  ;;  %v3091_v62 = vld [vmem:[%s5060_s3] ss:$0 sm:$0xff]  ;;  %vm4454_vm2 = vmpackc.low %vm433_vm1, %vm433_vm1 }
  0x61   :  { %3576 = vmatprep.subr.bf16.mxu0 %v3575_v39 }
  0x64   :  { %3578 = vmatpush1.bf16.msra.mxu0 %v3577_v40 }
  0xe8   :  { %v132_v8 = vpop.xlane.xlu0 %131  ;;  %v138_v9 = vpop.xlane.xlu1 %137 }
  0xe9   :  { %v143_v10 = vmul.f32 0.03125, %v132_v8  ;;  %v145_v11 = vmul.f32 0.03125, %v138_v9 }
  0xeb   :  { %v4295_v12 = vsub.f32 %v4278_v0, %v143_v10  ;;  %v4298_v13 = vsub.f32 %v4280_v1, %v145_v11 }
  0xec   :  { %v135_v14 = vpop.xlane.xlu0 %134  ;;  %v141_v15 = vpop.xlane.xlu1 %140 }
  0xed   :  { %v144_v16 = vmul.f32 0.03125, %v135_v14  ;;  %v146_v17 = vmul.f32 0.03125, %v141_v15  ;;  %v151_v18 = vmul.f32 %v4295_v12, %v4295_v12  ;;  %v153_v19 = vmul.f32 %v4298_v13, %v4298_v13 }
  0xef   :  { %v4305_v20 = vsub.f32 %v4282_v2, %v144_v16  ;;  %v4308_v21 = vsub.f32 %v4288_v5, %v146_v17  ;;  %v155_v22 = vsel %vm129_vm0, %v151_v18, 0.0  ;;  %v161_v23 = vsel %vm129_vm0, %v153_v19, 0.0 }
  0xf0   :  { %156 = vadd.xlane.f32.xlu0 %v155_v22 }
  0xf1   :  { %v152_v24 = vmul.f32 %v4305_v20, %v4305_v20  ;;  %v154_v25 = vmul.f32 %v4308_v21, %v4308_v21 }
  0xf3   :  { %v158_v26 = vsel %vm129_vm0, %v152_v24, 0.0  ;;  %v164_v27 = vsel %vm129_vm0, %v154_v25, 0.0 }
  0xf4   :  { %162 = vadd.xlane.f32.xlu0 %v161_v23  ;;  %159 = vadd.xlane.f32.xlu1 %v158_v26  ;;  %v314_v23 = vld [vmem:[%s5062_s5 + $0x10] sm:$0xff] }
  0xf8   :  { %165 = vadd.xlane.f32.xlu1 %v164_v27 }
 0x109   :  { %386 = vrot.lane.b32.xlu1 %v4343_v41, %s4102_s6 }
 0x10a   :  { %384 = vrot.lane.b32.xlu0 %v4345_v42, %s4102_s6 }
 0x10d   :  { %388 = vrot.lane.b32.xlu1 %v4351_v43, %s4102_s6 }
 0x10e   :  { %368 = vrot.lane.b32.xlu0 %v4356_v44, %s4103_s24 }
 0x111   :  { %390 = vrot.lane.b32.xlu1 %v4362_v45, %s4102_s6 }
 0x115   :  { %370 = vrot.lane.b32.xlu1 %v4369_v46, %s4103_s24 }
 0x17d   :  { %v157_v47 = vpop.xlane.xlu0 %156 }
 0x17e   :  { %v167_v48 = vmul.f32 0.03125, %v157_v47 }
 0x180   :  { %v171_v49 = vadd.f32 1e-05, %v167_v48 }
 0x181   :  { %v160_v50 = vpop.xlane.xlu1 %159  ;;  %v163_v51 = vpop.xlane.xlu0 %162 }
 0x182   :  { %3822 = vrsqrt.f32 %v171_v49  ;;  %v168_v52 = vmul.f32 0.03125, %v160_v50  ;;  %v169_v53 = vmul.f32 0.03125, %v163_v51 }
 0x184   :  { %v172_v54 = vadd.f32 1e-05, %v168_v52  ;;  %v173_v55 = vadd.f32 1e-05, %v169_v53 }
 0x185   :  { %v166_v56 = vpop.xlane.xlu1 %165  ;;  %v385_v18 = vpop.permute.xlu0 %384 }
 0x186   :  { %3824 = vrsqrt.f32 %v172_v54  ;;  %v170_v57 = vmul.f32 0.03125, %v166_v56 }
 0x187   :  { %3826 = vrsqrt.f32 %v173_v55 }
 0x188   :  { %v174_v58 = vadd.f32 1e-05, %v170_v57 }
 0x189   :  { %v387_v17 = vpop.permute.xlu1 %386  ;;  %v369_v48 = vpop.permute.xlu0 %368 }
 0x18a   :  { %3828 = vrsqrt.f32 %v174_v58 }
 0x18c   :  { %v3823_v59 = vpop.eup %3822 }
 0x18d   :  { %v179_v61 = vmul.f32 %v3823_v59, %v4295_v12  ;;  %v389_v26 = vpop.permute.xlu1 %388 }
 0x18f   :  { %v189_v63 = vmul.f32 %v3090_v60, %v179_v61 }
 0x190   :  { %v3825_v3 = vpop.eup %3824 }
 0x191   :  { %v3827_v4 = vpop.eup %3826  ;;  %v199_v6 = vadd.f32 %v3091_v62, %v189_v63  ;;  %v180_v7 = vmul.f32 %v3825_v3, %v4305_v20  ;;  %v391_v34 = vpop.permute.xlu1 %390 }
 0x192   :  { %v181_v8 = vmul.f32 %v3827_v4, %v4298_v13 }
 0x193   :  { %3092 = vmatmul.mubr.msk.f32.vlgmr.msra.gmra.mrb[0].mxu0 %vm129_vm0, %v199_v6  ;;  %v190_v9 = vmul.f32 %v3090_v60, %v180_v7 }
 0x194   :  { %v3829_v10 = vpop.eup %3828  ;;  %293 = vmatprep.mubr.f32.mxu0 %v4101_v38  ;;  %v191_v12 = vmul.f32 %v3090_v60, %v181_v8 }
 0x195   :  { %v200_v11 = vadd.f32 %v3091_v62, %v190_v9  ;;  %v182_v14 = vmul.f32 %v3829_v10, %v4308_v21  ;;  %v371_v49 = vpop.permute.xlu1 %370 }
 0x196   :  { %v201_v15 = vadd.f32 %v3091_v62, %v191_v12 }
 0x197   :  { %3093 = vmatmul.mubr.msk.f32.gmra.mrb[2].mxu0 %vm129_vm0, %v200_v11  ;;  %v192_v16 = vmul.f32 %v3090_v60, %v182_v14 }
 0x198   :  { %299 = vmatprep.mubr.f32.mxu0 %v4101_v38 }
 0x199   :  { %v202_v13 = vadd.f32 %v3091_v62, %v192_v16 }
 0x19b   :  { %3094 = vmatmul.mubr.msk.f32.gmra.mrb[4].mxu0 %vm129_vm0, %v201_v15 }
 0x19c   :  { %305 = vmatprep.mubr.f32.mxu0 %v4101_v38 }
 0x19f   :  { %3095 = vmatmul.mubr.msk.f32.gmra.mrb[6].mxu0 %vm129_vm0, %v202_v13 }
 0x266   :  { %v4390_v19 = vpop.f32.mrb[0].mxu0 }
 0x267   :  { %v4392_v20 = vpop.f32.mrb[1].mxu0  ;;  %v396_v21 = vmul.f32 %v385_v18, %v4390_v19  ;;  %v380_v51 = vmul.f32 %v369_v48, %v4390_v19  ;;  %v320_v16 = vmul.f32 %v4356_v44, %v4390_v19  ;;  %v4486_v48 = vld [vmem:[#allocation5 + $0x10] sm:$0xff] }
 0x269   :  { %404 = vrot.lane.b32.xlu0 %v396_v21, %s4102_s6 }
 0x26a   :  { %v4396_v22 = vpop.f32.mrb[2].mxu0 }
 0x26b   :  { %v4401_v24 = vpop.f32.mrb[3].mxu0  ;;  %v397_v25 = vmul.f32 %v387_v17, %v4396_v22  ;;  %v381_v52 = vmul.f32 %v371_v49, %v4396_v22 }
 0x26c   :  { %v3782_v27 = vpack.i.bf16 %v4401_v24, %v4392_v20  ;;  %v3591_v28 = vpack.c.bf16 %v4401_v24, %v4392_v20 }
 0x26d   :  { %406 = vrot.lane.b32.xlu1 %v397_v25, %s4102_s6  ;;  %372 = vrot.lane.b32.xlu0 %v314_v23, %s4103_s24 }
 0x26e   :  { %v301_v29 = vpop.f32.mrb[4].mxu0  ;;  %3592 = vmatprep.subr.bf16.mxu0 %v3591_v28 }
 0x26f   :  { %v4413_v31 = vpop.f32.mrb[5].mxu0  ;;  %3594 = vmatpush3.bf16.msra.mxu0 %v3591_v28  ;;  %v398_v32 = vmul.f32 %v389_v26, %v301_v29  ;;  %v4415_v33 = vmul.f32 %v314_v23, %v301_v29 }
 0x271   :  { %374 = vrot.lane.b32.xlu1 %v315_v30, %s4103_s24  ;;  %408 = vrot.lane.b32.xlu0 %v398_v32, %s4102_s6 }
 0x272   :  { %v307_v35 = vpop.f32.mrb[6].mxu0 }
 0x273   :  { %v4419_v36 = vpop.f32.mrb[7].mxu0  ;;  %v399_v37 = vmul.f32 %v391_v34, %v307_v35  ;;  %v4421_v39 = vmul.f32 %v315_v30, %v307_v35  ;;  %v4479_v34 = vld [vmem:[#allocation5 + $0x8] sm:$0xff] }
 0x274   :  { %v3787_v40 = vpack.i.bf16 %v4419_v36, %v4413_v31  ;;  %v3595_v47 = vpack.c.bf16 %v4419_v36, %v4413_v31 }
 0x275   :  { %410 = vrot.lane.b32.xlu1 %v399_v37, %s4102_s6  ;;  %328 = vrot.lane.b32.xlu0 %v4345_v42, %s4104_s29 }
 0x276   :  { %3596 = vmatprep.subr.bf16.mxu0 %v3595_v47 }
 0x277   :  { %3598 = vmatpush3.bf16.msra.mxu0 %v3595_v47 }
 0x279   :  { %330 = vrot.lane.b32.xlu1 %v4343_v41, %s4104_s29  ;;  %332 = vrot.lane.b32.xlu0 %v4351_v43, %s4104_s29 }
 0x27d   :  { %334 = vrot.lane.b32.xlu1 %v4362_v45, %s4104_s29 }
 0x2db   :  { %v405_v50 = vpop.permute.xlu0 %404 }
 0x2dc   :  { %v416_v54 = vadd.f32 %v405_v50, %v380_v51  ;;  %v4489_v50 = vld [vmem:[#allocation5 + $0x18] sm:$0xff] }
 0x2df   :  { %v407_v53 = vpop.permute.xlu1 %406  ;;  %v373_v42 = vpop.permute.xlu0 %372 }
 0x2e0   :  { %v417_v55 = vadd.f32 %v407_v53, %v381_v52  ;;  %v382_v43 = vmul.f32 %v373_v42, %v301_v29 }
 0x2e2   :  { %v4438_v56 = vpack.i.bf16 %v417_v55, %v416_v54 }
 0x2e3   :  { %v375_v41 = vpop.permute.xlu1 %374  ;;  %v409_v57 = vpop.permute.xlu0 %408 }
 0x2e4   :  { %3763 = vrot.lane.b32.xlu0 %v4438_v56, %s4103_s24  ;;  %v383_v45 = vmul.f32 %v375_v41, %v307_v35  ;;  %v418_v60 = vadd.f32 %v409_v57, %v382_v43 }
 0x2e7   :  { %v411_v58 = vpop.permute.xlu1 %410  ;;  %v329_v59 = vpop.permute.xlu0 %328 }
 0x2e8   :  { %v419_v61 = vadd.f32 %v411_v58, %v383_v45  ;;  %v340_v62 = vmul.f32 %v329_v59, %v4390_v19  ;;  %v321_v19 = vmul.f32 %v4369_v46, %v4396_v22 }
 0x2ea   :  { %v4443_v63 = vpack.i.bf16 %v419_v61, %v418_v60  ;;  %348 = vrot.lane.b32.xlu0 %v340_v62, %s4102_s6 }
 0x2eb   :  { %v331_v3 = vpop.permute.xlu1 %330  ;;  %v333_v4 = vpop.permute.xlu0 %332 }
 0x2ec   :  { %v342_v6 = vmul.f32 %v333_v4, %v301_v29  ;;  %3768 = vrot.lane.b32.xlu1 %v4443_v63, %s4103_s24  ;;  %v341_v7 = vmul.f32 %v331_v3, %v4396_v22 }
 0x2ee   :  { %352 = vrot.lane.b32.xlu0 %v342_v6, %s4102_s6 }
 0x2ef   :  { %v335_v8 = vpop.permute.xlu1 %334 }
 0x2f0   :  { %350 = vrot.lane.b32.xlu1 %v341_v7, %s4102_s6  ;;  %v343_v9 = vmul.f32 %v335_v8, %v307_v35  ;;  %v4481_v35 = vld [vmem:[#allocation5] sm:$0xff] }
 0x2f4   :  { %354 = vrot.lane.b32.xlu1 %v343_v9, %s4102_s6 }
 0x356   :  { %v3764_v10 = vpop.permute.xlu0 %3763 }
 0x357   :  { %v3766_v11 = vunpack.i.h.bf16 %v3764_v10  ;;  %v3765_v12 = vunpack.i.l.bf16 %v3764_v10 }
 0x359   :  { %v3579_v15 = vpack.c.bf16 %v3766_v11, %v3765_v12 }
 0x35b   :  { %3581 = vmatprep.subr.msk.bf16.mxu1 %vm4454_vm2, %v3579_v15 }
 0x35c   :  { %v349_v13 = vpop.permute.xlu0 %348  ;;  %3584 = vmatpush3.bf16.xpose.msk.msra.mxu1 %vm4454_vm2, %v3579_v15 }
 0x35d   :  { %v4464_v17 = vadd.f32 %v349_v13, %v320_v16  ;;  %v680_v16 = vld [vmem:[#allocation8] sm:$0xff]  ;;  %v681_v13 = vld [vmem:[#allocation8 + $0x8] sm:$0xff] }
 0x35e   :  { %v3769_v18 = vpop.permute.xlu1 %3768 }
 0x35f   :  { %v3771_v21 = vunpack.i.h.bf16 %v3769_v18  ;;  %v3770_v23 = vunpack.i.l.bf16 %v3769_v18  ;;  %3355 = vmatprep.mubr.msk.f32.mxu1 %vm433_vm1, %v4464_v17  ;;  %v3599_v18 = vpack.c.bf16 %v681_v13, %v680_v16 }
 0x360   :  { %v353_v44 = vpop.permute.xlu0 %352 }
 0x361   :  { %v3585_v25 = vpack.c.bf16 %v3771_v21, %v3770_v23  ;;  %v362_v29 = vadd.f32 %v353_v44, %v4415_v33 }
 0x362   :  { %v351_v26 = vpop.permute.xlu1 %350 }
 0x363   :  { %3587 = vmatprep.subr.msk.bf16.mxu1 %vm4454_vm2, %v3585_v25  ;;  %v361_v28 = vadd.f32 %v351_v26, %v321_v19 }
 0x364   :  { %3590 = vmatpush3.bf16.xpose.msk.msra.mxu1 %vm4454_vm2, %v3585_v25 }
 0x365   :  { %3600 = vmatprep.subr.bf16.mxu1 %v3599_v18 }
 0x366   :  { %v355_v30 = vpop.permute.xlu1 %354 }
 0x367   :  { %v363_v32 = vadd.f32 %v355_v30, %v4421_v39 }
 0x36b   :  { %3356 = vmatmul.mubr.msk.f32.vlgmr.msra.gmra.mrb[0].mxu1 %vm433_vm1, %v361_v28 }
 0x36c   :  { %3358 = vmatprep.mubr.msk.f32.mxu1 %vm433_vm1, %v362_v29  ;;  %3602 = vmatpush3.bf16.msra.mxu1 %v3599_v18 }
 0x36f   :  { %3359 = vmatmul.mubr.msk.f32.gmra.mrb[2].mxu1 %vm433_vm1, %v363_v32 }
 0x43e   :  { %v3357_v37 = vpop.f32.mrb[0].mxu1 }
 0x43f   :  { %v526_v47 = vadd.f32 %v3357_v37, %v4479_v34  ;;  %v520_v46 = vpop.f32.mrb[1].mxu1 }
 0x440   :  { %v521_v22 = vadd.f32 %v520_v46, %v4481_v35 }
 0x441   :  { %v542_v33 = vsel %vm129_vm0, %v526_v47, -inf }
 0x442   :  { %543 = vmax.xlane.f32.xlu1 %v542_v33  ;;  %v3360_v49 = vpop.f32.mrb[2].mxu1  ;;  %v539_v39 = vsel %vm129_vm0, %v521_v22, -inf }
 0x443   :  { %v530_v51 = vpop.f32.mrb[3].mxu1  ;;  %540 = vmax.xlane.f32.xlu0 %v539_v39  ;;  %v536_v53 = vadd.f32 %v3360_v49, %v4489_v50 }
 0x444   :  { %v531_v52 = vadd.f32 %v530_v51, %v4486_v48 }
 0x445   :  { %v548_v54 = vsel %vm129_vm0, %v536_v53, -inf }
 0x446   :  { %v545_v42 = vsel %vm129_vm0, %v531_v52, -inf }
 0x447   :  { %546 = vmax.xlane.f32.xlu0 %v545_v42 }
 0x44b   :  { %549 = vmax.xlane.f32.xlu0 %v548_v54 }
 0x4cf   :  { %v544_v55 = vpop.xlane.xlu1 %543 }
 0x4d0   :  { %v552_v41 = vsub.f32 %v526_v47, %v544_v55  ;;  %v541_v57 = vpop.xlane.xlu0 %540 }
 0x4d1   :  { %v551_v43 = vsub.f32 %v521_v22, %v541_v57 }
 0x4d2   :  { %v557_v45 = vmul.f32 1.442695, %v552_v41 }
 0x4d3   :  { %v555_v58 = vmul.f32 1.442695, %v551_v43 }
 0x4d4   :  { %3830 = vpow2.f32 %v557_v45  ;;  %v547_v59 = vpop.xlane.xlu0 %546 }
 0x4d5   :  { %3832 = vpow2.f32 %v555_v58  ;;  %v553_v60 = vsub.f32 %v531_v52, %v547_v59 }
 0x4d7   :  { %v559_v61 = vmul.f32 1.442695, %v553_v60 }
 0x4d8   :  { %v550_v62 = vpop.xlane.xlu0 %549 }
 0x4d9   :  { %3834 = vpow2.f32 %v559_v61  ;;  %v554_v3 = vsub.f32 %v536_v53, %v550_v62 }
 0x4db   :  { %v561_v4 = vmul.f32 1.442695, %v554_v3 }
 0x4dd   :  { %3836 = vpow2.f32 %v561_v4 }
 0x4de   :  { %v3831_v6 = vpop.eup %3830 }
 0x4df   :  { %v3833_v7 = vpop.eup %3832  ;;  %v566_v8 = vsel %vm129_vm0, %v3831_v6, 0.0 }
 0x4e0   :  { %567 = vadd.xlane.f32.xlu1 %v566_v8  ;;  %v563_v9 = vsel %vm129_vm0, %v3833_v7, 0.0 }
 0x4e1   :  { %564 = vadd.xlane.f32.xlu0 %v563_v9 }
 0x4e3   :  { %v3835_v10 = vpop.eup %3834 }
 0x4e4   :  { %v569_v11 = vsel %vm129_vm0, %v3835_v10, 0.0 }
 0x4e5   :  { %570 = vadd.xlane.f32.xlu0 %v569_v11 }
 0x4e7   :  { %v3837_v12 = vpop.eup %3836 }
 0x4e8   :  { %v572_v15 = vsel %vm129_vm0, %v3837_v12, 0.0 }
 0x4e9   :  { %573 = vadd.xlane.f32.xlu1 %v572_v15 }
 0x4fa   :  { %3778 = vrot.lane.b32.xlu1 %v4443_v63, %s4105_s18 }
 0x4fb   :  { %3773 = vrot.lane.b32.xlu0 %v4438_v56, %s4105_s18 }
 0x4fe   :  { %789 = vrot.lane.b32.xlu1 %v4464_v17, %s4106_s22 }
 0x4ff   :  { %793 = vrot.lane.b32.xlu0 %v362_v29, %s4106_s22 }
 0x502   :  { %791 = vrot.lane.b32.xlu1 %v361_v28, %s4106_s22 }
 0x506   :  { %795 = vrot.lane.b32.xlu1 %v363_v32, %s4106_s22 }
 0x56d   :  { %v568_v21 = vpop.xlane.xlu1 %567 }
 0x56e   :  { %3838 = vrcp.f32 %v568_v21  ;;  %v565_v63 = vpop.xlane.xlu0 %564 }
 0x56f   :  { %3840 = vrcp.f32 %v565_v63 }
 0x572   :  { %v571_v56 = vpop.xlane.xlu0 %570 }
 0x573   :  { %3842 = vrcp.f32 %v571_v56 }
 0x576   :  { %v574_v23 = vpop.xlane.xlu1 %573  ;;  %v3774_v25 = vpop.permute.xlu0 %3773 }
 0x577   :  { %3844 = vrcp.f32 %v574_v23  ;;  %v3776_v17 = vunpack.i.h.bf16 %v3774_v25  ;;  %v3775_v26 = vunpack.i.l.bf16 %v3774_v25 }
 0x578   :  { %v3839_v44 = vpop.eup %3838 }
 0x579   :  { %v3841_v19 = vpop.eup %3840  ;;  %v3603_v28 = vpack.c.bf16 %v3776_v17, %v3775_v26  ;;  %v580_v32 = vmul.f32 %v3839_v44, %v3831_v6 }
 0x57a   :  { %v3779_v29 = vpop.permute.xlu1 %3778  ;;  %v579_v30 = vmul.f32 %v3841_v19, %v3833_v7  ;;  %v794_v53 = vpop.permute.xlu0 %793 }
 0x57b   :  { %v3781_v37 = vunpack.i.h.bf16 %v3779_v29  ;;  %v3780_v47 = vunpack.i.l.bf16 %v3779_v29  ;;  %3605 = vmatprep.subr.msk.bf16.mxu0 %vm4454_vm2, %v3603_v28 }
 0x57c   :  { %3369 = vmatprep.mubr.msk.f32.mxu0 %vm129_vm0, %v579_v30 }
 0x57d   :  { %v3843_v46 = vpop.eup %3842  ;;  %v3609_v22 = vpack.c.bf16 %v3781_v37, %v3780_v47  ;;  %3370 = vmatmul.mubr.msk.f32.vlgmr.msra.gmra.mrb[8].mxu0 %vm129_vm0, %v580_v32 }
 0x57e   :  { %3608 = vmatpush3.bf16.xpose.msk.msra.mxu0 %vm4454_vm2, %v3603_v28  ;;  %v581_v33 = vmul.f32 %v3843_v46, %v3835_v10  ;;  %v790_v51 = vpop.permute.xlu1 %789 }
 0x57f   :  { %3611 = vmatprep.subr.msk.bf16.mxu0 %vm4454_vm2, %v3609_v22 }
 0x580   :  { %3372 = vmatprep.mubr.msk.f32.mxu0 %vm129_vm0, %v581_v33  ;;  %v1065_v33 = vld [vmem:[#allocation8 + $0x18] sm:$0xff] }
 0x581   :  { %v3845_v49 = vpop.eup %3844 }
 0x582   :  { %v582_v39 = vmul.f32 %v3845_v49, %v3837_v12  ;;  %v792_v52 = vpop.permute.xlu1 %791 }
 0x584   :  { %3373 = vmatmul.mubr.msk.f32.gmra.mrb[10].mxu0 %vm129_vm0, %v582_v39 }
 0x585   :  { %3393 = vmatprep.mubr.msk.f32.mxu0 %vm433_vm1, %v790_v51 }
 0x586   :  { %3614 = vmatpush3.bf16.xpose.msk.msra.mxu0 %vm4454_vm2, %v3609_v22  ;;  %v796_v42 = vpop.permute.xlu1 %795 }
 0x58d   :  { %3394 = vmatmul.mubr.msk.f32.vlgmr.msra.gmra.mrb[12].mxu0 %vm433_vm1, %v792_v52 }
 0x58e   :  { %3396 = vmatprep.mubr.msk.f32.mxu0 %vm433_vm1, %v794_v53 }
 0x591   :  { %3397 = vmatmul.mubr.msk.f32.gmra.mrb[14].mxu0 %vm433_vm1, %v796_v42 }
 0x650   :  { %v3371_v54 = vpop.f32.mrb[8].mxu0 }
 0x651   :  { %v661_v55 = vpop.f32.mrb[9].mxu0 }
 0x652   :  { %3379 = vmatprep.mubr.msk.f32.mxu1 %vm433_vm1, %v661_v55 }
 0x653   :  { %3380 = vmatmul.mubr.msk.f32.vlgmr.msra.gmra.mrb[4].mxu1 %vm433_vm1, %v3371_v54 }
 0x657   :  { %v3374_v41 = vpop.f32.mrb[10].mxu0 }
 0x658   :  { %v671_v57 = vpop.f32.mrb[11].mxu0 }
 0x659   :  { %3382 = vmatprep.mubr.msk.f32.mxu1 %vm433_vm1, %v671_v57 }
 0x65a   :  { %3383 = vmatmul.mubr.msk.f32.gmra.mrb[6].mxu1 %vm433_vm1, %v3374_v41 }
 0x660   :  { %v3395_v43 = vpop.f32.mrb[12].mxu0 }
 0x661   :  { %v893_v45 = vadd.f32 %v3395_v43, %v4479_v34  ;;  %v887_v58 = vpop.f32.mrb[13].mxu0 }
 0x662   :  { %v888_v59 = vadd.f32 %v887_v58, %v4481_v35 }
 0x663   :  { %v909_v60 = vsel %vm129_vm0, %v893_v45, -inf }
 0x664   :  { %910 = vmax.xlane.f32.xlu1 %v909_v60  ;;  %v3398_v61 = vpop.f32.mrb[14].mxu0  ;;  %v906_v62 = vsel %vm129_vm0, %v888_v59, -inf }
 0x665   :  { %v897_v3 = vpop.f32.mrb[15].mxu0  ;;  %907 = vmax.xlane.f32.xlu0 %v906_v62  ;;  %v903_v6 = vadd.f32 %v3398_v61, %v4489_v50 }
 0x666   :  { %v898_v4 = vadd.f32 %v897_v3, %v4486_v48 }
 0x667   :  { %v915_v34 = vsel %vm129_vm0, %v903_v6, -inf }
 0x668   :  { %v912_v7 = vsel %vm129_vm0, %v898_v4, -inf }
 0x669   :  { %913 = vmax.xlane.f32.xlu0 %v912_v7 }
 0x66d   :  { %916 = vmax.xlane.f32.xlu0 %v915_v34 }
 0x6f1   :  { %v911_v8 = vpop.xlane.xlu1 %910 }
 0x6f2   :  { %v919_v35 = vsub.f32 %v893_v45, %v911_v8  ;;  %v908_v9 = vpop.xlane.xlu0 %907  ;;  %v3112_v45 = vld [vmem:[%s5065_s8] ss:$0 sm:$0xff] }
 0x6f3   :  { %v918_v10 = vsub.f32 %v888_v59, %v908_v9 }
 0x6f4   :  { %v924_v11 = vmul.f32 1.442695, %v919_v35 }
 0x6f5   :  { %v922_v12 = vmul.f32 1.442695, %v918_v10 }
 0x6f6   :  { %3846 = vpow2.f32 %v924_v11  ;;  %v914_v15 = vpop.xlane.xlu0 %913 }
 0x6f7   :  { %3848 = vpow2.f32 %v922_v12  ;;  %v920_v16 = vsub.f32 %v898_v4, %v914_v15 }
 0x6f9   :  { %v926_v13 = vmul.f32 1.442695, %v920_v16 }
 0x6fa   :  { %v917_v48 = vpop.xlane.xlu0 %916 }
 0x6fb   :  { %3850 = vpow2.f32 %v926_v13  ;;  %v921_v50 = vsub.f32 %v903_v6, %v917_v48 }
 0x6fd   :  { %v928_v18 = vmul.f32 1.442695, %v921_v50 }
 0x6ff   :  { %3852 = vpow2.f32 %v928_v18 }
 0x700   :  { %v3847_v21 = vpop.eup %3846 }
 0x701   :  { %v3849_v63 = vpop.eup %3848  ;;  %v933_v56 = vsel %vm129_vm0, %v3847_v21, 0.0 }
 0x702   :  { %934 = vadd.xlane.f32.xlu1 %v933_v56  ;;  %v930_v23 = vsel %vm129_vm0, %v3849_v63, 0.0 }
 0x703   :  { %931 = vadd.xlane.f32.xlu0 %v930_v23 }
 0x705   :  { %v3851_v25 = vpop.eup %3850 }
 0x706   :  { %v936_v17 = vsel %vm129_vm0, %v3851_v25, 0.0 }
 0x707   :  { %937 = vadd.xlane.f32.xlu0 %v936_v17 }
 0x709   :  { %v3853_v26 = vpop.eup %3852 }
 0x70a   :  { %v939_v44 = vsel %vm129_vm0, %v3853_v26, 0.0 }
 0x70b   :  { %940 = vadd.xlane.f32.xlu1 %v939_v44 }
 0x71c   :  { %3788 = vrot.lane.b32.xlu1 %v3787_v40, %s4106_s22  ;;  %v1064_v40 = vld [vmem:[#allocation8 + $0x10] sm:$0xff] }
 0x71d   :  { %3783 = vrot.lane.b32.xlu0 %v3782_v27, %s4106_s22  ;;  %v3623_v27 = vpack.c.bf16 %v1065_v33, %v1064_v40 }
 0x78f   :  { %v935_v28 = vpop.xlane.xlu1 %934 }
 0x790   :  { %v932_v19 = vpop.xlane.xlu0 %931 }
 0x791   :  { %3854 = vrcp.f32 %v932_v19 }
 0x792   :  { %3856 = vrcp.f32 %v935_v28 }
 0x794   :  { %v938_v29 = vpop.xlane.xlu0 %937 }
 0x795   :  { %3858 = vrcp.f32 %v938_v29  ;;  %v1245_v29 = vld [vmem:[#allocation10] sm:$0xff] }
 0x798   :  { %v941_v30 = vpop.xlane.xlu1 %940  ;;  %v3784_v32 = vpop.permute.xlu0 %3783 }
 0x799   :  { %v3786_v37 = vunpack.i.h.bf16 %v3784_v32  ;;  %v3785_v47 = vunpack.i.l.bf16 %v3784_v32  ;;  %3860 = vrcp.f32 %v941_v30  ;;  %v1246_v30 = vld [vmem:[#allocation10 + $0x8] sm:$0xff] }
 0x79a   :  { %v3627_v32 = vpack.c.bf16 %v1246_v30, %v1245_v29 }
 0x79b   :  { %v3855_v46 = vpop.eup %3854  ;;  %v3615_v22 = vpack.c.bf16 %v3786_v37, %v3785_v47  ;;  %v1247_v37 = vld [vmem:[#allocation10 + $0x10] sm:$0xff]  ;;  %v1248_v47 = vld [vmem:[#allocation10 + $0x18] sm:$0xff] }
 0x79c   :  { %v3789_v31 = vpop.permute.xlu1 %3788  ;;  %v946_v36 = vmul.f32 %v3855_v46, %v3849_v63  ;;  %v3857_v39 = vpop.eup %3856  ;;  %3628 = vmatprep.subr.bf16.mxu0 %v3627_v32  ;;  %v3631_v46 = vpack.c.bf16 %v1248_v47, %v1247_v37 }
 0x79d   :  { %v3791_v49 = vunpack.i.h.bf16 %v3789_v31  ;;  %v3790_v20 = vunpack.i.l.bf16 %v3789_v31  ;;  %3616 = vmatprep.subr.bf16.mxu1 %v3615_v22  ;;  %v947_v52 = vmul.f32 %v3857_v39, %v3847_v21  ;;  %3630 = vmatpush3.bf16.msra.mxu0 %v3627_v32 }
 0x79e   :  { %3618 = vmatpush3.bf16.msra.mxu1 %v3615_v22  ;;  %3407 = vmatprep.mubr.msk.f32.mxu1 %vm129_vm0, %v946_v36 }
 0x79f   :  { %v3619_v24 = vpack.c.bf16 %v3791_v49, %v3790_v20  ;;  %v3859_v51 = vpop.eup %3858  ;;  %3632 = vmatprep.subr.bf16.mxu0 %v3631_v46 }
 0x7a0   :  { %v948_v42 = vmul.f32 %v3859_v51, %v3851_v25 }
 0x7a1   :  { %3620 = vmatprep.subr.bf16.mxu1 %v3619_v24  ;;  %3634 = vmatpush3.bf16.msra.mxu0 %v3631_v46 }
 0x7a2   :  { %3622 = vmatpush3.bf16.msra.mxu1 %v3619_v24 }
 0x7a3   :  { %3624 = vmatprep.subr.bf16.mxu1 %v3623_v27  ;;  %v3861_v53 = vpop.eup %3860 }
 0x7a4   :  { %v949_v54 = vmul.f32 %v3861_v53, %v3853_v26 }
 0x7a5   :  { %3408 = vmatmul.mubr.msk.f32.vlgmr.msra.gmra.mrb[8].mxu1 %vm129_vm0, %v947_v52 }
 0x7a6   :  { %3410 = vmatprep.mubr.msk.f32.mxu1 %vm129_vm0, %v948_v42  ;;  %3626 = vmatpush3.bf16.msra.mxu1 %v3623_v27  ;;  %v3129_v42 = vld [vmem:[%s5066_s9] ss:$0 sm:$0xff] }
 0x7a9   :  { %3411 = vmatmul.mubr.msk.f32.gmra.mrb[10].mxu1 %vm129_vm0, %v949_v54 }
 0x878   :  { %v3409_v55 = vpop.f32.mrb[8].mxu1 }
 0x879   :  { %v1044_v41 = vpop.f32.mrb[9].mxu1 }
 0x87a   :  { %3417 = vmatprep.mubr.msk.f32.mxu1 %vm433_vm1, %v1044_v41 }
 0x87b   :  { %3418 = vmatmul.mubr.msk.f32.vlgmr.msra.gmra.mrb[4].mxu1 %vm433_vm1, %v3409_v55 }
 0x87c   :  { %v3412_v57 = vpop.f32.mrb[10].mxu1 }
 0x87d   :  { %v1054_v43 = vpop.f32.mrb[11].mxu1 }
 0x87e   :  { %3420 = vmatprep.mubr.msk.f32.mxu1 %vm433_vm1, %v1054_v43 }
 0x87f   :  { %3421 = vmatmul.mubr.msk.f32.gmra.mrb[6].mxu1 %vm433_vm1, %v3412_v57  ;;  %v3130_v57 = vld [vmem:[%s5067_s10] ss:$0 sm:$0xff] }
 0x94e   :  { %v3419_v58 = vpop.f32.mrb[4].mxu1 }
 0x94f   :  { %v3731_v59 = vadd.f32 %v3419_v58, %v3112_v45  ;;  %v1144_v60 = vpop.f32.mrb[5].mxu1 }
 0x950   :  { %v3732_v61 = vadd.f32 %v3112_v45, %v1144_v60 }
 0x951   :  { %v4560_v62 = vadd.f32 %v3731_v59, %v4282_v2 }
 0x952   :  { %v4563_v3 = vadd.f32 %v3732_v61, %v4278_v0  ;;  %v3422_v4 = vpop.f32.mrb[6].mxu1 }
 0x953   :  { %v3733_v6 = vadd.f32 %v3422_v4, %v3112_v45  ;;  %v1154_v7 = vpop.f32.mrb[7].mxu1  ;;  %v1176_v34 = vsel %vm129_vm0, %v4560_v62, 0.0 }
 0x954   :  { %v3734_v8 = vadd.f32 %v3112_v45, %v1154_v7  ;;  %1177 = vadd.xlane.f32.xlu0 %v1176_v34  ;;  %v1173_v35 = vsel %vm129_vm0, %v4563_v3, 0.0 }
 0x955   :  { %v4570_v9 = vadd.f32 %v3733_v6, %v4288_v5  ;;  %1174 = vadd.xlane.f32.xlu1 %v1173_v35 }
 0x956   :  { %v4573_v2 = vadd.f32 %v3734_v8, %v4280_v1 }
 0x957   :  { %v1182_v0 = vsel %vm129_vm0, %v4570_v9, 0.0 }
 0x958   :  { %v1179_v10 = vsel %vm129_vm0, %v4573_v2, 0.0 }
 0x959   :  { %1183 = vadd.xlane.f32.xlu1 %v1182_v0  ;;  %1180 = vadd.xlane.f32.xlu0 %v1179_v10  ;;  %v1469_v0 = vld [vmem:[%s5070_s13] sm:$0xff]  ;;  %v1470_v10 = vld [vmem:[%s5070_s13 + $0x8] sm:$0xff] }
 0x9e1   :  { %v1178_v11 = vpop.xlane.xlu0 %1177 }
 0x9e2   :  { %v1186_v12 = vmul.f32 0.03125, %v1178_v11  ;;  %v1175_v15 = vpop.xlane.xlu1 %1174  ;;  %v3635_v11 = vpack.c.bf16 %v1470_v10, %v1469_v0 }
 0x9e3   :  { %v1185_v16 = vmul.f32 0.03125, %v1175_v15  ;;  %v1472_v15 = vld [vmem:[%s5070_s13 + $0x18] sm:$0xff] }
 0x9e4   :  { %v1190_v13 = vsub.f32 %v4560_v62, %v1186_v12  ;;  %3636 = vmatprep.subr.bf16.mxu1 %v3635_v11  ;;  %v1471_v12 = vld [vmem:[%s5070_s13 + $0x10] sm:$0xff] }
 0x9e5   :  { %v1189_v5 = vsub.f32 %v4563_v3, %v1185_v16  ;;  %3638 = vmatpush3.bf16.msra.mxu1 %v3635_v11  ;;  %v3639_v16 = vpack.c.bf16 %v1472_v15, %v1471_v12 }
 0x9e6   :  { %v1184_v48 = vpop.xlane.xlu1 %1183  ;;  %v1181_v50 = vpop.xlane.xlu0 %1180  ;;  %v1194_v1 = vmul.f32 %v1190_v13, %v1190_v13 }
 0x9e7   :  { %v1188_v18 = vmul.f32 0.03125, %v1184_v48  ;;  %v1187_v21 = vmul.f32 0.03125, %v1181_v50  ;;  %v1193_v63 = vmul.f32 %v1189_v5, %v1189_v5  ;;  %3640 = vmatprep.subr.bf16.mxu1 %v3639_v16  ;;  %v1475_v50 = vld [vmem:[%s5070_s13 + $0x30] sm:$0xff] }
 0x9e8   :  { %v1200_v56 = vsel %vm129_vm0, %v1194_v1, 0.0  ;;  %v1476_v1 = vld [vmem:[%s5070_s13 + $0x38] sm:$0xff] }
 0x9e9   :  { %v1192_v23 = vsub.f32 %v4570_v9, %v1188_v18  ;;  %v1191_v25 = vsub.f32 %v4573_v2, %v1187_v21  ;;  %1201 = vadd.xlane.f32.xlu1 %v1200_v56  ;;  %v1197_v17 = vsel %vm129_vm0, %v1193_v63, 0.0  ;;  %3642 = vmatpush3.bf16.msra.mxu1 %v3639_v16  ;;  %v3647_v18 = vpack.c.bf16 %v1476_v1, %v1475_v50  ;;  %v3131_v21 = vld [vmem:[%s5069_s12] ss:$0 sm:$0xff] }
 0x9ea   :  { %1198 = vadd.xlane.f32.xlu0 %v1197_v17 }
 0x9eb   :  { %v1196_v26 = vmul.f32 %v1192_v23, %v1192_v23  ;;  %v1195_v44 = vmul.f32 %v1191_v25, %v1191_v25 }
 0x9ed   :  { %v1206_v19 = vsel %vm129_vm0, %v1196_v26, 0.0  ;;  %v1203_v28 = vsel %vm129_vm0, %v1195_v44, 0.0 }
 0x9ee   :  { %1207 = vadd.xlane.f32.xlu1 %v1206_v19  ;;  %1204 = vadd.xlane.f32.xlu0 %v1203_v28 }
 0xa76   :  { %v1202_v22 = vpop.xlane.xlu1 %1201 }
 0xa77   :  { %v1210_v31 = vmul.f32 0.03125, %v1202_v22  ;;  %v1199_v36 = vpop.xlane.xlu0 %1198 }
 0xa78   :  { %v1209_v40 = vmul.f32 0.03125, %v1199_v36 }
 0xa79   :  { %v1214_v33 = vadd.f32 1e-05, %v1210_v31 }
 0xa7a   :  { %v1213_v49 = vadd.f32 1e-05, %v1209_v40 }
 0xa7b   :  { %3862 = vrsqrt.f32 %v1214_v33  ;;  %v1208_v20 = vpop.xlane.xlu1 %1207  ;;  %v1205_v24 = vpop.xlane.xlu0 %1204 }
 0xa7c   :  { %3864 = vrsqrt.f32 %v1213_v49  ;;  %v1212_v27 = vmul.f32 0.03125, %v1208_v20  ;;  %v1211_v39 = vmul.f32 0.03125, %v1205_v24 }
 0xa7e   :  { %v1216_v51 = vadd.f32 1e-05, %v1212_v27  ;;  %v1215_v52 = vadd.f32 1e-05, %v1211_v39 }
 0xa80   :  { %3866 = vrsqrt.f32 %v1216_v51 }
 0xa81   :  { %3868 = vrsqrt.f32 %v1215_v52 }
 0xa85   :  { %v3863_v53 = vpop.eup %3862 }
 0xa86   :  { %v3865_v54 = vpop.eup %3864  ;;  %v1222_v55 = vmul.f32 %v3863_v53, %v1190_v13  ;;  %v1473_v13 = vld [vmem:[%s5070_s13 + $0x20] sm:$0xff] }
 0xa87   :  { %v1221_v41 = vmul.f32 %v3865_v54, %v1189_v5  ;;  %v1474_v5 = vld [vmem:[%s5070_s13 + $0x28] sm:$0xff] }
 0xa88   :  { %v1232_v43 = vmul.f32 %v3129_v42, %v1222_v55  ;;  %v3643_v48 = vpack.c.bf16 %v1474_v5, %v1473_v13 }
 0xa89   :  { %v1231_v45 = vmul.f32 %v3129_v42, %v1221_v41 }
 0xa8a   :  { %v3867_v58 = vpop.eup %3866  ;;  %v1242_v4 = vadd.f32 %v3130_v57, %v1232_v43  ;;  %3644 = vmatprep.subr.bf16.mxu1 %v3643_v48 }
 0xa8b   :  { %v3869_v59 = vpop.eup %3868  ;;  %v1241_v60 = vadd.f32 %v3130_v57, %v1231_v45  ;;  %v1224_v61 = vmul.f32 %v3867_v58, %v1192_v23  ;;  %3646 = vmatpush3.bf16.msra.mxu1 %v3643_v48 }
 0xa8c   :  { %v1223_v6 = vmul.f32 %v3869_v59, %v1191_v25  ;;  %3648 = vmatprep.subr.bf16.mxu1 %v3647_v18 }
 0xa8d   :  { %3431 = vmatprep.mubr.msk.f32.mxu0 %vm129_vm0, %v1241_v60  ;;  %v1234_v7 = vmul.f32 %v3129_v42, %v1224_v61 }
 0xa8e   :  { %3432 = vmatmul.mubr.msk.f32.vlgmr.msra.gmra.mrb[16].mxu0 %vm129_vm0, %v1242_v4  ;;  %v1233_v34 = vmul.f32 %v3129_v42, %v1223_v6 }
 0xa8f   :  { %v1244_v8 = vadd.f32 %v3130_v57, %v1234_v7  ;;  %3650 = vmatpush3.bf16.msra.mxu1 %v3647_v18 }
 0xa90   :  { %v1243_v35 = vadd.f32 %v3130_v57, %v1233_v34 }
 0xa92   :  { %3434 = vmatprep.mubr.msk.f32.mxu0 %vm129_vm0, %v1243_v35 }
 0xa93   :  { %3435 = vmatmul.mubr.msk.f32.gmra.mrb[18].mxu0 %vm129_vm0, %v1244_v8 }
 0xa94   :  { %1755 = vmatprep.mubr.f32.mxu0 %v4101_v38 }
 0xb61   :  { %v3433_v63 = vpop.f32.mrb[16].mxu0 }
 0xb62   :  { %v4625_v56 = vadd.f32 %v3433_v63, %v3131_v21  ;;  %v1334_v23 = vpop.f32.mrb[17].mxu0 }
 0xb63   :  { %v4627_v25 = vadd.f32 %v3131_v21, %v1334_v23 }
 0xb64   :  { %v4630_v17 = vmul.f32 0.70710677, %v4625_v56 }
 0xb65   :  { %v4633_v26 = vmul.f32 0.70710677, %v4627_v25 }
 0xb66   :  { %v1366_v44 = vand.u32 2147483647, %v4630_v17  ;;  %v3436_v19 = vpop.f32.mrb[18].mxu0  ;;  %vm1358_vm3 = vcmp.lt.f32.partialorder %v4630_v17, 0.0 }
 0xb67   :  { %v1365_v28 = vand.u32 2147483647, %v4633_v26  ;;  %v4637_v29 = vadd.f32 %v3436_v19, %v3131_v21  ;;  %v1344_v30 = vpop.f32.mrb[19].mxu0  ;;  %vm1357_vm4 = vcmp.lt.f32.partialorder %v4633_v26, 0.0 }
 0xb68   :  { %v1370_v32 = vmul.f32 0.3275911, %v1366_v44  ;;  %v4639_v37 = vadd.f32 %v3131_v21, %v1344_v30  ;;  %v1430_v53 = vsub.f32 0.0, %v1366_v44 }
 0xb69   :  { %v1369_v47 = vmul.f32 0.3275911, %v1365_v28  ;;  %v4642_v46 = vmul.f32 0.70710677, %v4637_v29  ;;  %v1429_v55 = vsub.f32 0.0, %v1365_v28 }
 0xb6a   :  { %v1374_v22 = vadd.f32 1.0, %v1370_v32  ;;  %v4645_v31 = vmul.f32 0.70710677, %v4639_v37  ;;  %v1434_v45 = vmul.f32 %v1430_v53, %v1366_v44 }
 0xb6b   :  { %v1373_v36 = vadd.f32 1.0, %v1369_v47  ;;  %v1368_v40 = vand.u32 2147483647, %v4642_v46  ;;  %v1433_v61 = vmul.f32 %v1429_v55, %v1365_v28  ;;  %vm1360_vm5 = vcmp.lt.f32.partialorder %v4642_v46, 0.0 }
 0xb6c   :  { %3870 = vrcp.f32 %v1374_v22  ;;  %v1367_v49 = vand.u32 2147483647, %v4645_v31  ;;  %v1439_v0 = vmul.f32 1.442695, %v1434_v45  ;;  %vm1359_vm7 = vcmp.lt.f32.partialorder %v4645_v31, 0.0 }
 0xb6d   :  { %3872 = vrcp.f32 %v1373_v36  ;;  %v1372_v33 = vmul.f32 0.3275911, %v1368_v40  ;;  %v1432_v4 = vsub.f32 0.0, %v1368_v40  ;;  %v1437_v16 = vmul.f32 1.442695, %v1433_v61 }
 0xb6e   :  { %v1371_v24 = vmul.f32 0.3275911, %v1367_v49  ;;  %v1431_v12 = vsub.f32 0.0, %v1367_v49 }
 0xb6f   :  { %v1376_v20 = vadd.f32 1.0, %v1372_v33  ;;  %v1436_v13 = vmul.f32 %v1432_v4, %v1368_v40 }
 0xb70   :  { %v1375_v27 = vadd.f32 1.0, %v1371_v24  ;;  %v1435_v23 = vmul.f32 %v1431_v12, %v1367_v49 }
 0xb71   :  { %3874 = vrcp.f32 %v1376_v20  ;;  %v1443_v19 = vmul.f32 1.442695, %v1436_v13 }
 0xb72   :  { %3876 = vrcp.f32 %v1375_v27  ;;  %v1441_v40 = vmul.f32 1.442695, %v1435_v23 }
 0xb73   :  { %3878 = vpow2.f32 %v1439_v0 }
 0xb74   :  { %3880 = vpow2.f32 %v1437_v16 }
 0xb75   :  { %3882 = vpow2.f32 %v1443_v19 }
 0xb76   :  { %v3871_v39 = vpop.eup %3870  ;;  %3884 = vpow2.f32 %v1441_v40 }
 0xb77   :  { %v3873_v51 = vpop.eup %3872  ;;  %v1382_v52 = vmul.f32 %v3871_v39, %v1374_v22 }
 0xb78   :  { %v1381_v42 = vmul.f32 %v3873_v51, %v1373_v36 }
 0xb79   :  { %v1386_v54 = vsub.f32 2.0, %v1382_v52 }
 0xb7a   :  { %v1385_v41 = vsub.f32 2.0, %v1381_v42 }
 0xb7b   :  { %v3875_v57 = vpop.eup %3874  ;;  %v1390_v43 = vmul.f32 %v3871_v39, %v1386_v54 }
 0xb7c   :  { %v1389_v58 = vmul.f32 %v3873_v51, %v1385_v41  ;;  %v1384_v59 = vmul.f32 %v3875_v57, %v1376_v20  ;;  %v3877_v6 = vpop.eup %3876 }
 0xb7d   :  { %v1394_v60 = vmul.f32 1.0614054, %v1390_v43  ;;  %v1383_v35 = vmul.f32 %v3877_v6, %v1375_v27  ;;  %v3879_v55 = vpop.eup %3878 }
 0xb7e   :  { %v1393_v7 = vmul.f32 1.0614054, %v1389_v58  ;;  %v1388_v34 = vsub.f32 2.0, %v1384_v59  ;;  %v3881_v45 = vpop.eup %3880 }
 0xb7f   :  { %v1398_v8 = vadd.f32 -1.4531521, %v1394_v60  ;;  %v1387_v5 = vsub.f32 2.0, %v1383_v35  ;;  %v3883_v0 = vpop.eup %3882 }
 0xb80   :  { %v1397_v10 = vadd.f32 -1.4531521, %v1393_v7  ;;  %v1392_v11 = vmul.f32 %v3875_v57, %v1388_v34  ;;  %v4107_v34 = vmov 1.0   ;;  %v3885_v13 = vpop.eup %3884 }
 0xb81   :  { %v1402_v15 = vmul.f32 %v1398_v8, %v1390_v43  ;;  %v1391_v18 = vmul.f32 %v3877_v6, %v1387_v5  ;;  %v1362_v8 = vsel %vm1358_vm3, -1.0, %v4107_v34  ;;  %v1457_v5 = vmul.f32 0.5, %v4627_v25 }
 0xb82   :  { %v1401_v48 = vmul.f32 %v1397_v10, %v1389_v58  ;;  %v1396_v50 = vmul.f32 1.0614054, %v1392_v11  ;;  %v1363_v19 = vsel %vm1359_vm7, -1.0, %v4107_v34 }
 0xb83   :  { %v1406_v1 = vadd.f32 1.4214138, %v1402_v15  ;;  %v1395_v28 = vmul.f32 1.0614054, %v1391_v18 }
 0xb84   :  { %v1405_v21 = vadd.f32 1.4214138, %v1401_v48  ;;  %v1400_v63 = vadd.f32 -1.4531521, %v1396_v50 }
 0xb85   :  { %v1410_v44 = vmul.f32 %v1406_v1, %v1390_v43  ;;  %v1399_v22 = vadd.f32 -1.4531521, %v1395_v28  ;;  %v1458_v1 = vmul.f32 0.5, %v4625_v56  ;;  %v1459_v28 = vmul.f32 0.5, %v4639_v37 }
 0xb86   :  { %v1409_v30 = vmul.f32 %v1405_v21, %v1389_v58  ;;  %v1404_v32 = vmul.f32 %v1400_v63, %v1392_v11 }
 0xb87   :  { %v1414_v47 = vadd.f32 -0.28449672, %v1410_v44  ;;  %v1403_v24 = vmul.f32 %v1399_v22, %v1391_v18  ;;  %v3140_v22 = vld [vmem:[%s5071_s14] ss:$0 sm:$0xff] }
 0xb88   :  { %v1413_v36 = vadd.f32 -0.28449672, %v1409_v30  ;;  %v1408_v33 = vadd.f32 1.4214138, %v1404_v32  ;;  %v1460_v30 = vmul.f32 0.5, %v4637_v29 }
 0xb89   :  { %v1418_v20 = vmul.f32 %v1414_v47, %v1390_v43  ;;  %v1407_v52 = vadd.f32 1.4214138, %v1403_v24 }
 0xb8a   :  { %v1417_v27 = vmul.f32 %v1413_v36, %v1389_v58  ;;  %v1412_v39 = vmul.f32 %v1408_v33, %v1392_v11 }
 0xb8b   :  { %v1422_v51 = vadd.f32 0.2548296, %v1418_v20  ;;  %v1411_v54 = vmul.f32 %v1407_v52, %v1391_v18 }
 0xb8c   :  { %v1421_v53 = vadd.f32 0.2548296, %v1417_v27  ;;  %v1416_v49 = vadd.f32 -0.28449672, %v1412_v39 }
 0xb8d   :  { %v1426_v42 = vmul.f32 %v1422_v51, %v1390_v43  ;;  %v1415_v60 = vadd.f32 -0.28449672, %v1411_v54 }
 0xb8e   :  { %v1425_v41 = vmul.f32 %v1421_v53, %v1389_v58  ;;  %v1420_v57 = vmul.f32 %v1416_v49, %v1392_v11  ;;  %v1361_v58 = vsel %vm1357_vm4, -1.0, %v4107_v34 }
 0xb8f   :  { %v1446_v59 = vmul.f32 %v3879_v55, %v1426_v42  ;;  %v1419_v7 = vmul.f32 %v1415_v60, %v1391_v18 }
 0xb90   :  { %v1445_v61 = vmul.f32 %v3881_v45, %v1425_v41  ;;  %v1424_v4 = vadd.f32 0.2548296, %v1420_v57 }
 0xb91   :  { %v1450_v6 = vsub.f32 1.0, %v1446_v59  ;;  %v1423_v12 = vadd.f32 0.2548296, %v1419_v7 }
 0xb92   :  { %v1449_v35 = vsub.f32 1.0, %v1445_v61  ;;  %v1428_v43 = vmul.f32 %v1424_v4, %v1392_v11  ;;  %v1364_v11 = vsel %vm1360_vm5, -1.0, %v4107_v34 }
 0xb93   :  { %v1454_v10 = vmul.f32 %v1450_v6, %v1362_v8  ;;  %v1427_v26 = vmul.f32 %v1423_v12, %v1391_v18  ;;  %v3146_v12 = vld [vmem:[%s5061_s4 + $0x48] sm:$0xff] }
 0xb94   :  { %v1453_v15 = vmul.f32 %v1449_v35, %v1361_v58  ;;  %v1448_v17 = vmul.f32 %v3883_v0, %v1428_v43 }
 0xb95   :  { %v1462_v16 = vadd.f32 1.0, %v1454_v10  ;;  %v1447_v21 = vmul.f32 %v3885_v13, %v1427_v26  ;;  %v3147_v26 = vld [vmem:[%s5061_s4 + $0x50] sm:$0xff] }
 0xb96   :  { %v1461_v48 = vadd.f32 1.0, %v1453_v15  ;;  %v1452_v50 = vsub.f32 1.0, %v1448_v17  ;;  %v3148_v15 = vld [vmem:[%s5061_s4 + $0x58] sm:$0xff] }
 0xb97   :  { %v1466_v44 = vmul.f32 %v1462_v16, %v1458_v1  ;;  %v1451_v46 = vsub.f32 1.0, %v1447_v21  ;;  %v3651_v17 = vpack.c.bf16 %v3148_v15, %v3146_v12  ;;  %v3145_v16 = vld [vmem:[%s5061_s4 + $0x40] sm:$0xff] }
 0xb98   :  { %v1465_v63 = vmul.f32 %v1461_v48, %v1457_v5  ;;  %v1456_v23 = vmul.f32 %v1452_v50, %v1364_v11  ;;  %v3653_v13 = vpack.c.bf16 %v3147_v26, %v3145_v16  ;;  %v3150_v5 = vld [vmem:[%s5061_s4 + $0x68] sm:$0xff]  ;;  %v3152_v48 = vld [vmem:[%s5061_s4 + $0x78] sm:$0xff]  ;;  %v3149_v1 = vld [vmem:[%s5061_s4 + $0x60] sm:$0xff] }
 0xb99   :  { %v1455_v18 = vmul.f32 %v1451_v46, %v1363_v19  ;;  %3652 = vmatprep.subr.bf16.mxu0 %v3651_v17  ;;  %v3655_v50 = vpack.c.bf16 %v3152_v48, %v3150_v5  ;;  %v3151_v11 = vld [vmem:[%s5061_s4 + $0x70] sm:$0xff]  ;;  %v4757_v46 = vld [vmem:[%s5062_s5 + $0x20] sm:$0xff]  ;;  %v4763_v19 = vld [vmem:[#allocation7 + $0x38] sm:$0xff] }
 0xb9a   :  { %3453 = vmatprep.mubr.msk.f32.mxu1 %vm1477_vm6, %v1465_v63  ;;  %v1464_v25 = vadd.f32 1.0, %v1456_v23  ;;  %3654 = vmatpush1.bf16.msra.mxu0 %v3653_v13  ;;  %v3657_v21 = vpack.c.bf16 %v3151_v11, %v3149_v1  ;;  %v4744_v63 = vld [vmem:[#allocation7 + $0x28] sm:$0xff]  ;;  %v4746_v23 = vld [vmem:[#allocation7 + $0x20] sm:$0xff]  ;;  %v3160_v16 = vld [vmem:[%s5062_s5 + $0x38] sm:$0xff] }
 0xb9b   :  { %3454 = vmatmul.mubr.msk.f32.vlgmr.msra.gmra.mrb[12].mxu1 %vm1477_vm6, %v1466_v44  ;;  %v1463_v56 = vadd.f32 1.0, %v1455_v18  ;;  %3656 = vmatprep.subr.bf16.mxu0 %v3655_v50  ;;  %v4752_v44 = vld [vmem:[#allocation7 + $0x30] sm:$0xff]  ;;  %v4770_v18 = vld [vmem:[%s5062_s5 + $0x28] sm:$0xff] }
 0xb9c   :  { %v1468_v31 = vmul.f32 %v1464_v25, %v1460_v30 }
 0xb9d   :  { %v1467_v32 = vmul.f32 %v1463_v56, %v1459_v28 }
 0xb9e   :  { %3658 = vmatpush1.bf16.msra.mxu0 %v3657_v21 }
 0xb9f   :  { %3456 = vmatprep.mubr.msk.f32.mxu1 %vm1477_vm6, %v1467_v32 }
 0xba0   :  { %3457 = vmatmul.mubr.msk.f32.gmra.mrb[14].mxu1 %vm1477_vm6, %v1468_v31 }
 0xc6e   :  { %v3455_v47 = vpop.f32.mrb[12].mxu1 }
 0xc6f   :  { %v1576_v36 = vadd.f32 %v3455_v47, %v4560_v62  ;;  %v1556_v33 = vpop.f32.mrb[13].mxu1 }
 0xc70   :  { %v1575_v40 = vadd.f32 %v1556_v33, %v4563_v3 }
 0xc71   :  { %v4670_v37 = vadd.f32 %v3140_v22, %v1576_v36 }
 0xc72   :  { %v4672_v20 = vadd.f32 %v3140_v22, %v1575_v40 }
 0xc73   :  { %1591 = vst.msk [vmem:[#allocation11 + $0x8] sm:$0xff] %vm129_vm0, %v4670_v37  ;;  %v1601_v29 = vsel %vm129_vm0, %v4670_v37, 0.0  ;;  %v3458_v24 = vpop.f32.mrb[14].mxu1 }
 0xc74   :  { %1590 = vst.msk [vmem:[#allocation11] sm:$0xff] %vm129_vm0, %v4672_v20  ;;  %1602 = vadd.xlane.f32.xlu1 %v1601_v29  ;;  %v1598_v62 = vsel %vm129_vm0, %v4672_v20, 0.0  ;;  %v1578_v3 = vadd.f32 %v3458_v24, %v4570_v9  ;;  %v1566_v27 = vpop.f32.mrb[15].mxu1 }
 0xc75   :  { %1599 = vadd.xlane.f32.xlu0 %v1598_v62  ;;  %v1577_v39 = vadd.f32 %v1566_v27, %v4573_v2 }
 0xc76   :  { %v4684_v51 = vadd.f32 %v3140_v22, %v1578_v3  ;;  %v3143_v3 = vld [vmem:[%s5059_s2 + $0x1] ss:$0 sm:$0xff] }
 0xc77   :  { %v4686_v52 = vadd.f32 %v3140_v22, %v1577_v39 }
 0xc78   :  { %1593 = vst.msk [vmem:[#allocation11 + $0x18] sm:$0xff] %vm129_vm0, %v4684_v51  ;;  %v1607_v53 = vsel %vm129_vm0, %v4684_v51, 0.0 }
 0xc79   :  { %1592 = vst.msk [vmem:[#allocation11 + $0x10] sm:$0xff] %vm129_vm0, %v4686_v52  ;;  %1608 = vadd.xlane.f32.xlu1 %v1607_v53  ;;  %v1604_v9 = vsel %vm129_vm0, %v4686_v52, 0.0  ;;  %v3144_v53 = vld [vmem:[%s5060_s3 + $0x1] ss:$0 sm:$0xff] }
 0xc7a   :  { %1605 = vadd.xlane.f32.xlu0 %v1604_v9 }
 0xd01   :  { %v1603_v49 = vpop.xlane.xlu1 %1602 }
 0xd02   :  { %v1611_v2 = vmul.f32 0.03125, %v1603_v49  ;;  %v1600_v42 = vpop.xlane.xlu0 %1599 }
 0xd03   :  { %v1610_v54 = vmul.f32 0.03125, %v1600_v42 }
 0xd04   :  { %v4697_v55 = vsub.f32 %v4670_v37, %v1611_v2 }
 0xd05   :  { %v4700_v41 = vsub.f32 %v4672_v20, %v1610_v54 }
 0xd06   :  { %v1619_v57 = vmul.f32 %v4697_v55, %v4697_v55  ;;  %v1609_v59 = vpop.xlane.xlu1 %1608 }
 0xd07   :  { %v1618_v45 = vmul.f32 %v4700_v41, %v4700_v41  ;;  %v1613_v61 = vmul.f32 0.03125, %v1609_v59  ;;  %v1606_v4 = vpop.xlane.xlu0 %1605 }
 0xd08   :  { %v1625_v60 = vsel %vm129_vm0, %v1619_v57, 0.0  ;;  %v1612_v7 = vmul.f32 0.03125, %v1606_v4 }
 0xd09   :  { %1626 = vadd.xlane.f32.xlu1 %v1625_v60  ;;  %v1622_v6 = vsel %vm129_vm0, %v1618_v45, 0.0  ;;  %v4709_v8 = vsub.f32 %v4684_v51, %v1613_v61 }
 0xd0a   :  { %1623 = vadd.xlane.f32.xlu0 %v1622_v6  ;;  %v4712_v35 = vsub.f32 %v4686_v52, %v1612_v7 }
 0xd0b   :  { %v1621_v43 = vmul.f32 %v4709_v8, %v4709_v8 }
 0xd0c   :  { %v1620_v0 = vmul.f32 %v4712_v35, %v4712_v35 }
 0xd0d   :  { %v1631_v10 = vsel %vm129_vm0, %v1621_v43, 0.0 }
 0xd0e   :  { %1632 = vadd.xlane.f32.xlu1 %v1631_v10  ;;  %v1628_v58 = vsel %vm129_vm0, %v1620_v0, 0.0  ;;  %v3159_v0 = vld [vmem:[%s5062_s5 + $0x30] sm:$0xff]  ;;  %s3076_s5 = sshll.u32 %s4108_s1, 4  ;;  %s3077_s5 = int_to_ptr.vmem [resolvable:$true] %s3076_s5 }
 0xd0f   :  { %1629 = vadd.xlane.f32.xlu0 %v1628_v58  ;;  %p4069_p13 = scmp.lt.s32.totalorder %s3077_s5, %s3077_s5 }
 0xd1f   :  { %1856 = vrot.lane.b32.xlu1 %v4744_v63, %s4102_s6 }
 0xd23   :  { %1858 = vrot.lane.b32.xlu1 %v4752_v44, %s4102_s6 }
 0xd25   :  { %1854 = vrot.lane.b32.xlu0 %v4746_v23, %s4102_s6 }
 0xd27   :  { %1860 = vrot.lane.b32.xlu1 %v4763_v19, %s4102_s6 }
 0xd29   :  { %1838 = vrot.lane.b32.xlu0 %v4757_v46, %s4103_s24 }
 0xd2b   :  { %1840 = vrot.lane.b32.xlu1 %v4770_v18, %s4103_s24 }
 0xd96   :  { %v1627_v25 = vpop.xlane.xlu1 %1626 }
 0xd97   :  { %v1635_v28 = vmul.f32 0.03125, %v1627_v25  ;;  %v1624_v56 = vpop.xlane.xlu0 %1623 }
 0xd98   :  { %v1634_v30 = vmul.f32 0.03125, %v1624_v56 }
 0xd99   :  { %v1639_v32 = vadd.f32 1e-05, %v1635_v28 }
 0xd9a   :  { %v1638_v31 = vadd.f32 1e-05, %v1634_v30 }
 0xd9b   :  { %3886 = vrsqrt.f32 %v1639_v32  ;;  %v1633_v47 = vpop.xlane.xlu1 %1632 }
 0xd9c   :  { %3888 = vrsqrt.f32 %v1638_v31  ;;  %v1637_v22 = vmul.f32 0.03125, %v1633_v47  ;;  %v1630_v36 = vpop.xlane.xlu0 %1629 }
 0xd9d   :  { %v1636_v33 = vmul.f32 0.03125, %v1630_v36 }
 0xd9e   :  { %v1641_v40 = vadd.f32 1e-05, %v1637_v22 }
 0xd9f   :  { %v1640_v29 = vadd.f32 1e-05, %v1636_v33  ;;  %v1857_v4 = vpop.permute.xlu1 %1856 }
 0xda0   :  { %3890 = vrsqrt.f32 %v1641_v40  ;;  %v1855_v6 = vpop.permute.xlu0 %1854 }
 0xda1   :  { %3892 = vrsqrt.f32 %v1640_v29 }
 0xda3   :  { %v1859_v58 = vpop.permute.xlu1 %1858 }
 0xda4   :  { %v1839_v56 = vpop.permute.xlu0 %1838 }
 0xda5   :  { %v3887_v62 = vpop.eup %3886 }
 0xda6   :  { %v3889_v24 = vpop.eup %3888  ;;  %v1647_v39 = vmul.f32 %v3887_v62, %v4697_v55 }
 0xda7   :  { %v1646_v27 = vmul.f32 %v3889_v24, %v4700_v41  ;;  %v1861_v48 = vpop.permute.xlu1 %1860 }
 0xda8   :  { %v1657_v2 = vmul.f32 %v3143_v3, %v1647_v39 }
 0xda9   :  { %v1656_v9 = vmul.f32 %v3143_v3, %v1646_v27 }
 0xdaa   :  { %v3891_v42 = vpop.eup %3890  ;;  %v1667_v45 = vadd.f32 %v3144_v53, %v1657_v2 }
 0xdab   :  { %v1666_v49 = vadd.f32 %v3144_v53, %v1656_v9  ;;  %v3893_v54 = vpop.eup %3892  ;;  %v1649_v41 = vmul.f32 %v3891_v42, %v4709_v8  ;;  %v1841_v30 = vpop.permute.xlu1 %1840 }
 0xdac   :  { %v1648_v57 = vmul.f32 %v3893_v54, %v4712_v35 }
 0xdad   :  { %3153 = vmatmul.mubr.msk.f32.vlgmr.msra.gmra.mrb[20].mxu0 %vm129_vm0, %v1666_v49  ;;  %v1659_v60 = vmul.f32 %v3143_v3, %v1649_v41 }
 0xdae   :  { %1761 = vmatprep.mubr.f32.mxu0 %v4101_v38  ;;  %v1658_v59 = vmul.f32 %v3143_v3, %v1648_v57 }
 0xdaf   :  { %v1669_v61 = vadd.f32 %v3144_v53, %v1659_v60 }
 0xdb0   :  { %v1668_v55 = vadd.f32 %v3144_v53, %v1658_v59 }
 0xdb1   :  { %3154 = vmatmul.mubr.msk.f32.gmra.mrb[22].mxu0 %vm129_vm0, %v1667_v45 }
 0xdb2   :  { %1767 = vmatprep.mubr.f32.mxu0 %v4101_v38 }
 0xdb5   :  { %3155 = vmatmul.mubr.msk.f32.gmra.mrb[24].mxu0 %vm129_vm0, %v1668_v55 }
 0xdb6   :  { %1773 = vmatprep.mubr.f32.mxu0 %v4101_v38 }
 0xdb9   :  { %3156 = vmatmul.mubr.msk.f32.gmra.mrb[26].mxu0 %vm129_vm0, %v1669_v61 }
 0xe80   :  { %v4791_v7 = vpop.f32.mrb[20].mxu0 }
 0xe81   :  { %v4793_v35 = vpop.f32.mrb[21].mxu0  ;;  %v1866_v8 = vmul.f32 %v1855_v6, %v4791_v7  ;;  %v1850_v31 = vmul.f32 %v1839_v56, %v4791_v7  ;;  %v1790_v60 = vmul.f32 %v4757_v46, %v4791_v7 }
 0xe83   :  { %1874 = vrot.lane.b32.xlu0 %v1866_v8, %s4102_s6 }
 0xe84   :  { %v4797_v43 = vpop.f32.mrb[22].mxu0 }
 0xe85   :  { %v4802_v38 = vpop.f32.mrb[23].mxu0  ;;  %v1867_v10 = vmul.f32 %v1857_v4, %v4797_v43  ;;  %v1851_v47 = vmul.f32 %v1841_v30, %v4797_v43 }
 0xe86   :  { %v3812_v12 = vpack.i.bf16 %v4802_v38, %v4793_v35  ;;  %v3671_v15 = vpack.c.bf16 %v4802_v38, %v4793_v35  ;;  %v2535_v38 = vld [vmem:[#allocation8 + $0x30] sm:$0xff] }
 0xe87   :  { %1876 = vrot.lane.b32.xlu1 %v1867_v10, %s4102_s6  ;;  %1842 = vrot.lane.b32.xlu0 %v3159_v0, %s4103_s24 }
 0xe88   :  { %v1769_v17 = vpop.f32.mrb[24].mxu0  ;;  %3672 = vmatprep.subr.bf16.mxu1 %v3671_v15 }
 0xe89   :  { %v4814_v26 = vpop.f32.mrb[25].mxu0  ;;  %3674 = vmatpush3.bf16.msra.mxu1 %v3671_v15  ;;  %v1868_v13 = vmul.f32 %v1859_v58, %v1769_v17  ;;  %v4816_v5 = vmul.f32 %v3159_v0, %v1769_v17 }
 0xe8b   :  { %1844 = vrot.lane.b32.xlu1 %v3160_v16, %s4103_s24  ;;  %1878 = vrot.lane.b32.xlu0 %v1868_v13, %s4102_s6 }
 0xe8c   :  { %v1775_v50 = vpop.f32.mrb[26].mxu0 }
 0xe8d   :  { %v4820_v1 = vpop.f32.mrb[27].mxu0  ;;  %v1869_v11 = vmul.f32 %v1861_v48, %v1775_v50  ;;  %v4822_v21 = vmul.f32 %v3160_v16, %v1775_v50 }
 0xe8e   :  { %v3817_v25 = vpack.i.bf16 %v4820_v1, %v4814_v26  ;;  %v3675_v28 = vpack.c.bf16 %v4820_v1, %v4814_v26 }
 0xe8f   :  { %1880 = vrot.lane.b32.xlu1 %v1869_v11, %s4102_s6  ;;  %1798 = vrot.lane.b32.xlu0 %v4746_v23, %s4104_s29 }
 0xe90   :  { %3676 = vmatprep.subr.bf16.mxu1 %v3675_v28 }
 0xe91   :  { %3678 = vmatpush3.bf16.msra.mxu1 %v3675_v28 }
 0xe93   :  { %1800 = vrot.lane.b32.xlu1 %v4744_v63, %s4104_s29  ;;  %1802 = vrot.lane.b32.xlu0 %v4752_v44, %s4104_s29 }
 0xe97   :  { %1804 = vrot.lane.b32.xlu1 %v4763_v19, %s4104_s29 }
 0xef5   :  { %v1875_v32 = vpop.permute.xlu0 %1874 }
 0xef6   :  { %v1886_v36 = vadd.f32 %v1875_v32, %v1850_v31 }
 0xef9   :  { %v1877_v22 = vpop.permute.xlu1 %1876  ;;  %v1843_v23 = vpop.permute.xlu0 %1842 }
 0xefa   :  { %v1887_v33 = vadd.f32 %v1877_v22, %v1851_v47  ;;  %v1852_v44 = vmul.f32 %v1843_v23, %v1769_v17  ;;  %v3950_v22 = vld [vmem:[#allocation5 + $0x8] sm:$0xff] }
 0xefc   :  { %v3802_v40 = vpack.i.bf16 %v1887_v33, %v1886_v36  ;;  %v3951_v33 = vld [vmem:[#allocation5] sm:$0xff] }
 0xefd   :  { %v1845_v29 = vpop.permute.xlu1 %1844  ;;  %v1879_v63 = vpop.permute.xlu0 %1878 }
 0xefe   :  { %3793 = vrot.lane.b32.xlu0 %v3802_v40, %s4103_s24  ;;  %v1853_v62 = vmul.f32 %v1845_v29, %v1775_v50  ;;  %v1888_v3 = vadd.f32 %v1879_v63, %v1852_v44 }
 0xf01   :  { %v1881_v24 = vpop.permute.xlu1 %1880  ;;  %v1799_v19 = vpop.permute.xlu0 %1798 }
 0xf02   :  { %v1889_v27 = vadd.f32 %v1881_v24, %v1853_v62  ;;  %v1810_v39 = vmul.f32 %v1799_v19, %v4791_v7  ;;  %v3952_v62 = vld [vmem:[#allocation5 + $0x10] sm:$0xff]  ;;  %v3953_v19 = vld [vmem:[#allocation5 + $0x18] sm:$0xff] }
 0xf04   :  { %v3807_v53 = vpack.i.bf16 %v1889_v27, %v1888_v3  ;;  %1818 = vrot.lane.b32.xlu0 %v1810_v39, %s4102_s6 }
 0xf05   :  { %v1801_v9 = vpop.permute.xlu1 %1800  ;;  %v1803_v49 = vpop.permute.xlu0 %1802 }
 0xf06   :  { %v1812_v2 = vmul.f32 %v1803_v49, %v1769_v17  ;;  %3798 = vrot.lane.b32.xlu1 %v3807_v53, %s4103_s24  ;;  %v1811_v42 = vmul.f32 %v1801_v9, %v4797_v43  ;;  %v1791_v17 = vmul.f32 %v4770_v18, %v4797_v43 }
 0xf08   :  { %1822 = vrot.lane.b32.xlu0 %v1812_v2, %s4102_s6 }
 0xf09   :  { %v1805_v54 = vpop.permute.xlu1 %1804 }
 0xf0a   :  { %1820 = vrot.lane.b32.xlu1 %v1811_v42, %s4102_s6  ;;  %v1813_v57 = vmul.f32 %v1805_v54, %v1775_v50 }
 0xf0c   :  { %3803 = vrot.lane.b32.xlu0 %v3802_v40, %s4105_s18 }
 0xf0e   :  { %1824 = vrot.lane.b32.xlu1 %v1813_v57, %s4102_s6 }
 0xf12   :  { %3808 = vrot.lane.b32.xlu1 %v3807_v53, %s4105_s18 }
 0xf70   :  { %v3794_v45 = vpop.permute.xlu0 %3793 }
 0xf71   :  { %v3796_v41 = vunpack.i.h.bf16 %v3794_v45  ;;  %v3795_v59 = vunpack.i.l.bf16 %v3794_v45 }
 0xf73   :  { %v3659_v55 = vpack.c.bf16 %v3796_v41, %v3795_v59 }
 0xf75   :  { %3661 = vmatprep.subr.msk.bf16.mxu0 %vm4454_vm2, %v3659_v55 }
 0xf76   :  { %v1819_v61 = vpop.permute.xlu0 %1818  ;;  %3664 = vmatpush3.bf16.xpose.msk.msra.mxu0 %vm4454_vm2, %v3659_v55 }
 0xf77   :  { %v1830_v4 = vadd.f32 %v1819_v61, %v1790_v60 }
 0xf78   :  { %v3799_v6 = vpop.permute.xlu1 %3798 }
 0xf79   :  { %v3801_v8 = vunpack.i.h.bf16 %v3799_v6  ;;  %v3800_v0 = vunpack.i.l.bf16 %v3799_v6  ;;  %2260 = vrot.lane.b32.xlu0 %v1830_v4, %s4106_s22  ;;  %3467 = vmatprep.mubr.msk.f32.mxu0 %vm433_vm1, %v1830_v4 }
 0xf7a   :  { %v1823_v10 = vpop.permute.xlu0 %1822 }
 0xf7b   :  { %v3665_v58 = vpack.c.bf16 %v3801_v8, %v3800_v0  ;;  %v1832_v15 = vadd.f32 %v1823_v10, %v4816_v5 }
 0xf7c   :  { %v1821_v46 = vpop.permute.xlu1 %1820 }
 0xf7d   :  { %v1831_v7 = vadd.f32 %v1821_v46, %v1791_v17  ;;  %2264 = vrot.lane.b32.xlu0 %v1832_v15, %s4106_s22  ;;  %3667 = vmatprep.subr.msk.bf16.mxu0 %vm4454_vm2, %v3665_v58 }
 0xf7e   :  { %v3804_v16 = vpop.permute.xlu0 %3803  ;;  %3670 = vmatpush3.bf16.xpose.msk.msra.mxu0 %vm4454_vm2, %v3665_v58 }
 0xf7f   :  { %v3806_v13 = vunpack.i.h.bf16 %v3804_v16  ;;  %v3805_v48 = vunpack.i.l.bf16 %v3804_v16  ;;  %2262 = vrot.lane.b32.xlu1 %v1831_v7, %s4106_s22 }
 0xf80   :  { %v1825_v50 = vpop.permute.xlu1 %1824 }
 0xf81   :  { %v3683_v5 = vpack.c.bf16 %v3806_v13, %v3805_v48  ;;  %v1833_v11 = vadd.f32 %v1825_v50, %v4822_v21 }
 0xf83   :  { %2266 = vrot.lane.b32.xlu1 %v1833_v11, %s4106_s22  ;;  %3685 = vmatprep.subr.msk.bf16.mxu0 %vm4454_vm2, %v3683_v5 }
 0xf84   :  { %v3809_v18 = vpop.permute.xlu1 %3808 }
 0xf85   :  { %v3811_v43 = vunpack.i.h.bf16 %v3809_v18  ;;  %v3810_v28 = vunpack.i.l.bf16 %v3809_v18  ;;  %3468 = vmatmul.mubr.msk.f32.vlgmr.msra.gmra.mrb[28].mxu0 %vm433_vm1, %v1831_v7 }
 0xf86   :  { %3470 = vmatprep.mubr.msk.f32.mxu0 %vm433_vm1, %v1832_v15  ;;  %3688 = vmatpush3.bf16.xpose.msk.msra.mxu0 %vm4454_vm2, %v3683_v5 }
 0xf87   :  { %v3689_v56 = vpack.c.bf16 %v3811_v43, %v3810_v28 }
 0xf89   :  { %3471 = vmatmul.mubr.msk.f32.gmra.mrb[30].mxu0 %vm433_vm1, %v1833_v11  ;;  %3691 = vmatprep.subr.msk.bf16.mxu0 %vm4454_vm2, %v3689_v56 }
 0xf8e   :  { %3694 = vmatpush3.bf16.xpose.msk.msra.mxu0 %vm4454_vm2, %v3689_v56 }
 0xfeb   :  { %v2261_v21 = vpop.permute.xlu0 %2260 }
 0xfec   :  { %3505 = vmatprep.mubr.msk.f32.mxu0 %vm433_vm1, %v2261_v21 }
 0xfef   :  { %v2265_v32 = vpop.permute.xlu0 %2264 }
 0xff1   :  { %v2263_v30 = vpop.permute.xlu1 %2262 }
 0xff2   :  { %3506 = vmatmul.mubr.msk.f32.vlgmr.msra.gmra.mrb[32].mxu0 %vm433_vm1, %v2263_v30 }
 0xff3   :  { %3508 = vmatprep.mubr.msk.f32.mxu0 %vm433_vm1, %v2265_v32 }
 0xff5   :  { %v2267_v31 = vpop.permute.xlu1 %2266 }
 0xff6   :  { %3509 = vmatmul.mubr.msk.f32.gmra.mrb[34].mxu0 %vm433_vm1, %v2267_v31 }
0x1058   :  { %v3469_v47 = vpop.f32.mrb[28].mxu0 }
0x1059   :  { %v1996_v23 = vadd.f32 %v3950_v22, %v3469_v47  ;;  %v1990_v36 = vpop.f32.mrb[29].mxu0 }
0x105a   :  { %v1991_v40 = vadd.f32 %v3951_v33, %v1990_v36 }
0x105b   :  { %v2012_v14 = vsel %vm129_vm0, %v1996_v23, -inf }
0x105c   :  { %2013 = vmax.xlane.f32.xlu1 %v2012_v14  ;;  %v3472_v29 = vpop.f32.mrb[30].mxu0  ;;  %v2009_v63 = vsel %vm129_vm0, %v1991_v40, -inf }
0x105d   :  { %v2000_v44 = vpop.f32.mrb[31].mxu0  ;;  %2010 = vmax.xlane.f32.xlu0 %v2009_v63  ;;  %v2006_v3 = vadd.f32 %v3953_v19, %v3472_v29 }
0x105e   :  { %v2001_v24 = vadd.f32 %v3952_v62, %v2000_v44 }
0x105f   :  { %v2018_v39 = vsel %vm129_vm0, %v2006_v3, -inf }
0x1060   :  { %v2015_v27 = vsel %vm129_vm0, %v2001_v24, -inf }
0x1061   :  { %2016 = vmax.xlane.f32.xlu0 %v2015_v27 }
0x1065   :  { %2019 = vmax.xlane.f32.xlu0 %v2018_v39 }
0x10c5   :  { %v3507_v53 = vpop.f32.mrb[32].mxu0 }
0x10c6   :  { %v2358_v9 = vpop.f32.mrb[33].mxu0  ;;  %v2364_v13 = vadd.f32 %v3950_v22, %v3507_v53 }
0x10c7   :  { %v2359_v46 = vadd.f32 %v3951_v33, %v2358_v9 }
0x10c8   :  { %v2380_v43 = vsel %vm129_vm0, %v2364_v13, -inf }
0x10c9   :  { %v3510_v49 = vpop.f32.mrb[34].mxu0  ;;  %v2377_v50 = vsel %vm129_vm0, %v2359_v46, -inf }
0x10ca   :  { %v2368_v2 = vpop.f32.mrb[35].mxu0  ;;  %v2374_v11 = vadd.f32 %v3953_v19, %v3510_v49 }
0x10cb   :  { %v2369_v48 = vadd.f32 %v3952_v62, %v2368_v2 }
0x10cc   :  { %v2386_v28 = vsel %vm129_vm0, %v2374_v11, -inf }
0x10cd   :  { %v2383_v18 = vsel %vm129_vm0, %v2369_v48, -inf }
0x10e9   :  { %v2014_v42 = vpop.xlane.xlu1 %2013 }
0x10ea   :  { %v2022_v54 = vsub.f32 %v1996_v23, %v2014_v42  ;;  %v2011_v57 = vpop.xlane.xlu0 %2010 }
0x10eb   :  { %v2021_v45 = vsub.f32 %v1991_v40, %v2011_v57 }
0x10ec   :  { %v2027_v41 = vmul.f32 1.442695, %v2022_v54 }
0x10ed   :  { %v2025_v59 = vmul.f32 1.442695, %v2021_v45 }
0x10ee   :  { %3894 = vpow2.f32 %v2027_v41  ;;  %v2017_v55 = vpop.xlane.xlu0 %2016 }
0x10ef   :  { %3896 = vpow2.f32 %v2025_v59  ;;  %v2023_v60 = vsub.f32 %v2001_v24, %v2017_v55 }
0x10f1   :  { %v2029_v61 = vmul.f32 1.442695, %v2023_v60  ;;  %v2151_v60 = vld [vmem:[#allocation8 + $0x20] sm:$0xff] }
0x10f2   :  { %v2020_v4 = vpop.xlane.xlu0 %2019 }
0x10f3   :  { %3898 = vpow2.f32 %v2029_v61  ;;  %v2024_v6 = vsub.f32 %v2006_v3, %v2020_v4  ;;  %v2152_v61 = vld [vmem:[#allocation8 + $0x28] sm:$0xff] }
0x10f4   :  { %v3679_v4 = vpack.c.bf16 %v2152_v61, %v2151_v60 }
0x10f5   :  { %v2031_v8 = vmul.f32 1.442695, %v2024_v6 }
0x10f6   :  { %3680 = vmatprep.subr.bf16.mxu1 %v3679_v4 }
0x10f7   :  { %3900 = vpow2.f32 %v2031_v8 }
0x10f8   :  { %v3895_v0 = vpop.eup %3894 }
0x10f9   :  { %v3897_v10 = vpop.eup %3896  ;;  %v2036_v58 = vsel %vm129_vm0, %v3895_v0, 0.0 }
0x10fa   :  { %2037 = vadd.xlane.f32.xlu1 %v2036_v58  ;;  %v2033_v15 = vsel %vm129_vm0, %v3897_v10, 0.0 }
0x10fb   :  { %2034 = vadd.xlane.f32.xlu0 %v2033_v15 }
0x10fd   :  { %v3899_v17 = vpop.eup %3898 }
0x10fe   :  { %v2039_v7 = vsel %vm129_vm0, %v3899_v17, 0.0 }
0x10ff   :  { %2040 = vadd.xlane.f32.xlu0 %v2039_v7 }
0x1101   :  { %v3901_v16 = vpop.eup %3900 }
0x1102   :  { %v2042_v5 = vsel %vm129_vm0, %v3901_v16, 0.0 }
0x1103   :  { %2378 = vmax.xlane.f32.xlu0 %v2377_v50  ;;  %2043 = vadd.xlane.f32.xlu1 %v2042_v5 }
0x1107   :  { %2384 = vmax.xlane.f32.xlu0 %v2383_v18  ;;  %2381 = vmax.xlane.f32.xlu1 %v2380_v43 }
0x110b   :  { %2387 = vmax.xlane.f32.xlu1 %v2386_v28 }
0x1187   :  { %v2038_v56 = vpop.xlane.xlu1 %2037 }
0x1188   :  { %3902 = vrcp.f32 %v2038_v56  ;;  %v2035_v21 = vpop.xlane.xlu0 %2034 }
0x1189   :  { %3904 = vrcp.f32 %v2035_v21 }
0x118c   :  { %v2041_v30 = vpop.xlane.xlu0 %2040 }
0x118d   :  { %3906 = vrcp.f32 %v2041_v30 }
0x1190   :  { %v2044_v32 = vpop.xlane.xlu1 %2043  ;;  %v2379_v31 = vpop.xlane.xlu0 %2378 }
0x1191   :  { %3908 = vrcp.f32 %v2044_v32  ;;  %v2389_v47 = vsub.f32 %v2359_v46, %v2379_v31 }
0x1192   :  { %v3903_v22 = vpop.eup %3902 }
0x1193   :  { %v3905_v23 = vpop.eup %3904  ;;  %v2393_v36 = vmul.f32 1.442695, %v2389_v47  ;;  %v2050_v29 = vmul.f32 %v3903_v22, %v3895_v0 }
0x1194   :  { %v2382_v33 = vpop.xlane.xlu1 %2381  ;;  %v2385_v40 = vpop.xlane.xlu0 %2384  ;;  %v2049_v14 = vmul.f32 %v3905_v23, %v3897_v10  ;;  %v3178_v23 = vld [vmem:[%s5065_s8 + $0x1] ss:$0 sm:$0xff] }
0x1195   :  { %3910 = vpow2.f32 %v2393_v36  ;;  %v2390_v63 = vsub.f32 %v2364_v13, %v2382_v33  ;;  %v2391_v44 = vsub.f32 %v2369_v48, %v2385_v40 }
0x1196   :  { %3481 = vmatprep.mubr.msk.f32.mxu1 %vm129_vm0, %v2049_v14 }
0x1197   :  { %v3907_v62 = vpop.eup %3906  ;;  %v2395_v24 = vmul.f32 1.442695, %v2390_v63  ;;  %v2397_v19 = vmul.f32 1.442695, %v2391_v44  ;;  %3482 = vmatmul.mubr.msk.f32.vlgmr.msra.gmra.mrb[16].mxu1 %vm129_vm0, %v2050_v29 }
0x1198   :  { %v2388_v3 = vpop.xlane.xlu1 %2387  ;;  %v2051_v27 = vmul.f32 %v3907_v62, %v3899_v17  ;;  %3682 = vmatpush3.bf16.msra.mxu1 %v3679_v4 }
0x1199   :  { %3912 = vpow2.f32 %v2395_v24  ;;  %v2392_v39 = vsub.f32 %v2374_v11, %v2388_v3 }
0x119a   :  { %3914 = vpow2.f32 %v2397_v19  ;;  %3484 = vmatprep.mubr.msk.f32.mxu1 %vm129_vm0, %v2051_v27 }
0x119b   :  { %v3909_v53 = vpop.eup %3908  ;;  %v2399_v9 = vmul.f32 1.442695, %v2392_v39 }
0x119c   :  { %v2052_v49 = vmul.f32 %v3909_v53, %v3901_v16 }
0x119d   :  { %3916 = vpow2.f32 %v2399_v9 }
0x119e   :  { %3485 = vmatmul.mubr.msk.f32.gmra.mrb[18].mxu1 %vm129_vm0, %v2052_v49 }
0x119f   :  { %v3911_v2 = vpop.eup %3910 }
0x11a0   :  { %v2401_v42 = vsel %vm129_vm0, %v3911_v2, 0.0 }
0x11a1   :  { %2402 = vadd.xlane.f32.xlu0 %v2401_v42 }
0x11a3   :  { %v3913_v54 = vpop.eup %3912 }
0x11a4   :  { %v3915_v57 = vpop.eup %3914  ;;  %v2404_v45 = vsel %vm129_vm0, %v3913_v54, 0.0 }
0x11a5   :  { %2405 = vadd.xlane.f32.xlu1 %v2404_v45  ;;  %v2407_v41 = vsel %vm129_vm0, %v3915_v57, 0.0 }
0x11a6   :  { %2408 = vadd.xlane.f32.xlu0 %v2407_v41 }
0x11a7   :  { %v3917_v59 = vpop.eup %3916 }
0x11a8   :  { %v2410_v55 = vsel %vm129_vm0, %v3917_v59, 0.0 }
0x11a9   :  { %2411 = vadd.xlane.f32.xlu1 %v2410_v55 }
0x11ba   :  { %3818 = vrot.lane.b32.xlu1 %v3817_v25, %s4106_s22 }
0x11bc   :  { %3813 = vrot.lane.b32.xlu0 %v3812_v12, %s4106_s22  ;;  %v2536_v12 = vld [vmem:[#allocation8 + $0x38] sm:$0xff] }
0x11bd   :  { %v3703_v13 = vpack.c.bf16 %v2536_v12, %v2535_v38 }
0x122e   :  { %v2403_v6 = vpop.xlane.xlu0 %2402 }
0x122f   :  { %3918 = vrcp.f32 %v2403_v6 }
0x1232   :  { %v2406_v17 = vpop.xlane.xlu1 %2405 }
0x1233   :  { %v2409_v8 = vpop.xlane.xlu0 %2408  ;;  %3920 = vrcp.f32 %v2406_v17  ;;  %v2720_v17 = vld [vmem:[#allocation10 + $0x28] sm:$0xff] }
0x1234   :  { %3922 = vrcp.f32 %v2409_v8 }
0x1236   :  { %v2412_v46 = vpop.xlane.xlu1 %2411 }
0x1237   :  { %v3814_v0 = vpop.permute.xlu0 %3813  ;;  %3924 = vrcp.f32 %v2412_v46  ;;  %v2721_v46 = vld [vmem:[#allocation10 + $0x30] sm:$0xff] }
0x1238   :  { %v3816_v10 = vunpack.i.h.bf16 %v3814_v0  ;;  %v3815_v58 = vunpack.i.l.bf16 %v3814_v0 }
0x1239   :  { %v3919_v48 = vpop.eup %3918 }
0x123a   :  { %v3695_v15 = vpack.c.bf16 %v3816_v10, %v3815_v58  ;;  %v3819_v26 = vpop.permute.xlu1 %3818  ;;  %v2417_v18 = vmul.f32 %v3919_v48, %v3911_v2 }
0x123b   :  { %v3821_v1 = vunpack.i.h.bf16 %v3819_v26  ;;  %v3820_v25 = vunpack.i.l.bf16 %v3819_v26 }
0x123c   :  { %3696 = vmatprep.subr.bf16.mxu1 %v3695_v15 }
0x123d   :  { %v3699_v16 = vpack.c.bf16 %v3821_v1, %v3820_v25  ;;  %v3921_v11 = vpop.eup %3920  ;;  %v2722_v1 = vld [vmem:[#allocation10 + $0x38] sm:$0xff] }
0x123e   :  { %v3923_v43 = vpop.eup %3922  ;;  %v2418_v28 = vmul.f32 %v3921_v11, %v3913_v54  ;;  %v3711_v25 = vpack.c.bf16 %v2722_v1, %v2721_v46 }
0x123f   :  { %v2419_v21 = vmul.f32 %v3923_v43, %v3915_v57 }
0x1241   :  { %v3925_v56 = vpop.eup %3924 }
0x1242   :  { %v2420_v30 = vmul.f32 %v3925_v56, %v3917_v59  ;;  %v3197_v56 = vld [vmem:[%s5066_s9 + $0x1] ss:$0 sm:$0xff] }
0x126a   :  { %v3483_v7 = vpop.f32.mrb[16].mxu1 }
0x126b   :  { %v2131_v35 = vpop.f32.mrb[17].mxu1 }
0x126c   :  { %3491 = vmatprep.mubr.msk.f32.mxu1 %vm433_vm1, %v2131_v35 }
0x126d   :  { %3492 = vmatmul.mubr.msk.f32.vlgmr.msra.gmra.mrb[20].mxu1 %vm433_vm1, %v3483_v7 }
0x126e   :  { %3698 = vmatpush3.bf16.msra.mxu1 %v3695_v15  ;;  %v2719_v15 = vld [vmem:[#allocation10 + $0x20] sm:$0xff] }
0x126f   :  { %3700 = vmatprep.subr.bf16.mxu1 %v3699_v16  ;;  %v3707_v26 = vpack.c.bf16 %v2720_v17, %v2719_v15 }
0x1271   :  { %v3486_v50 = vpop.f32.mrb[18].mxu1  ;;  %3708 = vmatprep.subr.bf16.mxu0 %v3707_v26 }
0x1272   :  { %3702 = vmatpush3.bf16.msra.mxu1 %v3699_v16  ;;  %v2141_v5 = vpop.f32.mrb[19].mxu1  ;;  %3710 = vmatpush3.bf16.msra.mxu0 %v3707_v26 }
0x1273   :  { %3494 = vmatprep.mubr.msk.f32.mxu1 %vm433_vm1, %v2141_v5  ;;  %3704 = vmatprep.subr.bf16.mxu1 %v3703_v13 }
0x1274   :  { %3495 = vmatmul.mubr.msk.f32.gmra.mrb[22].mxu1 %vm433_vm1, %v3486_v50  ;;  %3712 = vmatprep.subr.bf16.mxu0 %v3711_v25 }
0x1275   :  { %3519 = vmatprep.mubr.msk.f32.mxu1 %vm129_vm0, %v2417_v18 }
0x1276   :  { %3714 = vmatpush3.bf16.msra.mxu0 %v3711_v25 }
0x1278   :  { %3520 = vmatmul.mubr.msk.f32.vlgmr.msra.gmra.mrb[24].mxu1 %vm129_vm0, %v2418_v28 }
0x1279   :  { %3522 = vmatprep.mubr.msk.f32.mxu1 %vm129_vm0, %v2419_v21  ;;  %3706 = vmatpush3.bf16.msra.mxu1 %v3703_v13 }
0x127c   :  { %3523 = vmatmul.mubr.msk.f32.gmra.mrb[26].mxu1 %vm129_vm0, %v2420_v30 }
0x134b   :  { %v3521_v32 = vpop.f32.mrb[24].mxu1 }
0x134c   :  { %v2515_v31 = vpop.f32.mrb[25].mxu1 }
0x134d   :  { %3529 = vmatprep.mubr.msk.f32.mxu1 %vm433_vm1, %v2515_v31  ;;  %v3198_v31 = vld [vmem:[%s5067_s10 + $0x1] ss:$0 sm:$0xff] }
0x134e   :  { %3530 = vmatmul.mubr.msk.f32.vlgmr.msra.gmra.mrb[20].mxu1 %vm433_vm1, %v3521_v32 }
0x134f   :  { %v3524_v47 = vpop.f32.mrb[26].mxu1 }
0x1350   :  { %v2525_v22 = vpop.f32.mrb[27].mxu1 }
0x1351   :  { %3532 = vmatprep.mubr.msk.f32.mxu1 %vm433_vm1, %v2525_v22 }
0x1352   :  { %3533 = vmatmul.mubr.msk.f32.gmra.mrb[22].mxu1 %vm433_vm1, %v3524_v47 }
0x1421   :  { %v3531_v36 = vpop.f32.mrb[20].mxu1 }
0x1422   :  { %v3735_v33 = vadd.f32 %v3531_v36, %v3178_v23  ;;  %v2615_v40 = vpop.f32.mrb[21].mxu1 }
0x1423   :  { %v3736_v14 = vadd.f32 %v3178_v23, %v2615_v40 }
0x1424   :  { %v4927_v29 = vadd.f32 %v3735_v33, %v4670_v37 }
0x1425   :  { %v4930_v63 = vadd.f32 %v3736_v14, %v4672_v20  ;;  %v3534_v44 = vpop.f32.mrb[22].mxu1 }
0x1426   :  { %v3737_v62 = vadd.f32 %v3534_v44, %v3178_v23  ;;  %v2625_v24 = vpop.f32.mrb[23].mxu1  ;;  %v2649_v19 = vsel %vm129_vm0, %v4927_v29, 0.0 }
0x1427   :  { %v3738_v3 = vadd.f32 %v3178_v23, %v2625_v24  ;;  %2650 = vadd.xlane.f32.xlu0 %v2649_v19  ;;  %v2646_v27 = vsel %vm129_vm0, %v4930_v63, 0.0 }
0x1428   :  { %v4937_v39 = vadd.f32 %v3737_v62, %v4684_v51  ;;  %2647 = vadd.xlane.f32.xlu1 %v2646_v27  ;;  %v3205_v27 = vld [vmem:[%s5070_s13 + $0x40] sm:$0xff] }
0x1429   :  { %v4940_v37 = vadd.f32 %v3738_v3, %v4686_v52 }
0x142a   :  { %v2655_v20 = vsel %vm129_vm0, %v4937_v39, 0.0 }
0x142b   :  { %v2652_v53 = vsel %vm129_vm0, %v4940_v37, 0.0 }
0x142c   :  { %2656 = vadd.xlane.f32.xlu1 %v2655_v20  ;;  %2653 = vadd.xlane.f32.xlu0 %v2652_v53  ;;  %v3206_v20 = vld [vmem:[%s5070_s13 + $0x48] sm:$0xff] }
0x142d   :  { %v3715_v53 = vpack.c.bf16 %v3206_v20, %v3205_v27 }
0x142f   :  { %3716 = vmatprep.subr.bf16.mxu1 %v3715_v53 }
0x1430   :  { %3718 = vmatpush3.bf16.msra.mxu1 %v3715_v53 }
0x14b4   :  { %v2651_v9 = vpop.xlane.xlu0 %2650 }
0x14b5   :  { %v2659_v49 = vmul.f32 0.03125, %v2651_v9  ;;  %v2648_v2 = vpop.xlane.xlu1 %2647  ;;  %v3207_v9 = vld [vmem:[%s5070_s13 + $0x50] sm:$0xff] }
0x14b6   :  { %v2658_v42 = vmul.f32 0.03125, %v2648_v2 }
0x14b7   :  { %v2663_v54 = vsub.f32 %v4927_v29, %v2659_v49  ;;  %v3208_v49 = vld [vmem:[%s5070_s13 + $0x58] sm:$0xff] }
0x14b8   :  { %v2662_v51 = vsub.f32 %v4930_v63, %v2658_v42  ;;  %v3719_v2 = vpack.c.bf16 %v3208_v49, %v3207_v9  ;;  %v3209_v42 = vld [vmem:[%s5070_s13 + $0x60] sm:$0xff] }
0x14b9   :  { %v2657_v57 = vpop.xlane.xlu1 %2656  ;;  %v2654_v45 = vpop.xlane.xlu0 %2653  ;;  %v2667_v52 = vmul.f32 %v2663_v54, %v2663_v54 }
0x14ba   :  { %v2661_v41 = vmul.f32 0.03125, %v2657_v57  ;;  %v2660_v59 = vmul.f32 0.03125, %v2654_v45  ;;  %v2666_v55 = vmul.f32 %v2662_v51, %v2662_v51  ;;  %3720 = vmatprep.subr.bf16.mxu1 %v3719_v2  ;;  %v3211_v57 = vld [vmem:[%s5070_s13 + $0x70] sm:$0xff]  ;;  %v3212_v45 = vld [vmem:[%s5070_s13 + $0x78] sm:$0xff] }
0x14bb   :  { %v2673_v60 = vsel %vm129_vm0, %v2667_v52, 0.0  ;;  %3722 = vmatpush3.bf16.msra.mxu1 %v3719_v2  ;;  %v3727_v52 = vpack.c.bf16 %v3212_v45, %v3211_v57 }
0x14bc   :  { %v2665_v61 = vsub.f32 %v4937_v39, %v2661_v41  ;;  %v2664_v4 = vsub.f32 %v4940_v37, %v2660_v59  ;;  %2674 = vadd.xlane.f32.xlu1 %v2673_v60  ;;  %v2670_v6 = vsel %vm129_vm0, %v2666_v55, 0.0  ;;  %v3200_v41 = vld [vmem:[%s5069_s12 + $0x1] ss:$0 sm:$0xff] }
0x14bd   :  { %2671 = vadd.xlane.f32.xlu0 %v2670_v6 }
0x14be   :  { %v2669_v8 = vmul.f32 %v2665_v61, %v2665_v61  ;;  %v2668_v0 = vmul.f32 %v2664_v4, %v2664_v4 }
0x14c0   :  { %v2679_v10 = vsel %vm129_vm0, %v2669_v8, 0.0  ;;  %v2676_v58 = vsel %vm129_vm0, %v2668_v0, 0.0 }
0x14c1   :  { %2680 = vadd.xlane.f32.xlu1 %v2679_v10  ;;  %2677 = vadd.xlane.f32.xlu0 %v2676_v58 }
0x1549   :  { %v2675_v7 = vpop.xlane.xlu1 %2674 }
0x154a   :  { %v2683_v35 = vmul.f32 0.03125, %v2675_v7  ;;  %v2672_v38 = vpop.xlane.xlu0 %2671 }
0x154b   :  { %v2682_v12 = vmul.f32 0.03125, %v2672_v38 }
0x154c   :  { %v2687_v16 = vadd.f32 1e-05, %v2683_v35 }
0x154d   :  { %v2686_v13 = vadd.f32 1e-05, %v2682_v12 }
0x154e   :  { %3926 = vrsqrt.f32 %v2687_v16  ;;  %v2681_v48 = vpop.xlane.xlu1 %2680  ;;  %v2678_v50 = vpop.xlane.xlu0 %2677 }
0x154f   :  { %3928 = vrsqrt.f32 %v2686_v13  ;;  %v2685_v5 = vmul.f32 0.03125, %v2681_v48  ;;  %v2684_v11 = vmul.f32 0.03125, %v2678_v50 }
0x1551   :  { %v2689_v18 = vadd.f32 1e-05, %v2685_v5  ;;  %v2688_v43 = vadd.f32 1e-05, %v2684_v11 }
0x1553   :  { %3930 = vrsqrt.f32 %v2689_v18 }
0x1554   :  { %3932 = vrsqrt.f32 %v2688_v43 }
0x1558   :  { %v3927_v28 = vpop.eup %3926 }
0x1559   :  { %v3929_v21 = vpop.eup %3928  ;;  %v2695_v30 = vmul.f32 %v3927_v28, %v2663_v54  ;;  %v3210_v54 = vld [vmem:[%s5070_s13 + $0x68] sm:$0xff] }
0x155a   :  { %v2694_v32 = vmul.f32 %v3929_v21, %v2662_v51  ;;  %v3723_v51 = vpack.c.bf16 %v3210_v54, %v3209_v42 }
0x155b   :  { %v2705_v47 = vmul.f32 %v3197_v56, %v2695_v30 }
0x155c   :  { %v2704_v22 = vmul.f32 %v3197_v56, %v2694_v32  ;;  %3724 = vmatprep.subr.bf16.mxu1 %v3723_v51 }
0x155d   :  { %v3931_v23 = vpop.eup %3930  ;;  %v2715_v14 = vadd.f32 %v3198_v31, %v2705_v47  ;;  %3726 = vmatpush3.bf16.msra.mxu1 %v3723_v51 }
0x155e   :  { %v3933_v36 = vpop.eup %3932  ;;  %v2714_v33 = vadd.f32 %v3198_v31, %v2704_v22  ;;  %v2697_v40 = vmul.f32 %v3931_v23, %v2665_v61  ;;  %3728 = vmatprep.subr.bf16.mxu1 %v3727_v52 }
0x155f   :  { %v2696_v44 = vmul.f32 %v3933_v36, %v2664_v4 }
0x1560   :  { %3543 = vmatprep.mubr.msk.f32.mxu0 %vm129_vm0, %v2714_v33  ;;  %v2707_v62 = vmul.f32 %v3197_v56, %v2697_v40 }
0x1561   :  { %3544 = vmatmul.mubr.msk.f32.vlgmr.msra.gmra.mrb[36].mxu0 %vm129_vm0, %v2715_v14  ;;  %v2706_v24 = vmul.f32 %v3197_v56, %v2696_v44  ;;  %3730 = vmatpush3.bf16.msra.mxu1 %v3727_v52 }
0x1562   :  { %v2717_v19 = vadd.f32 %v3198_v31, %v2707_v62 }
0x1563   :  { %v2716_v3 = vadd.f32 %v3198_v31, %v2706_v24 }
0x1565   :  { %3546 = vmatprep.mubr.msk.f32.mxu0 %vm129_vm0, %v2716_v3 }
0x1566   :  { %3547 = vmatmul.mubr.msk.f32.gmra.mrb[38].mxu0 %vm129_vm0, %v2717_v19 }
0x1634   :  { %v3545_v59 = vpop.f32.mrb[36].mxu0 }
0x1635   :  { %v4991_v55 = vadd.f32 %v3545_v59, %v3200_v41  ;;  %v2809_v60 = vpop.f32.mrb[37].mxu0 }
0x1636   :  { %v4993_v61 = vadd.f32 %v3200_v41, %v2809_v60 }
0x1637   :  { %v4996_v4 = vmul.f32 0.70710677, %v4991_v55 }
0x1638   :  { %v4999_v6 = vmul.f32 0.70710677, %v4993_v61 }
0x1639   :  { %v2841_v8 = vand.u32 2147483647, %v4996_v4  ;;  %v3548_v0 = vpop.f32.mrb[38].mxu0  ;;  %vm2833_vm8 = vcmp.lt.f32.partialorder %v4996_v4, 0.0 }
0x163a   :  { %v2840_v10 = vand.u32 2147483647, %v4999_v6  ;;  %v5003_v58 = vadd.f32 %v3548_v0, %v3200_v41  ;;  %v2819_v15 = vpop.f32.mrb[39].mxu0  ;;  %vm2832_vm9 = vcmp.lt.f32.partialorder %v4999_v6, 0.0 }
0x163b   :  { %v2845_v17 = vmul.f32 0.3275911, %v2841_v8  ;;  %v5005_v46 = vadd.f32 %v3200_v41, %v2819_v15  ;;  %v2905_v43 = vsub.f32 0.0, %v2841_v8 }
0x163c   :  { %v2844_v26 = vmul.f32 0.3275911, %v2840_v10  ;;  %v5008_v1 = vmul.f32 0.70710677, %v5003_v58  ;;  %v2904_v21 = vsub.f32 0.0, %v2840_v10 }
0x163d   :  { %v2849_v25 = vadd.f32 1.0, %v2845_v17  ;;  %v5011_v7 = vmul.f32 0.70710677, %v5005_v46  ;;  %v2909_v47 = vmul.f32 %v2905_v43, %v2841_v8 }
0x163e   :  { %v2848_v35 = vadd.f32 1.0, %v2844_v26  ;;  %v2843_v38 = vand.u32 2147483647, %v5008_v1  ;;  %v2908_v33 = vmul.f32 %v2904_v21, %v2840_v10  ;;  %vm2835_vm10 = vcmp.lt.f32.partialorder %v5008_v1, 0.0 }
0x163f   :  { %3934 = vrcp.f32 %v2849_v25  ;;  %v2842_v16 = vand.u32 2147483647, %v5011_v7  ;;  %v2914_v3 = vmul.f32 1.442695, %v2909_v47  ;;  %vm2834_vm11 = vcmp.lt.f32.partialorder %v5011_v7, 0.0 }
0x1640   :  { %3936 = vrcp.f32 %v2848_v35  ;;  %v2847_v12 = vmul.f32 0.3275911, %v2843_v38  ;;  %v2907_v40 = vsub.f32 0.0, %v2843_v38  ;;  %v2912_v49 = vmul.f32 1.442695, %v2908_v33 }
0x1641   :  { %v2846_v48 = vmul.f32 0.3275911, %v2842_v16  ;;  %v2906_v53 = vsub.f32 0.0, %v2842_v16  ;;  %v2838_v1 = vsel %vm2834_vm11, -1.0, %v4107_v34 }
0x1642   :  { %v2851_v13 = vadd.f32 1.0, %v2847_v12  ;;  %v2911_v2 = vmul.f32 %v2907_v40, %v2843_v38 }
0x1643   :  { %v2850_v50 = vadd.f32 1.0, %v2846_v48  ;;  %v2910_v59 = vmul.f32 %v2906_v53, %v2842_v16 }
0x1644   :  { %3938 = vrcp.f32 %v2851_v13  ;;  %v2918_v8 = vmul.f32 1.442695, %v2911_v2 }
0x1645   :  { %3940 = vrcp.f32 %v2850_v50  ;;  %v2916_v38 = vmul.f32 1.442695, %v2910_v59 }
0x1646   :  { %3942 = vpow2.f32 %v2914_v3 }
0x1647   :  { %3944 = vpow2.f32 %v2912_v49  ;;  %v2932_v49 = vmul.f32 0.5, %v4993_v61 }
0x1648   :  { %3946 = vpow2.f32 %v2918_v8  ;;  %v2935_v8 = vmul.f32 0.5, %v5003_v58 }
0x1649   :  { %v3935_v5 = vpop.eup %3934  ;;  %3948 = vpow2.f32 %v2916_v38 }
0x164a   :  { %v3937_v11 = vpop.eup %3936  ;;  %v2857_v18 = vmul.f32 %v3935_v5, %v2849_v25 }
0x164b   :  { %v2856_v28 = vmul.f32 %v3937_v11, %v2848_v35 }
0x164c   :  { %v2861_v56 = vsub.f32 2.0, %v2857_v18 }
0x164d   :  { %v2860_v30 = vsub.f32 2.0, %v2856_v28 }
0x164e   :  { %v3939_v32 = vpop.eup %3938  ;;  %v2865_v31 = vmul.f32 %v3935_v5, %v2861_v56 }
0x164f   :  { %v2864_v22 = vmul.f32 %v3937_v11, %v2860_v30  ;;  %v2859_v23 = vmul.f32 %v3939_v32, %v2851_v13  ;;  %v3941_v14 = vpop.eup %3940 }
0x1650   :  { %v2869_v36 = vmul.f32 1.0614054, %v2865_v31  ;;  %v2858_v19 = vmul.f32 %v3941_v14, %v2850_v50  ;;  %v3943_v56 = vpop.eup %3942 }
0x1651   :  { %v2868_v44 = vmul.f32 1.0614054, %v2864_v22  ;;  %v2863_v62 = vsub.f32 2.0, %v2859_v23 }
0x1652   :  { %v2873_v24 = vadd.f32 -1.4531521, %v2869_v36  ;;  %v2862_v42 = vsub.f32 2.0, %v2858_v19 }
0x1653   :  { %v2872_v27 = vadd.f32 -1.4531521, %v2868_v44  ;;  %v2867_v20 = vmul.f32 %v3939_v32, %v2863_v62  ;;  %v3945_v32 = vpop.eup %3944  ;;  %v2837_v44 = vsel %vm2833_vm8, -1.0, %v4107_v34 }
0x1654   :  { %v2877_v9 = vmul.f32 %v2873_v24, %v2865_v31  ;;  %v2866_v45 = vmul.f32 %v3941_v14, %v2862_v42 }
0x1655   :  { %v2876_v54 = vmul.f32 %v2872_v27, %v2864_v22  ;;  %v2871_v51 = vmul.f32 1.0614054, %v2867_v20 }
0x1656   :  { %v2881_v57 = vadd.f32 1.4214138, %v2877_v9  ;;  %v2870_v0 = vmul.f32 1.0614054, %v2866_v45 }
0x1657   :  { %v2880_v52 = vadd.f32 1.4214138, %v2876_v54  ;;  %v2875_v41 = vadd.f32 -1.4531521, %v2871_v51  ;;  %v2933_v54 = vmul.f32 0.5, %v4991_v55 }
0x1658   :  { %v2885_v60 = vmul.f32 %v2881_v57, %v2865_v31  ;;  %v2874_v26 = vadd.f32 -1.4531521, %v2870_v0 }
0x1659   :  { %v2884_v10 = vmul.f32 %v2880_v52, %v2864_v22  ;;  %v2879_v15 = vmul.f32 %v2875_v41, %v2867_v20 }
0x165a   :  { %v2889_v17 = vadd.f32 -0.28449672, %v2885_v60  ;;  %v2878_v13 = vmul.f32 %v2874_v26, %v2866_v45  ;;  %v2934_v60 = vmul.f32 0.5, %v5005_v46 }
0x165b   :  { %v2888_v25 = vadd.f32 -0.28449672, %v2884_v10  ;;  %v2883_v35 = vadd.f32 1.4214138, %v2879_v15 }
0x165c   :  { %v2893_v12 = vmul.f32 %v2889_v17, %v2865_v31  ;;  %v2882_v11 = vadd.f32 1.4214138, %v2878_v13 }
0x165d   :  { %v2892_v48 = vmul.f32 %v2888_v25, %v2864_v22  ;;  %v2887_v50 = vmul.f32 %v2883_v35, %v2867_v20 }
0x165e   :  { %v2897_v5 = vadd.f32 0.2548296, %v2893_v12  ;;  %v2886_v28 = vmul.f32 %v2882_v11, %v2866_v45 }
0x165f   :  { %v2896_v18 = vadd.f32 0.2548296, %v2892_v48  ;;  %v2891_v16 = vadd.f32 -0.28449672, %v2887_v50 }
0x1660   :  { %v2901_v43 = vmul.f32 %v2897_v5, %v2865_v31  ;;  %v2890_v23 = vadd.f32 -0.28449672, %v2886_v28  ;;  %v3947_v31 = vpop.eup %3946 }
0x1661   :  { %v2900_v21 = vmul.f32 %v2896_v18, %v2864_v22  ;;  %v2895_v30 = vmul.f32 %v2891_v16, %v2867_v20  ;;  %v2836_v22 = vsel %vm2832_vm9, -1.0, %v4107_v34  ;;  %v3949_v6 = vpop.eup %3948 }
0x1662   :  { %v2921_v47 = vmul.f32 %v3943_v56, %v2901_v43  ;;  %v2894_v14 = vmul.f32 %v2890_v23, %v2866_v45 }
0x1663   :  { %v2920_v36 = vmul.f32 %v3945_v32, %v2900_v21  ;;  %v2899_v33 = vadd.f32 0.2548296, %v2895_v30 }
0x1664   :  { %v2925_v40 = vsub.f32 1.0, %v2921_v47  ;;  %v2898_v3 = vadd.f32 0.2548296, %v2894_v14 }
0x1665   :  { %v2924_v62 = vsub.f32 1.0, %v2920_v36  ;;  %v2903_v24 = vmul.f32 %v2899_v33, %v2867_v20  ;;  %v2839_v20 = vsel %vm2835_vm10, -1.0, %v4107_v34  ;;  %v3218_v34 = vld [vmem:[%s5071_s14 + $0x1] ss:$0 sm:$0xff]  ;;  %s4064_s14 = scalar_lea.vmem %s3077_s5, 1024 }
0x1666   :  { %v2929_v19 = vmul.f32 %v2925_v40, %v2837_v44  ;;  %v2902_v9 = vmul.f32 %v2898_v3, %v2866_v45  ;;  %p4065_p12 = scmp.ne.s32.totalorder %s3077_s5, %s4064_s14  ;;  %p4070_p0 = scmp.lt.s32.totalorder %s4064_s14, %s4064_s14 }
0x1667   :  { %v2928_v27 = vmul.f32 %v2924_v62, %v2836_v22  ;;  %v2923_v4 = vmul.f32 %v3947_v31, %v2903_v24 }
0x1668   :  { %v2937_v53 = vadd.f32 1.0, %v2929_v19  ;;  %v2922_v51 = vmul.f32 %v3949_v6, %v2902_v9  ;;  %p4071_p1 = por %p4070_p0, %p4069_p13 }
0x1669   :  { %v2936_v2 = vadd.f32 1.0, %v2928_v27  ;;  %v2927_v42 = vsub.f32 1.0, %v2923_v4 }
0x166a   :  { %v2941_v41 = vmul.f32 %v2937_v53, %v2933_v54  ;;  %v2926_v59 = vsub.f32 1.0, %v2922_v51  ;;  %p4072_p2 = pnand %p4071_p1, %p4065_p12 }
0x166b   :  { %v2940_v57 = vmul.f32 %v2936_v2, %v2932_v49  ;;  %v2931_v52 = vmul.f32 %v2927_v42, %v2839_v20 }
0x166c   :  { %v2930_v45 = vmul.f32 %v2926_v59, %v2838_v1 }
0x166d   :  { %3565 = vmatprep.mubr.msk.f32.mxu1 %vm1477_vm6, %v2940_v57  ;;  %v2939_v61 = vadd.f32 1.0, %v2931_v52 }
0x166e   :  { %3566 = vmatmul.mubr.msk.f32.vlgmr.msra.gmra.mrb[28].mxu1 %vm1477_vm6, %v2941_v41  ;;  %v2938_v55 = vadd.f32 1.0, %v2930_v45 }
0x166f   :  { %v2943_v7 = vmul.f32 %v2939_v61, %v2935_v8 }
0x1670   :  { %v2942_v0 = vmul.f32 %v2938_v55, %v2934_v60 }
0x1672   :  { %3568 = vmatprep.mubr.msk.f32.mxu1 %vm1477_vm6, %v2942_v0 }
0x1673   :  { %3569 = vmatmul.mubr.msk.f32.gmra.mrb[30].mxu1 %vm1477_vm6, %v2943_v7 }
0x1741   :  { %v3567_v10 = vpop.f32.mrb[28].mxu1 }
0x1742   :  { %v3051_v15 = vadd.f32 %v3567_v10, %v4927_v29  ;;  %v3031_v17 = vpop.f32.mrb[29].mxu1 }
0x1743   :  { %v3050_v26 = vadd.f32 %v3031_v17, %v4930_v63 }
0x1744   :  { %v3063_v46 = vadd.f32 %v3218_v34, %v3051_v15 }
0x1745   :  { %v3062_v25 = vadd.f32 %v3218_v34, %v3050_v26 }
0x1746   :  { %3068 = vst.msk [vmem:[#allocation11 + $0x28] sm:$0xff] %vm129_vm0, %v3063_v46  ;;  %v3570_v58 = vpop.f32.mrb[30].mxu1 }
0x1747   :  { %3067 = vst.msk [vmem:[#allocation11 + $0x20] sm:$0xff] %vm129_vm0, %v3062_v25  ;;  %v3053_v35 = vadd.f32 %v3570_v58, %v4937_v39  ;;  %v3041_v38 = vpop.f32.mrb[31].mxu1 }
0x1748   :  { %v3052_v12 = vadd.f32 %v3041_v38, %v4940_v37 }
0x1749   :  { %v3065_v13 = vadd.f32 %v3218_v34, %v3053_v35 }
0x174a   :  { %v3064_v48 = vadd.f32 %v3218_v34, %v3052_v12 }
0x174b   :  { %3070 = vst.msk [vmem:[#allocation11 + $0x38] sm:$0xff] %vm129_vm0, %v3065_v13 }
0x174c   :  { %3069 = vst.msk [vmem:[#allocation11 + $0x30] sm:$0xff] %vm129_vm0, %v3064_v48 }
0x174d   :  { %4075 = shalt.err (!%p4072_p2)
}
0x174e   :  { %s4076_s24 = scalar_lea.hbm %s5072_s15, 1024 }
0x174f   :  { %p4077_p3 = scmp.ne.s32.totalorder %s5072_s15, %s4076_s24  ;;  %p4080_p4 = scmp.lt.u32.totalorder %s4076_s24, %s5072_s15 }
0x1751   :  { %p4082_p5 = pnand %p4080_p4, %p4077_p3 }
0x1753   :  { %4085 = shalt.err (!%p4082_p5)
}
0x1754   :  { %3082 = dma.vmem_to_hbm [thread:$0]  %s3077_s5, 1024, %s5072_s15, [#allocation4], %s4096_s30, %s4096_s30, %s4097_s16  }
0x1755   :  { %4092 = dma.done.wait [#allocation4], 1024  }
0x1756   :  { %4093 = vsyncadd [#allocation4], 4294966272 }
0x1757   :  { %3086 = vsyncpa [#allocation3], 1 }
0x1758   :  { %3087 = vsyncpa [#allocation6], 1 }
0x1759   :  { %3088 = vsyncpa [#allocation9], 1 }
0x175a   :  { %3089 = vsyncpa [#allocation4], 1 }

</bundles_post_ra>
